<compile_context>
chip_gen: v6e
topology: v6e:2x2x1
jax: 0.10.0
libtpu: 0.0.40
codegen_flags: <defaults>
</compile_context>

<pallas_src>
import math

import numpy as np

import jax
import jax.numpy as jnp
from jax.experimental import pallas as pl
from jax.experimental.pallas import tpu as pltpu

# ---------------- small synthetic config (mirrors modeling.py shapes) ----------
IMG = 16            # img_size
PATCH = 4           # config.patches['size']
IN_CH = 4           # in_channels
HIDDEN = 32         # config.hidden_size
NUM_HEADS = 4       # config.transformer['num_heads']
HEAD_DIM = HIDDEN // NUM_HEADS
MLP_DIM = 64        # config.transformer['mlp_dim']
NUM_LAYERS = 2      # config.transformer['num_layers']
NUM_CLASSES = 10    # num_classes
N_PATCHES = (IMG // PATCH) ** 2
SEQ = N_PATCHES + 1                 # 17 (cls + patches)
SEQ_PAD = 24                        # per-image rows, padded to multiple of 8
PATCH_DIM = IN_CH * PATCH * PATCH   # 64
LN_EPS = 1e-6
HEAD_PAD = 128                      # lane-dense logits slab (10 -> 128 lanes)


# ------------------------------ fused Pallas kernel -----------------------------
def _vit_kernel(patches_ref, keybias_ref, convw_ref, addpos_ref,
                ln1g_ref, ln1b_ref, wqkv_ref, bqkv_ref, wo_ref, bo_ref,
                ln2g_ref, ln2b_ref, w1_ref, b1_ref, w2_ref, b2_ref,
                encg_ref, encb_ref, headw_ref, headb_ref,
                o_ref):
    f32 = jnp.float32
    m_rows = patches_ref.shape[1]          # B_BLK * SEQ_PAD  (static)
    b_blk = m_rows // SEQ_PAD

    def layernorm(x, g, b):
        mu = jnp.mean(x, axis=-1, keepdims=True)
        var = jnp.mean(jnp.square(x - mu), axis=-1, keepdims=True)
        # NOTE: padded rows are all-zero -> var==0 -> rsqrt(1e-6); result is
        # finite garbage and never read (masked out of attention, discarded at
        # the head).  Do not start reading those rows.
        return (x - mu) * jax.lax.rsqrt(var + LN_EPS) * g + b

    # block-diagonal key bias (host-built constant): a query row attends only
    # to keys of the SAME image and only its SEQ valid positions; masked
    # entries get -1e30 (exp underflows to exactly 0, no NaN).
    key_bias = keybias_ref[...]            # [m_rows, m_rows]

    # ---- patch embedding (Conv2d stride==kernel as matmul) + cls/pos ----
    # conv bias & cls token & position embedding are pre-folded into addpos;
    # cls / padded rows of `patches` are zero so they contribute nothing.
    h = (jnp.dot(patches_ref[0], convw_ref[...], preferred_element_type=f32)
         + addpos_ref[...])                                      # [m, HIDDEN]

    inv_sqrt2 = 1.0 / math.sqrt(2.0)

    for l in range(NUM_LAYERS):
        # ---------------- attention sub-block ----------------
        xn = layernorm(h, ln1g_ref[l], ln1b_ref[l])
        qkv = (jnp.dot(xn, wqkv_ref[l], preferred_element_type=f32)
               + bqkv_ref[l])                                    # [m, 3*HIDDEN]
        q = qkv[:, 0:HIDDEN]            # 1/sqrt(HEAD_DIM) folded in at pack time
        k = qkv[:, HIDDEN:2 * HIDDEN]
        v = qkv[:, 2 * HIDDEN:3 * HIDDEN]

        ctx_heads = []
        for hh in range(NUM_HEADS):
            sl = slice(hh * HEAD_DIM, (hh + 1) * HEAD_DIM)
            s = jax.lax.dot_general(q[:, sl], k[:, sl],
                                    (((1,), (1,)), ((), ())),
                                    preferred_element_type=f32)  # [m, m]
            s = s + key_bias
            s = s - jnp.max(s, axis=-1, keepdims=True)
            p = jnp.exp(s)
            p = p / jnp.sum(p, axis=-1, keepdims=True)
            ctx_heads.append(jnp.dot(p, v[:, sl],
                                     preferred_element_type=f32))  # [m, HEAD_DIM]
        # merged output projection: one K=32 matmul instead of 4 K=8 + adds
        ctx = jnp.concatenate(ctx_heads, axis=1)                 # [m, HIDDEN]
        attn = jnp.dot(ctx, wo_ref[l], preferred_element_type=f32) + bo_ref[l]
        h = h + attn

        # ---------------- MLP sub-block ----------------
        xn = layernorm(h, ln2g_ref[l], ln2b_ref[l])
        y = jnp.dot(xn, w1_ref[l], preferred_element_type=f32) + b1_ref[l]
        # exact erf-based GELU (PyTorch F.gelu default), runs on the EUP
        y = 0.5 * y * (1.0 + jax.lax.erf(y * inv_sqrt2))
        y = jnp.dot(y, w2_ref[l], preferred_element_type=f32) + b2_ref[l]
        h = h + y

    # ---- encoder_norm + classification head on each image's cls row ----
    hn = layernorm(h, encg_ref[...], encb_ref[...])
    cls_rows = [hn[i * SEQ_PAD:i * SEQ_PAD + 1, :] for i in range(b_blk)]
    cls_tok = cls_rows[0] if b_blk == 1 else jnp.concatenate(cls_rows, axis=0)
    logits = (jnp.dot(cls_tok, headw_ref[...], preferred_element_type=f32)
              + headb_ref[...])                                  # [b_blk, 128]
    o_ref[0] = logits


def _full_spec(a):
    # whole array resident in VMEM; constant block index across the grid so it
    # is DMA'd only once (no per-step refetch).
    return pl.BlockSpec(a.shape, lambda i, n=a.ndim: (0,) * n)


def _choose_b_blk(b):
    # Target ~256 M rows per step to fill the v6e/v7x MXU (v5e's 128 is a
    # subset of this), but keep >= 2 grid steps when possible so v7x's two
    # TensorCores both get work via the "parallel" grid axis.
    target = max(1, 256 // SEQ_PAD)           # ~10 images
    if b >= 2:
        target = min(target, -(-b // 2))      # at least 2 steps
    return max(1, min(b, target))


# ------------------------------ forward wrapper ----------------------------------
def vit_forward(packed, x, b_blk=None):
    b = x.shape[0]
    if b_blk is None:
        b_blk = _choose_b_blk(b)
    num_steps = -(-b // b_blk)
    m = b_blk * SEQ_PAD
    g = IMG // PATCH

    # unfold NCHW image into patch rows flattened as (C, ph, pw) — matches the
    # Conv2d weight flattening; pure reshape/transpose glue.
    xp = x.reshape(b, IN_CH, g, PATCH, g, PATCH).transpose(0, 2, 4, 1, 3, 5)
    xp = xp.reshape(b, N_PATCHES, PATCH_DIM)
    # row 0 of each image reserved for the cls token, rows SEQ..SEQ_PAD-1 are
    # padding (all zero); pad the batch up to a multiple of b_blk.
    patches = jnp.pad(xp, ((0, num_steps * b_blk - b),
                           (1, SEQ_PAD - 1 - N_PATCHES), (0, 0)))
    patches = patches.reshape(num_steps, m, PATCH_DIM)

    # per-step additive slab (cls + pos + conv bias), tiled for b_blk images
    addpos = jnp.tile(packed["addpos"], (b_blk, 1))              # [m, HIDDEN]

    # block-diagonal key mask, built once on the host (pure constant).
    ridx = np.arange(m)
    same_img = (ridx[:, None] // SEQ_PAD) == (ridx[None, :] // SEQ_PAD)
    key_valid = (ridx[None, :] % SEQ_PAD) < SEQ
    key_bias = jnp.asarray(np.where(same_img & key_valid, 0.0, -1e30),
                           dtype=jnp.float32)                    # [m, m]

    weight_args = [
        packed["conv_wf"], addpos,
        packed["ln1_g"], packed["ln1_b"], packed["wqkv"], packed["bqkv"],
        packed["wo"], packed["bo"], packed["ln2_g"], packed["ln2_b"],
        packed["w1"], packed["b1"], packed["w2"], packed["b2"],
        packed["enc_g"], packed["enc_b"], packed["head_w"], packed["head_b"],
    ]
    in_specs = [pl.BlockSpec((1, m, PATCH_DIM), lambda i: (i, 0, 0)),
                _full_spec(key_bias)]
    in_specs += [_full_spec(a) for a in weight_args]

    out = pl.pallas_call(
        _vit_kernel,
        grid=(num_steps,),
        in_specs=in_specs,
        out_specs=pl.BlockSpec((1, b_blk, HEAD_PAD), lambda i: (i, 0, 0)),
        out_shape=jax.ShapeDtypeStruct((num_steps, b_blk, HEAD_PAD), jnp.float32),
        compiler_params=pltpu.CompilerParams(
            dimension_semantics=("parallel",),
            vmem_limit_bytes=32 * 1024 * 1024),
    )(patches, key_bias, *weight_args)

    logits = out.reshape(num_steps * b_blk, HEAD_PAD)[:b, :NUM_CLASSES]
    attn_weights = []   # vis=False -> attention weights not collected
    return logits, attn_weights


# ------------------------------ parameters ----------------------------------------
def init_params(key):
    """Raw parameters in PyTorch layout (Linear weight = [out, in], Conv2d =
    [out, in, kh, kw]) so the forward semantics match modeling.py exactly."""
    keys = iter(jax.random.split(key, 128))

    def rnd(shape, scale=0.02):
        return (scale * jax.random.normal(next(keys), shape)).astype(jnp.float32)

    params = {
        "conv_w": rnd((HIDDEN, IN_CH, PATCH, PATCH)),
        "conv_b": rnd((HIDDEN,)),
        "cls": rnd((1, 1, HIDDEN)),
        "pos": rnd((1, SEQ, HIDDEN)),
        "enc_norm_g": jnp.ones((HIDDEN,), jnp.float32),
        "enc_norm_b": jnp.zeros((HIDDEN,), jnp.float32),
        "head_w": rnd((NUM_CLASSES, HIDDEN)),
        "head_b": rnd((NUM_CLASSES,)),
        "blocks": [],
    }
    for _ in range(NUM_LAYERS):
        params["blocks"].append({
            "ln1_g": jnp.ones((HIDDEN,), jnp.float32),
            "ln1_b": jnp.zeros((HIDDEN,), jnp.float32),
            "wq": rnd((HIDDEN, HIDDEN)), "bq": rnd((HIDDEN,)),
            "wk": rnd((HIDDEN, HIDDEN)), "bk": rnd((HIDDEN,)),
            "wv": rnd((HIDDEN, HIDDEN)), "bv": rnd((HIDDEN,)),
            "wo": rnd((HIDDEN, HIDDEN)), "bo": rnd((HIDDEN,)),
            "ln2_g": jnp.ones((HIDDEN,), jnp.float32),
            "ln2_b": jnp.zeros((HIDDEN,), jnp.float32),
            "w1": rnd((MLP_DIM, HIDDEN)), "b1": rnd((MLP_DIM,)),
            "w2": rnd((HIDDEN, MLP_DIM)), "b2": rnd((HIDDEN,)),
        })
    return params


def pack_params(raw):
    """One-time packing: pre-transpose every Linear weight to [in, out], fuse
    Q/K/V (with 1/sqrt(HEAD_DIM) folded into the Q columns), stack per-layer
    weights with a leading layer axis, reshape biases to [1, n], fold cls
    token / position embedding / conv bias into one additive [SEQ_PAD, HIDDEN]
    slab, and zero-pad the head to 128 output lanes for a lane-dense store."""
    conv_wf = raw["conv_w"].reshape(HIDDEN, PATCH_DIM).T            # [64, 32]

    pos = raw["pos"][0]                                             # [SEQ, H]
    cls = raw["cls"][0, 0]                                          # [H]
    addpos = jnp.zeros((SEQ_PAD, HIDDEN), jnp.float32)
    addpos = addpos.at[0].set(cls + pos[0])
    addpos = addpos.at[1:SEQ].set(pos[1:] + raw["conv_b"][None, :])

    scale = 1.0 / math.sqrt(HEAD_DIM)

    def stack(fn):
        return jnp.stack([fn(blk) for blk in raw["blocks"]], axis=0)

    head_w = jnp.zeros((HIDDEN, HEAD_PAD), jnp.float32)
    head_w = head_w.at[:, :NUM_CLASSES].set(raw["head_w"].T)        # [H, 128]
    head_b = jnp.zeros((1, HEAD_PAD), jnp.float32)
    head_b = head_b.at[0, :NUM_CLASSES].set(raw["head_b"])          # [1, 128]

    return {
        "conv_wf": conv_wf,
        "addpos": addpos,
        "ln1_g": stack(lambda b: b["ln1_g"][None, :]),              # [L,1,H]
        "ln1_b": stack(lambda b: b["ln1_b"][None, :]),
        "wqkv": stack(lambda b: jnp.concatenate(
            [b["wq"].T * scale, b["wk"].T, b["wv"].T], axis=1)),    # [L,H,3H]
        "bqkv": stack(lambda b: jnp.concatenate(
            [b["bq"] * scale, b["bk"], b["bv"]])[None, :]),         # [L,1,3H]
        "wo": stack(lambda b: b["wo"].T),                           # [L,H,H]
        "bo": stack(lambda b: b["bo"][None, :]),
        "ln2_g": stack(lambda b: b["ln2_g"][None, :]),
        "ln2_b": stack(lambda b: b["ln2_b"][None, :]),
        "w1": stack(lambda b: b["w1"].T),                           # [L,H,MLP]
        "b1": stack(lambda b: b["b1"][None, :]),
        "w2": stack(lambda b: b["w2"].T),                           # [L,MLP,H]
        "b2": stack(lambda b: b["b2"][None, :]),
        "enc_g": raw["enc_norm_g"][None, :],
        "enc_b": raw["enc_norm_b"][None, :],
        "head_w": head_w,                                           # [H,128]
        "head_b": head_b,                                           # [1,128]
    }


# ------------------------------ main ----------------------------------------------
if __name__ == "__main__":
    key = jax.random.PRNGKey(0)
    pkey, xkey = jax.random.split(key)
    params = init_params(pkey)
    packed = pack_params(params)                      # one-time weight packing
    x = jax.random.normal(xkey, (2, IN_CH, IMG, IMG), dtype=jnp.float32)  # NCHW

    # default: auto-chosen batch block (here 1 image/step, 2 parallel steps)
    logits, attn_weights = jax.jit(vit_forward)(packed, x)
    logits = jax.block_until_ready(logits)
    assert logits.shape == (2, NUM_CLASSES)
    assert bool(jnp.all(jnp.isfinite(logits)))

    # batch-folding path (2 images folded into one M=48 step, block-diagonal
    # attention mask) must agree with the per-image path.
    logits_folded, _ = jax.jit(lambda p, xx: vit_forward(p, xx, b_blk=2))(packed, x)
    logits_folded = jax.block_until_ready(logits_folded)
    assert bool(jnp.allclose(logits, logits_folded, atol=1e-4, rtol=1e-4))

    print("KERNEL_OK")
</pallas_src>

<mosaic_0001>
module attributes {stable_mosaic.version = 11 : i64} {
  func.func @_vit_kernel(%arg0: i32, %arg1: memref<1x24x64xf32, #tpu.memory_space<vmem>>, %arg2: memref<24x24xf32, #tpu.memory_space<vmem>>, %arg3: memref<64x32xf32, #tpu.memory_space<vmem>>, %arg4: memref<24x32xf32, #tpu.memory_space<vmem>>, %arg5: memref<2x1x32xf32, #tpu.memory_space<vmem>>, %arg6: memref<2x1x32xf32, #tpu.memory_space<vmem>>, %arg7: memref<2x32x96xf32, #tpu.memory_space<vmem>>, %arg8: memref<2x1x96xf32, #tpu.memory_space<vmem>>, %arg9: memref<2x32x32xf32, #tpu.memory_space<vmem>>, %arg10: memref<2x1x32xf32, #tpu.memory_space<vmem>>, %arg11: memref<2x1x32xf32, #tpu.memory_space<vmem>>, %arg12: memref<2x1x32xf32, #tpu.memory_space<vmem>>, %arg13: memref<2x32x64xf32, #tpu.memory_space<vmem>>, %arg14: memref<2x1x64xf32, #tpu.memory_space<vmem>>, %arg15: memref<2x64x32xf32, #tpu.memory_space<vmem>>, %arg16: memref<2x1x32xf32, #tpu.memory_space<vmem>>, %arg17: memref<1x32xf32, #tpu.memory_space<vmem>>, %arg18: memref<1x32xf32, #tpu.memory_space<vmem>>, %arg19: memref<32x128xf32, #tpu.memory_space<vmem>>, %arg20: memref<1x128xf32, #tpu.memory_space<vmem>>, %arg21: memref<1x1x128xf32, #tpu.memory_space<vmem>>) attributes {dimension_semantics = [#tpu.dimension_semantics<parallel>], iteration_bounds = array<i64: 2>, scalar_prefetch = 0 : i64, scratch_operands = 0 : i64, tpu.core_type = #tpu.core_type<tc>, window_params = [{transform_indices = @transform_0, window_bounds = array<i64: 1, 24, 64>}, {pipeline_mode = #tpu.pipeline_mode<synchronous>, transform_indices = @transform_1, window_bounds = array<i64: 24, 24>}, {pipeline_mode = #tpu.pipeline_mode<synchronous>, transform_indices = @transform_2, window_bounds = array<i64: 64, 32>}, {pipeline_mode = #tpu.pipeline_mode<synchronous>, transform_indices = @transform_3, window_bounds = array<i64: 24, 32>}, {pipeline_mode = #tpu.pipeline_mode<synchronous>, transform_indices = @transform_4, window_bounds = array<i64: 2, 1, 32>}, {pipeline_mode = #tpu.pipeline_mode<synchronous>, transform_indices = @transform_5, window_bounds = array<i64: 2, 1, 32>}, {pipeline_mode = #tpu.pipeline_mode<synchronous>, transform_indices = @transform_6, window_bounds = array<i64: 2, 32, 96>}, {pipeline_mode = #tpu.pipeline_mode<synchronous>, transform_indices = @transform_7, window_bounds = array<i64: 2, 1, 96>}, {pipeline_mode = #tpu.pipeline_mode<synchronous>, transform_indices = @transform_8, window_bounds = array<i64: 2, 32, 32>}, {pipeline_mode = #tpu.pipeline_mode<synchronous>, transform_indices = @transform_9, window_bounds = array<i64: 2, 1, 32>}, {pipeline_mode = #tpu.pipeline_mode<synchronous>, transform_indices = @transform_10, window_bounds = array<i64: 2, 1, 32>}, {pipeline_mode = #tpu.pipeline_mode<synchronous>, transform_indices = @transform_11, window_bounds = array<i64: 2, 1, 32>}, {pipeline_mode = #tpu.pipeline_mode<synchronous>, transform_indices = @transform_12, window_bounds = array<i64: 2, 32, 64>}, {pipeline_mode = #tpu.pipeline_mode<synchronous>, transform_indices = @transform_13, window_bounds = array<i64: 2, 1, 64>}, {pipeline_mode = #tpu.pipeline_mode<synchronous>, transform_indices = @transform_14, window_bounds = array<i64: 2, 64, 32>}, {pipeline_mode = #tpu.pipeline_mode<synchronous>, transform_indices = @transform_15, window_bounds = array<i64: 2, 1, 32>}, {pipeline_mode = #tpu.pipeline_mode<synchronous>, transform_indices = @transform_16, window_bounds = array<i64: 1, 32>}, {pipeline_mode = #tpu.pipeline_mode<synchronous>, transform_indices = @transform_17, window_bounds = array<i64: 1, 32>}, {pipeline_mode = #tpu.pipeline_mode<synchronous>, transform_indices = @transform_18, window_bounds = array<i64: 32, 128>}, {pipeline_mode = #tpu.pipeline_mode<synchronous>, transform_indices = @transform_19, window_bounds = array<i64: 1, 128>}, {transform_indices = @transform_20, window_bounds = array<i64: 1, 1, 128>}]} {
    %c0 = arith.constant 0 : index
    %c0_0 = arith.constant 0 : index
    %0 = vector.load %arg2[%c0, %c0_0] : memref<24x24xf32, #tpu.memory_space<vmem>>, vector<24x24xf32>
    %c0_1 = arith.constant 0 : index
    %c0_2 = arith.constant 0 : index
    %c0_3 = arith.constant 0 : index
    %1 = vector.load %arg1[%c0_1, %c0_2, %c0_3] : memref<1x24x64xf32, #tpu.memory_space<vmem>>, vector<1x24x64xf32>
    %2 = vector.shape_cast %1 : vector<1x24x64xf32> to vector<24x64xf32>
    %c0_4 = arith.constant 0 : index
    %c0_5 = arith.constant 0 : index
    %3 = vector.load %arg3[%c0_4, %c0_5] : memref<64x32xf32, #tpu.memory_space<vmem>>, vector<64x32xf32>
    %cst = arith.constant dense<0.000000e+00> : vector<24x32xf32>
    %4 = tpu.matmul %2, %3, %cst {dimension_numbers = #tpu.dot_dimension_numbers<[1], [0], [0], [1], [0, 0, 1, 1], [], []>} : vector<24x64xf32>, vector<64x32xf32>, vector<24x32xf32> -> vector<24x32xf32>
    %c0_6 = arith.constant 0 : index
    %c0_7 = arith.constant 0 : index
    %5 = vector.load %arg4[%c0_6, %c0_7] : memref<24x32xf32, #tpu.memory_space<vmem>>, vector<24x32xf32>
    %6 = arith.addf %4, %5 : vector<24x32xf32>
    %c0_8 = arith.constant 0 : index
    %c0_9 = arith.constant 0 : index
    %c0_10 = arith.constant 0 : index
    %7 = vector.load %arg5[%c0_8, %c0_9, %c0_10] : memref<2x1x32xf32, #tpu.memory_space<vmem>>, vector<1x1x32xf32>
    %8 = vector.shape_cast %7 : vector<1x1x32xf32> to vector<1x32xf32>
    %c0_11 = arith.constant 0 : index
    %c0_12 = arith.constant 0 : index
    %c0_13 = arith.constant 0 : index
    %9 = vector.load %arg6[%c0_11, %c0_12, %c0_13] : memref<2x1x32xf32, #tpu.memory_space<vmem>>, vector<1x1x32xf32>
    %10 = vector.shape_cast %9 : vector<1x1x32xf32> to vector<1x32xf32>
    %cst_14 = arith.constant dense<0.000000e+00> : vector<24xf32>
    %11 = vector.multi_reduction <add>, %6, %cst_14 [1] : vector<24x32xf32> to vector<24xf32>
    %12 = vector.shape_cast %11 : vector<24xf32> to vector<24x1xf32>
    %cst_15 = arith.constant 3.200000e+01 : f32
    %13 = vector.broadcast %cst_15 : f32 to vector<24x1xf32>
    %14 = arith.divf %12, %13 : vector<24x1xf32>
    %15 = vector.broadcast %14 : vector<24x1xf32> to vector<24x32xf32>
    %16 = arith.subf %6, %15 : vector<24x32xf32>
    %17 = arith.mulf %16, %16 : vector<24x32xf32>
    %cst_16 = arith.constant dense<0.000000e+00> : vector<24xf32>
    %18 = vector.multi_reduction <add>, %17, %cst_16 [1] : vector<24x32xf32> to vector<24xf32>
    %19 = vector.shape_cast %18 : vector<24xf32> to vector<24x1xf32>
    %cst_17 = arith.constant 3.200000e+01 : f32
    %20 = vector.broadcast %cst_17 : f32 to vector<24x1xf32>
    %21 = arith.divf %19, %20 : vector<24x1xf32>
    %22 = vector.broadcast %14 : vector<24x1xf32> to vector<24x32xf32>
    %23 = arith.subf %6, %22 : vector<24x32xf32>
    %cst_18 = arith.constant 9.99999997E-7 : f32
    %24 = vector.broadcast %cst_18 : f32 to vector<24x1xf32>
    %25 = arith.addf %21, %24 : vector<24x1xf32>
    %26 = math.rsqrt %25 : vector<24x1xf32>
    %27 = vector.broadcast %26 : vector<24x1xf32> to vector<24x32xf32>
    %28 = arith.mulf %23, %27 : vector<24x32xf32>
    %29 = vector.broadcast %8 : vector<1x32xf32> to vector<24x32xf32>
    %30 = arith.mulf %28, %29 : vector<24x32xf32>
    %31 = vector.broadcast %10 : vector<1x32xf32> to vector<24x32xf32>
    %32 = arith.addf %30, %31 : vector<24x32xf32>
    %c0_19 = arith.constant 0 : index
    %c0_20 = arith.constant 0 : index
    %c0_21 = arith.constant 0 : index
    %33 = vector.load %arg7[%c0_19, %c0_20, %c0_21] : memref<2x32x96xf32, #tpu.memory_space<vmem>>, vector<1x32x96xf32>
    %34 = vector.shape_cast %33 : vector<1x32x96xf32> to vector<32x96xf32>
    %cst_22 = arith.constant dense<0.000000e+00> : vector<24x96xf32>
    %35 = tpu.matmul %32, %34, %cst_22 {dimension_numbers = #tpu.dot_dimension_numbers<[1], [0], [0], [1], [0, 0, 1, 1], [], []>} : vector<24x32xf32>, vector<32x96xf32>, vector<24x96xf32> -> vector<24x96xf32>
    %c0_23 = arith.constant 0 : index
    %c0_24 = arith.constant 0 : index
    %c0_25 = arith.constant 0 : index
    %36 = vector.load %arg8[%c0_23, %c0_24, %c0_25] : memref<2x1x96xf32, #tpu.memory_space<vmem>>, vector<1x1x96xf32>
    %37 = vector.shape_cast %36 : vector<1x1x96xf32> to vector<1x96xf32>
    %38 = vector.broadcast %37 : vector<1x96xf32> to vector<24x96xf32>
    %39 = arith.addf %35, %38 : vector<24x96xf32>
    %40 = vector.extract_strided_slice %39 {offsets = [0, 0], sizes = [24, 32], strides = [1, 1]} : vector<24x96xf32> to vector<24x32xf32>
    %41 = vector.extract_strided_slice %39 {offsets = [0, 32], sizes = [24, 32], strides = [1, 1]} : vector<24x96xf32> to vector<24x32xf32>
    %42 = vector.extract_strided_slice %39 {offsets = [0, 64], sizes = [24, 32], strides = [1, 1]} : vector<24x96xf32> to vector<24x32xf32>
    %43 = vector.extract_strided_slice %40 {offsets = [0, 0], sizes = [24, 8], strides = [1, 1]} : vector<24x32xf32> to vector<24x8xf32>
    %44 = vector.extract_strided_slice %41 {offsets = [0, 0], sizes = [24, 8], strides = [1, 1]} : vector<24x32xf32> to vector<24x8xf32>
    %cst_26 = arith.constant dense<0.000000e+00> : vector<24x24xf32>
    %45 = tpu.matmul %43, %44, %cst_26 {dimension_numbers = #tpu.dot_dimension_numbers<[1], [1], [0], [0], [0, 0, 1, 0], [], []>} : vector<24x8xf32>, vector<24x8xf32>, vector<24x24xf32> -> vector<24x24xf32>
    %46 = arith.addf %45, %0 : vector<24x24xf32>
    %cst_27 = arith.constant dense<0xFF800000> : vector<24xf32>
    %47 = vector.multi_reduction <maximumf>, %46, %cst_27 [1] : vector<24x24xf32> to vector<24xf32>
    %48 = vector.shape_cast %47 : vector<24xf32> to vector<24x1xf32>
    %49 = vector.broadcast %48 : vector<24x1xf32> to vector<24x24xf32>
    %50 = arith.subf %46, %49 : vector<24x24xf32>
    %51 = math.exp %50 : vector<24x24xf32>
    %cst_28 = arith.constant dense<0.000000e+00> : vector<24xf32>
    %52 = vector.multi_reduction <add>, %51, %cst_28 [1] : vector<24x24xf32> to vector<24xf32>
    %53 = vector.shape_cast %52 : vector<24xf32> to vector<24x1xf32>
    %54 = vector.broadcast %53 : vector<24x1xf32> to vector<24x24xf32>
    %55 = arith.divf %51, %54 : vector<24x24xf32>
    %56 = vector.extract_strided_slice %42 {offsets = [0, 0], sizes = [24, 8], strides = [1, 1]} : vector<24x32xf32> to vector<24x8xf32>
    %cst_29 = arith.constant dense<0.000000e+00> : vector<24x8xf32>
    %57 = tpu.matmul %55, %56, %cst_29 {dimension_numbers = #tpu.dot_dimension_numbers<[1], [0], [0], [1], [0, 0, 1, 1], [], []>} : vector<24x24xf32>, vector<24x8xf32>, vector<24x8xf32> -> vector<24x8xf32>
    %58 = vector.extract_strided_slice %40 {offsets = [0, 8], sizes = [24, 8], strides = [1, 1]} : vector<24x32xf32> to vector<24x8xf32>
    %59 = vector.extract_strided_slice %41 {offsets = [0, 8], sizes = [24, 8], strides = [1, 1]} : vector<24x32xf32> to vector<24x8xf32>
    %cst_30 = arith.constant dense<0.000000e+00> : vector<24x24xf32>
    %60 = tpu.matmul %58, %59, %cst_30 {dimension_numbers = #tpu.dot_dimension_numbers<[1], [1], [0], [0], [0, 0, 1, 0], [], []>} : vector<24x8xf32>, vector<24x8xf32>, vector<24x24xf32> -> vector<24x24xf32>
    %61 = arith.addf %60, %0 : vector<24x24xf32>
    %cst_31 = arith.constant dense<0xFF800000> : vector<24xf32>
    %62 = vector.multi_reduction <maximumf>, %61, %cst_31 [1] : vector<24x24xf32> to vector<24xf32>
    %63 = vector.shape_cast %62 : vector<24xf32> to vector<24x1xf32>
    %64 = vector.broadcast %63 : vector<24x1xf32> to vector<24x24xf32>
    %65 = arith.subf %61, %64 : vector<24x24xf32>
    %66 = math.exp %65 : vector<24x24xf32>
    %cst_32 = arith.constant dense<0.000000e+00> : vector<24xf32>
    %67 = vector.multi_reduction <add>, %66, %cst_32 [1] : vector<24x24xf32> to vector<24xf32>
    %68 = vector.shape_cast %67 : vector<24xf32> to vector<24x1xf32>
    %69 = vector.broadcast %68 : vector<24x1xf32> to vector<24x24xf32>
    %70 = arith.divf %66, %69 : vector<24x24xf32>
    %71 = vector.extract_strided_slice %42 {offsets = [0, 8], sizes = [24, 8], strides = [1, 1]} : vector<24x32xf32> to vector<24x8xf32>
    %cst_33 = arith.constant dense<0.000000e+00> : vector<24x8xf32>
    %72 = tpu.matmul %70, %71, %cst_33 {dimension_numbers = #tpu.dot_dimension_numbers<[1], [0], [0], [1], [0, 0, 1, 1], [], []>} : vector<24x24xf32>, vector<24x8xf32>, vector<24x8xf32> -> vector<24x8xf32>
    %73 = vector.extract_strided_slice %40 {offsets = [0, 16], sizes = [24, 8], strides = [1, 1]} : vector<24x32xf32> to vector<24x8xf32>
    %74 = vector.extract_strided_slice %41 {offsets = [0, 16], sizes = [24, 8], strides = [1, 1]} : vector<24x32xf32> to vector<24x8xf32>
    %cst_34 = arith.constant dense<0.000000e+00> : vector<24x24xf32>
    %75 = tpu.matmul %73, %74, %cst_34 {dimension_numbers = #tpu.dot_dimension_numbers<[1], [1], [0], [0], [0, 0, 1, 0], [], []>} : vector<24x8xf32>, vector<24x8xf32>, vector<24x24xf32> -> vector<24x24xf32>
    %76 = arith.addf %75, %0 : vector<24x24xf32>
    %cst_35 = arith.constant dense<0xFF800000> : vector<24xf32>
    %77 = vector.multi_reduction <maximumf>, %76, %cst_35 [1] : vector<24x24xf32> to vector<24xf32>
    %78 = vector.shape_cast %77 : vector<24xf32> to vector<24x1xf32>
    %79 = vector.broadcast %78 : vector<24x1xf32> to vector<24x24xf32>
    %80 = arith.subf %76, %79 : vector<24x24xf32>
    %81 = math.exp %80 : vector<24x24xf32>
    %cst_36 = arith.constant dense<0.000000e+00> : vector<24xf32>
    %82 = vector.multi_reduction <add>, %81, %cst_36 [1] : vector<24x24xf32> to vector<24xf32>
    %83 = vector.shape_cast %82 : vector<24xf32> to vector<24x1xf32>
    %84 = vector.broadcast %83 : vector<24x1xf32> to vector<24x24xf32>
    %85 = arith.divf %81, %84 : vector<24x24xf32>
    %86 = vector.extract_strided_slice %42 {offsets = [0, 16], sizes = [24, 8], strides = [1, 1]} : vector<24x32xf32> to vector<24x8xf32>
    %cst_37 = arith.constant dense<0.000000e+00> : vector<24x8xf32>
    %87 = tpu.matmul %85, %86, %cst_37 {dimension_numbers = #tpu.dot_dimension_numbers<[1], [0], [0], [1], [0, 0, 1, 1], [], []>} : vector<24x24xf32>, vector<24x8xf32>, vector<24x8xf32> -> vector<24x8xf32>
    %88 = vector.extract_strided_slice %40 {offsets = [0, 24], sizes = [24, 8], strides = [1, 1]} : vector<24x32xf32> to vector<24x8xf32>
    %89 = vector.extract_strided_slice %41 {offsets = [0, 24], sizes = [24, 8], strides = [1, 1]} : vector<24x32xf32> to vector<24x8xf32>
    %cst_38 = arith.constant dense<0.000000e+00> : vector<24x24xf32>
    %90 = tpu.matmul %88, %89, %cst_38 {dimension_numbers = #tpu.dot_dimension_numbers<[1], [1], [0], [0], [0, 0, 1, 0], [], []>} : vector<24x8xf32>, vector<24x8xf32>, vector<24x24xf32> -> vector<24x24xf32>
    %91 = arith.addf %90, %0 : vector<24x24xf32>
    %cst_39 = arith.constant dense<0xFF800000> : vector<24xf32>
    %92 = vector.multi_reduction <maximumf>, %91, %cst_39 [1] : vector<24x24xf32> to vector<24xf32>
    %93 = vector.shape_cast %92 : vector<24xf32> to vector<24x1xf32>
    %94 = vector.broadcast %93 : vector<24x1xf32> to vector<24x24xf32>
    %95 = arith.subf %91, %94 : vector<24x24xf32>
    %96 = math.exp %95 : vector<24x24xf32>
    %cst_40 = arith.constant dense<0.000000e+00> : vector<24xf32>
    %97 = vector.multi_reduction <add>, %96, %cst_40 [1] : vector<24x24xf32> to vector<24xf32>
    %98 = vector.shape_cast %97 : vector<24xf32> to vector<24x1xf32>
    %99 = vector.broadcast %98 : vector<24x1xf32> to vector<24x24xf32>
    %100 = arith.divf %96, %99 : vector<24x24xf32>
    %101 = vector.extract_strided_slice %42 {offsets = [0, 24], sizes = [24, 8], strides = [1, 1]} : vector<24x32xf32> to vector<24x8xf32>
    %cst_41 = arith.constant dense<0.000000e+00> : vector<24x8xf32>
    %102 = tpu.matmul %100, %101, %cst_41 {dimension_numbers = #tpu.dot_dimension_numbers<[1], [0], [0], [1], [0, 0, 1, 1], [], []>} : vector<24x24xf32>, vector<24x8xf32>, vector<24x8xf32> -> vector<24x8xf32>
    %103 = tpu.concatenate %57, %72, %87, %102 in 1 : vector<24x8xf32>, vector<24x8xf32>, vector<24x8xf32>, vector<24x8xf32> -> vector<24x32xf32>
    %c0_42 = arith.constant 0 : index
    %c0_43 = arith.constant 0 : index
    %c0_44 = arith.constant 0 : index
    %104 = vector.load %arg9[%c0_42, %c0_43, %c0_44] : memref<2x32x32xf32, #tpu.memory_space<vmem>>, vector<1x32x32xf32>
    %105 = vector.shape_cast %104 : vector<1x32x32xf32> to vector<32x32xf32>
    %cst_45 = arith.constant dense<0.000000e+00> : vector<24x32xf32>
    %106 = tpu.matmul %103, %105, %cst_45 {dimension_numbers = #tpu.dot_dimension_numbers<[1], [0], [0], [1], [0, 0, 1, 1], [], []>} : vector<24x32xf32>, vector<32x32xf32>, vector<24x32xf32> -> vector<24x32xf32>
    %c0_46 = arith.constant 0 : index
    %c0_47 = arith.constant 0 : index
    %c0_48 = arith.constant 0 : index
    %107 = vector.load %arg10[%c0_46, %c0_47, %c0_48] : memref<2x1x32xf32, #tpu.memory_space<vmem>>, vector<1x1x32xf32>
    %108 = vector.shape_cast %107 : vector<1x1x32xf32> to vector<1x32xf32>
    %109 = vector.broadcast %108 : vector<1x32xf32> to vector<24x32xf32>
    %110 = arith.addf %106, %109 : vector<24x32xf32>
    %111 = arith.addf %6, %110 : vector<24x32xf32>
    %c0_49 = arith.constant 0 : index
    %c0_50 = arith.constant 0 : index
    %c0_51 = arith.constant 0 : index
    %112 = vector.load %arg11[%c0_49, %c0_50, %c0_51] : memref<2x1x32xf32, #tpu.memory_space<vmem>>, vector<1x1x32xf32>
    %113 = vector.shape_cast %112 : vector<1x1x32xf32> to vector<1x32xf32>
    %c0_52 = arith.constant 0 : index
    %c0_53 = arith.constant 0 : index
    %c0_54 = arith.constant 0 : index
    %114 = vector.load %arg12[%c0_52, %c0_53, %c0_54] : memref<2x1x32xf32, #tpu.memory_space<vmem>>, vector<1x1x32xf32>
    %115 = vector.shape_cast %114 : vector<1x1x32xf32> to vector<1x32xf32>
    %cst_55 = arith.constant dense<0.000000e+00> : vector<24xf32>
    %116 = vector.multi_reduction <add>, %111, %cst_55 [1] : vector<24x32xf32> to vector<24xf32>
    %117 = vector.shape_cast %116 : vector<24xf32> to vector<24x1xf32>
    %cst_56 = arith.constant 3.200000e+01 : f32
    %118 = vector.broadcast %cst_56 : f32 to vector<24x1xf32>
    %119 = arith.divf %117, %118 : vector<24x1xf32>
    %120 = vector.broadcast %119 : vector<24x1xf32> to vector<24x32xf32>
    %121 = arith.subf %111, %120 : vector<24x32xf32>
    %122 = arith.mulf %121, %121 : vector<24x32xf32>
    %cst_57 = arith.constant dense<0.000000e+00> : vector<24xf32>
    %123 = vector.multi_reduction <add>, %122, %cst_57 [1] : vector<24x32xf32> to vector<24xf32>
    %124 = vector.shape_cast %123 : vector<24xf32> to vector<24x1xf32>
    %cst_58 = arith.constant 3.200000e+01 : f32
    %125 = vector.broadcast %cst_58 : f32 to vector<24x1xf32>
    %126 = arith.divf %124, %125 : vector<24x1xf32>
    %127 = vector.broadcast %119 : vector<24x1xf32> to vector<24x32xf32>
    %128 = arith.subf %111, %127 : vector<24x32xf32>
    %cst_59 = arith.constant 9.99999997E-7 : f32
    %129 = vector.broadcast %cst_59 : f32 to vector<24x1xf32>
    %130 = arith.addf %126, %129 : vector<24x1xf32>
    %131 = math.rsqrt %130 : vector<24x1xf32>
    %132 = vector.broadcast %131 : vector<24x1xf32> to vector<24x32xf32>
    %133 = arith.mulf %128, %132 : vector<24x32xf32>
    %134 = vector.broadcast %113 : vector<1x32xf32> to vector<24x32xf32>
    %135 = arith.mulf %133, %134 : vector<24x32xf32>
    %136 = vector.broadcast %115 : vector<1x32xf32> to vector<24x32xf32>
    %137 = arith.addf %135, %136 : vector<24x32xf32>
    %c0_60 = arith.constant 0 : index
    %c0_61 = arith.constant 0 : index
    %c0_62 = arith.constant 0 : index
    %138 = vector.load %arg13[%c0_60, %c0_61, %c0_62] : memref<2x32x64xf32, #tpu.memory_space<vmem>>, vector<1x32x64xf32>
    %139 = vector.shape_cast %138 : vector<1x32x64xf32> to vector<32x64xf32>
    %cst_63 = arith.constant dense<0.000000e+00> : vector<24x64xf32>
    %140 = tpu.matmul %137, %139, %cst_63 {dimension_numbers = #tpu.dot_dimension_numbers<[1], [0], [0], [1], [0, 0, 1, 1], [], []>} : vector<24x32xf32>, vector<32x64xf32>, vector<24x64xf32> -> vector<24x64xf32>
    %c0_64 = arith.constant 0 : index
    %c0_65 = arith.constant 0 : index
    %c0_66 = arith.constant 0 : index
    %141 = vector.load %arg14[%c0_64, %c0_65, %c0_66] : memref<2x1x64xf32, #tpu.memory_space<vmem>>, vector<1x1x64xf32>
    %142 = vector.shape_cast %141 : vector<1x1x64xf32> to vector<1x64xf32>
    %143 = vector.broadcast %142 : vector<1x64xf32> to vector<24x64xf32>
    %144 = arith.addf %140, %143 : vector<24x64xf32>
    %cst_67 = arith.constant 5.000000e-01 : f32
    %145 = vector.broadcast %cst_67 : f32 to vector<24x64xf32>
    %146 = arith.mulf %145, %144 : vector<24x64xf32>
    %cst_68 = arith.constant 0.707106769 : f32
    %147 = vector.broadcast %cst_68 : f32 to vector<24x64xf32>
    %148 = arith.mulf %144, %147 : vector<24x64xf32>
    %149 = math.erf %148 : vector<24x64xf32>
    %cst_69 = arith.constant 1.000000e+00 : f32
    %150 = vector.broadcast %cst_69 : f32 to vector<24x64xf32>
    %151 = arith.addf %150, %149 : vector<24x64xf32>
    %152 = arith.mulf %146, %151 : vector<24x64xf32>
    %c0_70 = arith.constant 0 : index
    %c0_71 = arith.constant 0 : index
    %c0_72 = arith.constant 0 : index
    %153 = vector.load %arg15[%c0_70, %c0_71, %c0_72] : memref<2x64x32xf32, #tpu.memory_space<vmem>>, vector<1x64x32xf32>
    %154 = vector.shape_cast %153 : vector<1x64x32xf32> to vector<64x32xf32>
    %cst_73 = arith.constant dense<0.000000e+00> : vector<24x32xf32>
    %155 = tpu.matmul %152, %154, %cst_73 {dimension_numbers = #tpu.dot_dimension_numbers<[1], [0], [0], [1], [0, 0, 1, 1], [], []>} : vector<24x64xf32>, vector<64x32xf32>, vector<24x32xf32> -> vector<24x32xf32>
    %c0_74 = arith.constant 0 : index
    %c0_75 = arith.constant 0 : index
    %c0_76 = arith.constant 0 : index
    %156 = vector.load %arg16[%c0_74, %c0_75, %c0_76] : memref<2x1x32xf32, #tpu.memory_space<vmem>>, vector<1x1x32xf32>
    %157 = vector.shape_cast %156 : vector<1x1x32xf32> to vector<1x32xf32>
    %158 = vector.broadcast %157 : vector<1x32xf32> to vector<24x32xf32>
    %159 = arith.addf %155, %158 : vector<24x32xf32>
    %160 = arith.addf %111, %159 : vector<24x32xf32>
    %c1 = arith.constant 1 : index
    %c0_77 = arith.constant 0 : index
    %c0_78 = arith.constant 0 : index
    %161 = vector.load %arg5[%c1, %c0_77, %c0_78] : memref<2x1x32xf32, #tpu.memory_space<vmem>>, vector<1x1x32xf32>
    %162 = vector.shape_cast %161 : vector<1x1x32xf32> to vector<1x32xf32>
    %c1_79 = arith.constant 1 : index
    %c0_80 = arith.constant 0 : index
    %c0_81 = arith.constant 0 : index
    %163 = vector.load %arg6[%c1_79, %c0_80, %c0_81] : memref<2x1x32xf32, #tpu.memory_space<vmem>>, vector<1x1x32xf32>
    %164 = vector.shape_cast %163 : vector<1x1x32xf32> to vector<1x32xf32>
    %cst_82 = arith.constant dense<0.000000e+00> : vector<24xf32>
    %165 = vector.multi_reduction <add>, %160, %cst_82 [1] : vector<24x32xf32> to vector<24xf32>
    %166 = vector.shape_cast %165 : vector<24xf32> to vector<24x1xf32>
    %cst_83 = arith.constant 3.200000e+01 : f32
    %167 = vector.broadcast %cst_83 : f32 to vector<24x1xf32>
    %168 = arith.divf %166, %167 : vector<24x1xf32>
    %169 = vector.broadcast %168 : vector<24x1xf32> to vector<24x32xf32>
    %170 = arith.subf %160, %169 : vector<24x32xf32>
    %171 = arith.mulf %170, %170 : vector<24x32xf32>
    %cst_84 = arith.constant dense<0.000000e+00> : vector<24xf32>
    %172 = vector.multi_reduction <add>, %171, %cst_84 [1] : vector<24x32xf32> to vector<24xf32>
    %173 = vector.shape_cast %172 : vector<24xf32> to vector<24x1xf32>
    %cst_85 = arith.constant 3.200000e+01 : f32
    %174 = vector.broadcast %cst_85 : f32 to vector<24x1xf32>
    %175 = arith.divf %173, %174 : vector<24x1xf32>
    %176 = vector.broadcast %168 : vector<24x1xf32> to vector<24x32xf32>
    %177 = arith.subf %160, %176 : vector<24x32xf32>
    %cst_86 = arith.constant 9.99999997E-7 : f32
    %178 = vector.broadcast %cst_86 : f32 to vector<24x1xf32>
    %179 = arith.addf %175, %178 : vector<24x1xf32>
    %180 = math.rsqrt %179 : vector<24x1xf32>
    %181 = vector.broadcast %180 : vector<24x1xf32> to vector<24x32xf32>
    %182 = arith.mulf %177, %181 : vector<24x32xf32>
    %183 = vector.broadcast %162 : vector<1x32xf32> to vector<24x32xf32>
    %184 = arith.mulf %182, %183 : vector<24x32xf32>
    %185 = vector.broadcast %164 : vector<1x32xf32> to vector<24x32xf32>
    %186 = arith.addf %184, %185 : vector<24x32xf32>
    %c1_87 = arith.constant 1 : index
    %c0_88 = arith.constant 0 : index
    %c0_89 = arith.constant 0 : index
    %187 = vector.load %arg7[%c1_87, %c0_88, %c0_89] : memref<2x32x96xf32, #tpu.memory_space<vmem>>, vector<1x32x96xf32>
    %188 = vector.shape_cast %187 : vector<1x32x96xf32> to vector<32x96xf32>
    %cst_90 = arith.constant dense<0.000000e+00> : vector<24x96xf32>
    %189 = tpu.matmul %186, %188, %cst_90 {dimension_numbers = #tpu.dot_dimension_numbers<[1], [0], [0], [1], [0, 0, 1, 1], [], []>} : vector<24x32xf32>, vector<32x96xf32>, vector<24x96xf32> -> vector<24x96xf32>
    %c1_91 = arith.constant 1 : index
    %c0_92 = arith.constant 0 : index
    %c0_93 = arith.constant 0 : index
    %190 = vector.load %arg8[%c1_91, %c0_92, %c0_93] : memref<2x1x96xf32, #tpu.memory_space<vmem>>, vector<1x1x96xf32>
    %191 = vector.shape_cast %190 : vector<1x1x96xf32> to vector<1x96xf32>
    %192 = vector.broadcast %191 : vector<1x96xf32> to vector<24x96xf32>
    %193 = arith.addf %189, %192 : vector<24x96xf32>
    %194 = vector.extract_strided_slice %193 {offsets = [0, 0], sizes = [24, 32], strides = [1, 1]} : vector<24x96xf32> to vector<24x32xf32>
    %195 = vector.extract_strided_slice %193 {offsets = [0, 32], sizes = [24, 32], strides = [1, 1]} : vector<24x96xf32> to vector<24x32xf32>
    %196 = vector.extract_strided_slice %193 {offsets = [0, 64], sizes = [24, 32], strides = [1, 1]} : vector<24x96xf32> to vector<24x32xf32>
    %197 = vector.extract_strided_slice %194 {offsets = [0, 0], sizes = [24, 8], strides = [1, 1]} : vector<24x32xf32> to vector<24x8xf32>
    %198 = vector.extract_strided_slice %195 {offsets = [0, 0], sizes = [24, 8], strides = [1, 1]} : vector<24x32xf32> to vector<24x8xf32>
    %cst_94 = arith.constant dense<0.000000e+00> : vector<24x24xf32>
    %199 = tpu.matmul %197, %198, %cst_94 {dimension_numbers = #tpu.dot_dimension_numbers<[1], [1], [0], [0], [0, 0, 1, 0], [], []>} : vector<24x8xf32>, vector<24x8xf32>, vector<24x24xf32> -> vector<24x24xf32>
    %200 = arith.addf %199, %0 : vector<24x24xf32>
    %cst_95 = arith.constant dense<0xFF800000> : vector<24xf32>
    %201 = vector.multi_reduction <maximumf>, %200, %cst_95 [1] : vector<24x24xf32> to vector<24xf32>
    %202 = vector.shape_cast %201 : vector<24xf32> to vector<24x1xf32>
    %203 = vector.broadcast %202 : vector<24x1xf32> to vector<24x24xf32>
    %204 = arith.subf %200, %203 : vector<24x24xf32>
    %205 = math.exp %204 : vector<24x24xf32>
    %cst_96 = arith.constant dense<0.000000e+00> : vector<24xf32>
    %206 = vector.multi_reduction <add>, %205, %cst_96 [1] : vector<24x24xf32> to vector<24xf32>
    %207 = vector.shape_cast %206 : vector<24xf32> to vector<24x1xf32>
    %208 = vector.broadcast %207 : vector<24x1xf32> to vector<24x24xf32>
    %209 = arith.divf %205, %208 : vector<24x24xf32>
    %210 = vector.extract_strided_slice %196 {offsets = [0, 0], sizes = [24, 8], strides = [1, 1]} : vector<24x32xf32> to vector<24x8xf32>
    %cst_97 = arith.constant dense<0.000000e+00> : vector<24x8xf32>
    %211 = tpu.matmul %209, %210, %cst_97 {dimension_numbers = #tpu.dot_dimension_numbers<[1], [0], [0], [1], [0, 0, 1, 1], [], []>} : vector<24x24xf32>, vector<24x8xf32>, vector<24x8xf32> -> vector<24x8xf32>
    %212 = vector.extract_strided_slice %194 {offsets = [0, 8], sizes = [24, 8], strides = [1, 1]} : vector<24x32xf32> to vector<24x8xf32>
    %213 = vector.extract_strided_slice %195 {offsets = [0, 8], sizes = [24, 8], strides = [1, 1]} : vector<24x32xf32> to vector<24x8xf32>
    %cst_98 = arith.constant dense<0.000000e+00> : vector<24x24xf32>
    %214 = tpu.matmul %212, %213, %cst_98 {dimension_numbers = #tpu.dot_dimension_numbers<[1], [1], [0], [0], [0, 0, 1, 0], [], []>} : vector<24x8xf32>, vector<24x8xf32>, vector<24x24xf32> -> vector<24x24xf32>
    %215 = arith.addf %214, %0 : vector<24x24xf32>
    %cst_99 = arith.constant dense<0xFF800000> : vector<24xf32>
    %216 = vector.multi_reduction <maximumf>, %215, %cst_99 [1] : vector<24x24xf32> to vector<24xf32>
    %217 = vector.shape_cast %216 : vector<24xf32> to vector<24x1xf32>
    %218 = vector.broadcast %217 : vector<24x1xf32> to vector<24x24xf32>
    %219 = arith.subf %215, %218 : vector<24x24xf32>
    %220 = math.exp %219 : vector<24x24xf32>
    %cst_100 = arith.constant dense<0.000000e+00> : vector<24xf32>
    %221 = vector.multi_reduction <add>, %220, %cst_100 [1] : vector<24x24xf32> to vector<24xf32>
    %222 = vector.shape_cast %221 : vector<24xf32> to vector<24x1xf32>
    %223 = vector.broadcast %222 : vector<24x1xf32> to vector<24x24xf32>
    %224 = arith.divf %220, %223 : vector<24x24xf32>
    %225 = vector.extract_strided_slice %196 {offsets = [0, 8], sizes = [24, 8], strides = [1, 1]} : vector<24x32xf32> to vector<24x8xf32>
    %cst_101 = arith.constant dense<0.000000e+00> : vector<24x8xf32>
    %226 = tpu.matmul %224, %225, %cst_101 {dimension_numbers = #tpu.dot_dimension_numbers<[1], [0], [0], [1], [0, 0, 1, 1], [], []>} : vector<24x24xf32>, vector<24x8xf32>, vector<24x8xf32> -> vector<24x8xf32>
    %227 = vector.extract_strided_slice %194 {offsets = [0, 16], sizes = [24, 8], strides = [1, 1]} : vector<24x32xf32> to vector<24x8xf32>
    %228 = vector.extract_strided_slice %195 {offsets = [0, 16], sizes = [24, 8], strides = [1, 1]} : vector<24x32xf32> to vector<24x8xf32>
    %cst_102 = arith.constant dense<0.000000e+00> : vector<24x24xf32>
    %229 = tpu.matmul %227, %228, %cst_102 {dimension_numbers = #tpu.dot_dimension_numbers<[1], [1], [0], [0], [0, 0, 1, 0], [], []>} : vector<24x8xf32>, vector<24x8xf32>, vector<24x24xf32> -> vector<24x24xf32>
    %230 = arith.addf %229, %0 : vector<24x24xf32>
    %cst_103 = arith.constant dense<0xFF800000> : vector<24xf32>
    %231 = vector.multi_reduction <maximumf>, %230, %cst_103 [1] : vector<24x24xf32> to vector<24xf32>
    %232 = vector.shape_cast %231 : vector<24xf32> to vector<24x1xf32>
    %233 = vector.broadcast %232 : vector<24x1xf32> to vector<24x24xf32>
    %234 = arith.subf %230, %233 : vector<24x24xf32>
    %235 = math.exp %234 : vector<24x24xf32>
    %cst_104 = arith.constant dense<0.000000e+00> : vector<24xf32>
    %236 = vector.multi_reduction <add>, %235, %cst_104 [1] : vector<24x24xf32> to vector<24xf32>
    %237 = vector.shape_cast %236 : vector<24xf32> to vector<24x1xf32>
    %238 = vector.broadcast %237 : vector<24x1xf32> to vector<24x24xf32>
    %239 = arith.divf %235, %238 : vector<24x24xf32>
    %240 = vector.extract_strided_slice %196 {offsets = [0, 16], sizes = [24, 8], strides = [1, 1]} : vector<24x32xf32> to vector<24x8xf32>
    %cst_105 = arith.constant dense<0.000000e+00> : vector<24x8xf32>
    %241 = tpu.matmul %239, %240, %cst_105 {dimension_numbers = #tpu.dot_dimension_numbers<[1], [0], [0], [1], [0, 0, 1, 1], [], []>} : vector<24x24xf32>, vector<24x8xf32>, vector<24x8xf32> -> vector<24x8xf32>
    %242 = vector.extract_strided_slice %194 {offsets = [0, 24], sizes = [24, 8], strides = [1, 1]} : vector<24x32xf32> to vector<24x8xf32>
    %243 = vector.extract_strided_slice %195 {offsets = [0, 24], sizes = [24, 8], strides = [1, 1]} : vector<24x32xf32> to vector<24x8xf32>
    %cst_106 = arith.constant dense<0.000000e+00> : vector<24x24xf32>
    %244 = tpu.matmul %242, %243, %cst_106 {dimension_numbers = #tpu.dot_dimension_numbers<[1], [1], [0], [0], [0, 0, 1, 0], [], []>} : vector<24x8xf32>, vector<24x8xf32>, vector<24x24xf32> -> vector<24x24xf32>
    %245 = arith.addf %244, %0 : vector<24x24xf32>
    %cst_107 = arith.constant dense<0xFF800000> : vector<24xf32>
    %246 = vector.multi_reduction <maximumf>, %245, %cst_107 [1] : vector<24x24xf32> to vector<24xf32>
    %247 = vector.shape_cast %246 : vector<24xf32> to vector<24x1xf32>
    %248 = vector.broadcast %247 : vector<24x1xf32> to vector<24x24xf32>
    %249 = arith.subf %245, %248 : vector<24x24xf32>
    %250 = math.exp %249 : vector<24x24xf32>
    %cst_108 = arith.constant dense<0.000000e+00> : vector<24xf32>
    %251 = vector.multi_reduction <add>, %250, %cst_108 [1] : vector<24x24xf32> to vector<24xf32>
    %252 = vector.shape_cast %251 : vector<24xf32> to vector<24x1xf32>
    %253 = vector.broadcast %252 : vector<24x1xf32> to vector<24x24xf32>
    %254 = arith.divf %250, %253 : vector<24x24xf32>
    %255 = vector.extract_strided_slice %196 {offsets = [0, 24], sizes = [24, 8], strides = [1, 1]} : vector<24x32xf32> to vector<24x8xf32>
    %cst_109 = arith.constant dense<0.000000e+00> : vector<24x8xf32>
    %256 = tpu.matmul %254, %255, %cst_109 {dimension_numbers = #tpu.dot_dimension_numbers<[1], [0], [0], [1], [0, 0, 1, 1], [], []>} : vector<24x24xf32>, vector<24x8xf32>, vector<24x8xf32> -> vector<24x8xf32>
    %257 = tpu.concatenate %211, %226, %241, %256 in 1 : vector<24x8xf32>, vector<24x8xf32>, vector<24x8xf32>, vector<24x8xf32> -> vector<24x32xf32>
    %c1_110 = arith.constant 1 : index
    %c0_111 = arith.constant 0 : index
    %c0_112 = arith.constant 0 : index
    %258 = vector.load %arg9[%c1_110, %c0_111, %c0_112] : memref<2x32x32xf32, #tpu.memory_space<vmem>>, vector<1x32x32xf32>
    %259 = vector.shape_cast %258 : vector<1x32x32xf32> to vector<32x32xf32>
    %cst_113 = arith.constant dense<0.000000e+00> : vector<24x32xf32>
    %260 = tpu.matmul %257, %259, %cst_113 {dimension_numbers = #tpu.dot_dimension_numbers<[1], [0], [0], [1], [0, 0, 1, 1], [], []>} : vector<24x32xf32>, vector<32x32xf32>, vector<24x32xf32> -> vector<24x32xf32>
    %c1_114 = arith.constant 1 : index
    %c0_115 = arith.constant 0 : index
    %c0_116 = arith.constant 0 : index
    %261 = vector.load %arg10[%c1_114, %c0_115, %c0_116] : memref<2x1x32xf32, #tpu.memory_space<vmem>>, vector<1x1x32xf32>
    %262 = vector.shape_cast %261 : vector<1x1x32xf32> to vector<1x32xf32>
    %263 = vector.broadcast %262 : vector<1x32xf32> to vector<24x32xf32>
    %264 = arith.addf %260, %263 : vector<24x32xf32>
    %265 = arith.addf %160, %264 : vector<24x32xf32>
    %c1_117 = arith.constant 1 : index
    %c0_118 = arith.constant 0 : index
    %c0_119 = arith.constant 0 : index
    %266 = vector.load %arg11[%c1_117, %c0_118, %c0_119] : memref<2x1x32xf32, #tpu.memory_space<vmem>>, vector<1x1x32xf32>
    %267 = vector.shape_cast %266 : vector<1x1x32xf32> to vector<1x32xf32>
    %c1_120 = arith.constant 1 : index
    %c0_121 = arith.constant 0 : index
    %c0_122 = arith.constant 0 : index
    %268 = vector.load %arg12[%c1_120, %c0_121, %c0_122] : memref<2x1x32xf32, #tpu.memory_space<vmem>>, vector<1x1x32xf32>
    %269 = vector.shape_cast %268 : vector<1x1x32xf32> to vector<1x32xf32>
    %cst_123 = arith.constant dense<0.000000e+00> : vector<24xf32>
    %270 = vector.multi_reduction <add>, %265, %cst_123 [1] : vector<24x32xf32> to vector<24xf32>
    %271 = vector.shape_cast %270 : vector<24xf32> to vector<24x1xf32>
    %cst_124 = arith.constant 3.200000e+01 : f32
    %272 = vector.broadcast %cst_124 : f32 to vector<24x1xf32>
    %273 = arith.divf %271, %272 : vector<24x1xf32>
    %274 = vector.broadcast %273 : vector<24x1xf32> to vector<24x32xf32>
    %275 = arith.subf %265, %274 : vector<24x32xf32>
    %276 = arith.mulf %275, %275 : vector<24x32xf32>
    %cst_125 = arith.constant dense<0.000000e+00> : vector<24xf32>
    %277 = vector.multi_reduction <add>, %276, %cst_125 [1] : vector<24x32xf32> to vector<24xf32>
    %278 = vector.shape_cast %277 : vector<24xf32> to vector<24x1xf32>
    %cst_126 = arith.constant 3.200000e+01 : f32
    %279 = vector.broadcast %cst_126 : f32 to vector<24x1xf32>
    %280 = arith.divf %278, %279 : vector<24x1xf32>
    %281 = vector.broadcast %273 : vector<24x1xf32> to vector<24x32xf32>
    %282 = arith.subf %265, %281 : vector<24x32xf32>
    %cst_127 = arith.constant 9.99999997E-7 : f32
    %283 = vector.broadcast %cst_127 : f32 to vector<24x1xf32>
    %284 = arith.addf %280, %283 : vector<24x1xf32>
    %285 = math.rsqrt %284 : vector<24x1xf32>
    %286 = vector.broadcast %285 : vector<24x1xf32> to vector<24x32xf32>
    %287 = arith.mulf %282, %286 : vector<24x32xf32>
    %288 = vector.broadcast %267 : vector<1x32xf32> to vector<24x32xf32>
    %289 = arith.mulf %287, %288 : vector<24x32xf32>
    %290 = vector.broadcast %269 : vector<1x32xf32> to vector<24x32xf32>
    %291 = arith.addf %289, %290 : vector<24x32xf32>
    %c1_128 = arith.constant 1 : index
    %c0_129 = arith.constant 0 : index
    %c0_130 = arith.constant 0 : index
    %292 = vector.load %arg13[%c1_128, %c0_129, %c0_130] : memref<2x32x64xf32, #tpu.memory_space<vmem>>, vector<1x32x64xf32>
    %293 = vector.shape_cast %292 : vector<1x32x64xf32> to vector<32x64xf32>
    %cst_131 = arith.constant dense<0.000000e+00> : vector<24x64xf32>
    %294 = tpu.matmul %291, %293, %cst_131 {dimension_numbers = #tpu.dot_dimension_numbers<[1], [0], [0], [1], [0, 0, 1, 1], [], []>} : vector<24x32xf32>, vector<32x64xf32>, vector<24x64xf32> -> vector<24x64xf32>
    %c1_132 = arith.constant 1 : index
    %c0_133 = arith.constant 0 : index
    %c0_134 = arith.constant 0 : index
    %295 = vector.load %arg14[%c1_132, %c0_133, %c0_134] : memref<2x1x64xf32, #tpu.memory_space<vmem>>, vector<1x1x64xf32>
    %296 = vector.shape_cast %295 : vector<1x1x64xf32> to vector<1x64xf32>
    %297 = vector.broadcast %296 : vector<1x64xf32> to vector<24x64xf32>
    %298 = arith.addf %294, %297 : vector<24x64xf32>
    %cst_135 = arith.constant 5.000000e-01 : f32
    %299 = vector.broadcast %cst_135 : f32 to vector<24x64xf32>
    %300 = arith.mulf %299, %298 : vector<24x64xf32>
    %cst_136 = arith.constant 0.707106769 : f32
    %301 = vector.broadcast %cst_136 : f32 to vector<24x64xf32>
    %302 = arith.mulf %298, %301 : vector<24x64xf32>
    %303 = math.erf %302 : vector<24x64xf32>
    %cst_137 = arith.constant 1.000000e+00 : f32
    %304 = vector.broadcast %cst_137 : f32 to vector<24x64xf32>
    %305 = arith.addf %304, %303 : vector<24x64xf32>
    %306 = arith.mulf %300, %305 : vector<24x64xf32>
    %c1_138 = arith.constant 1 : index
    %c0_139 = arith.constant 0 : index
    %c0_140 = arith.constant 0 : index
    %307 = vector.load %arg15[%c1_138, %c0_139, %c0_140] : memref<2x64x32xf32, #tpu.memory_space<vmem>>, vector<1x64x32xf32>
    %308 = vector.shape_cast %307 : vector<1x64x32xf32> to vector<64x32xf32>
    %cst_141 = arith.constant dense<0.000000e+00> : vector<24x32xf32>
    %309 = tpu.matmul %306, %308, %cst_141 {dimension_numbers = #tpu.dot_dimension_numbers<[1], [0], [0], [1], [0, 0, 1, 1], [], []>} : vector<24x64xf32>, vector<64x32xf32>, vector<24x32xf32> -> vector<24x32xf32>
    %c1_142 = arith.constant 1 : index
    %c0_143 = arith.constant 0 : index
    %c0_144 = arith.constant 0 : index
    %310 = vector.load %arg16[%c1_142, %c0_143, %c0_144] : memref<2x1x32xf32, #tpu.memory_space<vmem>>, vector<1x1x32xf32>
    %311 = vector.shape_cast %310 : vector<1x1x32xf32> to vector<1x32xf32>
    %312 = vector.broadcast %311 : vector<1x32xf32> to vector<24x32xf32>
    %313 = arith.addf %309, %312 : vector<24x32xf32>
    %314 = arith.addf %265, %313 : vector<24x32xf32>
    %c0_145 = arith.constant 0 : index
    %c0_146 = arith.constant 0 : index
    %315 = vector.load %arg17[%c0_145, %c0_146] : memref<1x32xf32, #tpu.memory_space<vmem>>, vector<1x32xf32>
    %c0_147 = arith.constant 0 : index
    %c0_148 = arith.constant 0 : index
    %316 = vector.load %arg18[%c0_147, %c0_148] : memref<1x32xf32, #tpu.memory_space<vmem>>, vector<1x32xf32>
    %cst_149 = arith.constant dense<0.000000e+00> : vector<24xf32>
    %317 = vector.multi_reduction <add>, %314, %cst_149 [1] : vector<24x32xf32> to vector<24xf32>
    %318 = vector.shape_cast %317 : vector<24xf32> to vector<24x1xf32>
    %cst_150 = arith.constant 3.200000e+01 : f32
    %319 = vector.broadcast %cst_150 : f32 to vector<24x1xf32>
    %320 = arith.divf %318, %319 : vector<24x1xf32>
    %321 = vector.broadcast %320 : vector<24x1xf32> to vector<24x32xf32>
    %322 = arith.subf %314, %321 : vector<24x32xf32>
    %323 = arith.mulf %322, %322 : vector<24x32xf32>
    %cst_151 = arith.constant dense<0.000000e+00> : vector<24xf32>
    %324 = vector.multi_reduction <add>, %323, %cst_151 [1] : vector<24x32xf32> to vector<24xf32>
    %325 = vector.shape_cast %324 : vector<24xf32> to vector<24x1xf32>
    %cst_152 = arith.constant 3.200000e+01 : f32
    %326 = vector.broadcast %cst_152 : f32 to vector<24x1xf32>
    %327 = arith.divf %325, %326 : vector<24x1xf32>
    %328 = vector.broadcast %320 : vector<24x1xf32> to vector<24x32xf32>
    %329 = arith.subf %314, %328 : vector<24x32xf32>
    %cst_153 = arith.constant 9.99999997E-7 : f32
    %330 = vector.broadcast %cst_153 : f32 to vector<24x1xf32>
    %331 = arith.addf %327, %330 : vector<24x1xf32>
    %332 = math.rsqrt %331 : vector<24x1xf32>
    %333 = vector.broadcast %332 : vector<24x1xf32> to vector<24x32xf32>
    %334 = arith.mulf %329, %333 : vector<24x32xf32>
    %335 = vector.broadcast %315 : vector<1x32xf32> to vector<24x32xf32>
    %336 = arith.mulf %334, %335 : vector<24x32xf32>
    %337 = vector.broadcast %316 : vector<1x32xf32> to vector<24x32xf32>
    %338 = arith.addf %336, %337 : vector<24x32xf32>
    %339 = vector.extract_strided_slice %338 {offsets = [0, 0], sizes = [1, 32], strides = [1, 1]} : vector<24x32xf32> to vector<1x32xf32>
    %c0_154 = arith.constant 0 : index
    %c0_155 = arith.constant 0 : index
    %340 = vector.load %arg19[%c0_154, %c0_155] : memref<32x128xf32, #tpu.memory_space<vmem>>, vector<32x128xf32>
    %cst_156 = arith.constant dense<0.000000e+00> : vector<1x128xf32>
    %341 = tpu.matmul %339, %340, %cst_156 {dimension_numbers = #tpu.dot_dimension_numbers<[1], [0], [0], [1], [0, 0, 1, 1], [], []>} : vector<1x32xf32>, vector<32x128xf32>, vector<1x128xf32> -> vector<1x128xf32>
    %c0_157 = arith.constant 0 : index
    %c0_158 = arith.constant 0 : index
    %342 = vector.load %arg20[%c0_157, %c0_158] : memref<1x128xf32, #tpu.memory_space<vmem>>, vector<1x128xf32>
    %343 = arith.addf %341, %342 : vector<1x128xf32>
    %c0_159 = arith.constant 0 : index
    %c0_160 = arith.constant 0 : index
    %c0_161 = arith.constant 0 : index
    %344 = vector.load %arg21[%c0_159, %c0_160, %c0_161] : memref<1x1x128xf32, #tpu.memory_space<vmem>>, vector<1x1x128xf32>
    %345 = vector.shape_cast %344 : vector<1x1x128xf32> to vector<1x128xf32>
    %346 = vector.shape_cast %343 : vector<1x128xf32> to vector<1x1x128xf32>
    tpu.vector_store %arg21[%c0_159, %c0_160, %c0_161], %346 {strides = array<i32>} : memref<1x1x128xf32, #tpu.memory_space<vmem>>, vector<1x1x128xf32>,
    return
  }
  func.func @transform_0(%arg0: i32) -> (i32, i32, i32) {
    %c0_i32 = arith.constant 0 : i32
    %c0_i32_0 = arith.constant 0 : i32
    %c0_i32_1 = arith.constant 0 : i32
    return %arg0, %c0_i32, %c0_i32_0 : i32, i32, i32
  }
  func.func @transform_1(%arg0: i32) -> (i32, i32) {
    %c0_i32 = arith.constant 0 : i32
    %c0_i32_0 = arith.constant 0 : i32
    %c0_i32_1 = arith.constant 0 : i32
    return %c0_i32, %c0_i32_0 : i32, i32
  }
  func.func @transform_2(%arg0: i32) -> (i32, i32) {
    %c0_i32 = arith.constant 0 : i32
    %c0_i32_0 = arith.constant 0 : i32
    %c0_i32_1 = arith.constant 0 : i32
    return %c0_i32, %c0_i32_0 : i32, i32
  }
  func.func @transform_3(%arg0: i32) -> (i32, i32) {
    %c0_i32 = arith.constant 0 : i32
    %c0_i32_0 = arith.constant 0 : i32
    %c0_i32_1 = arith.constant 0 : i32
    return %c0_i32, %c0_i32_0 : i32, i32
  }
  func.func @transform_4(%arg0: i32) -> (i32, i32, i32) {
    %c0_i32 = arith.constant 0 : i32
    %c0_i32_0 = arith.constant 0 : i32
    %c0_i32_1 = arith.constant 0 : i32
    %c0_i32_2 = arith.constant 0 : i32
    return %c0_i32, %c0_i32_0, %c0_i32_1 : i32, i32, i32
  }
  func.func @transform_5(%arg0: i32) -> (i32, i32, i32) {
    %c0_i32 = arith.constant 0 : i32
    %c0_i32_0 = arith.constant 0 : i32
    %c0_i32_1 = arith.constant 0 : i32
    %c0_i32_2 = arith.constant 0 : i32
    return %c0_i32, %c0_i32_0, %c0_i32_1 : i32, i32, i32
  }
  func.func @transform_6(%arg0: i32) -> (i32, i32, i32) {
    %c0_i32 = arith.constant 0 : i32
    %c0_i32_0 = arith.constant 0 : i32
    %c0_i32_1 = arith.constant 0 : i32
    %c0_i32_2 = arith.constant 0 : i32
    return %c0_i32, %c0_i32_0, %c0_i32_1 : i32, i32, i32
  }
  func.func @transform_7(%arg0: i32) -> (i32, i32, i32) {
    %c0_i32 = arith.constant 0 : i32
    %c0_i32_0 = arith.constant 0 : i32
    %c0_i32_1 = arith.constant 0 : i32
    %c0_i32_2 = arith.constant 0 : i32
    return %c0_i32, %c0_i32_0, %c0_i32_1 : i32, i32, i32
  }
  func.func @transform_8(%arg0: i32) -> (i32, i32, i32) {
    %c0_i32 = arith.constant 0 : i32
    %c0_i32_0 = arith.constant 0 : i32
    %c0_i32_1 = arith.constant 0 : i32
    %c0_i32_2 = arith.constant 0 : i32
    return %c0_i32, %c0_i32_0, %c0_i32_1 : i32, i32, i32
  }
  func.func @transform_9(%arg0: i32) -> (i32, i32, i32) {
    %c0_i32 = arith.constant 0 : i32
    %c0_i32_0 = arith.constant 0 : i32
    %c0_i32_1 = arith.constant 0 : i32
    %c0_i32_2 = arith.constant 0 : i32
    return %c0_i32, %c0_i32_0, %c0_i32_1 : i32, i32, i32
  }
  func.func @transform_10(%arg0: i32) -> (i32, i32, i32) {
    %c0_i32 = arith.constant 0 : i32
    %c0_i32_0 = arith.constant 0 : i32
    %c0_i32_1 = arith.constant 0 : i32
    %c0_i32_2 = arith.constant 0 : i32
    return %c0_i32, %c0_i32_0, %c0_i32_1 : i32, i32, i32
  }
  func.func @transform_11(%arg0: i32) -> (i32, i32, i32) {
    %c0_i32 = arith.constant 0 : i32
    %c0_i32_0 = arith.constant 0 : i32
    %c0_i32_1 = arith.constant 0 : i32
    %c0_i32_2 = arith.constant 0 : i32
    return %c0_i32, %c0_i32_0, %c0_i32_1 : i32, i32, i32
  }
  func.func @transform_12(%arg0: i32) -> (i32, i32, i32) {
    %c0_i32 = arith.constant 0 : i32
    %c0_i32_0 = arith.constant 0 : i32
    %c0_i32_1 = arith.constant 0 : i32
    %c0_i32_2 = arith.constant 0 : i32
    return %c0_i32, %c0_i32_0, %c0_i32_1 : i32, i32, i32
  }
  func.func @transform_13(%arg0: i32) -> (i32, i32, i32) {
    %c0_i32 = arith.constant 0 : i32
    %c0_i32_0 = arith.constant 0 : i32
    %c0_i32_1 = arith.constant 0 : i32
    %c0_i32_2 = arith.constant 0 : i32
    return %c0_i32, %c0_i32_0, %c0_i32_1 : i32, i32, i32
  }
  func.func @transform_14(%arg0: i32) -> (i32, i32, i32) {
    %c0_i32 = arith.constant 0 : i32
    %c0_i32_0 = arith.constant 0 : i32
    %c0_i32_1 = arith.constant 0 : i32
    %c0_i32_2 = arith.constant 0 : i32
    return %c0_i32, %c0_i32_0, %c0_i32_1 : i32, i32, i32
  }
  func.func @transform_15(%arg0: i32) -> (i32, i32, i32) {
    %c0_i32 = arith.constant 0 : i32
    %c0_i32_0 = arith.constant 0 : i32
    %c0_i32_1 = arith.constant 0 : i32
    %c0_i32_2 = arith.constant 0 : i32
    return %c0_i32, %c0_i32_0, %c0_i32_1 : i32, i32, i32
  }
  func.func @transform_16(%arg0: i32) -> (i32, i32) {
    %c0_i32 = arith.constant 0 : i32
    %c0_i32_0 = arith.constant 0 : i32
    %c0_i32_1 = arith.constant 0 : i32
    return %c0_i32, %c0_i32_0 : i32, i32
  }
  func.func @transform_17(%arg0: i32) -> (i32, i32) {
    %c0_i32 = arith.constant 0 : i32
    %c0_i32_0 = arith.constant 0 : i32
    %c0_i32_1 = arith.constant 0 : i32
    return %c0_i32, %c0_i32_0 : i32, i32
  }
  func.func @transform_18(%arg0: i32) -> (i32, i32) {
    %c0_i32 = arith.constant 0 : i32
    %c0_i32_0 = arith.constant 0 : i32
    %c0_i32_1 = arith.constant 0 : i32
    return %c0_i32, %c0_i32_0 : i32, i32
  }
  func.func @transform_19(%arg0: i32) -> (i32, i32) {
    %c0_i32 = arith.constant 0 : i32
    %c0_i32_0 = arith.constant 0 : i32
    %c0_i32_1 = arith.constant 0 : i32
    return %c0_i32, %c0_i32_0 : i32, i32
  }
  func.func @transform_20(%arg0: i32) -> (i32, i32, i32) {
    %c0_i32 = arith.constant 0 : i32
    %c0_i32_0 = arith.constant 0 : i32
    %c0_i32_1 = arith.constant 0 : i32
    return %arg0, %c0_i32, %c0_i32_0 : i32, i32, i32
  }
}

</mosaic_0001>

<bundles_post_ra>
// kernel: vit_forward.1
= control target key start
LH: loop header
LB: loop body
LE: loop exit
PB: predicated region body
PF: predicated region fallthrough
CT: control target
= control target key end

     0   :  { %s6313_s0 = inlined_call_operand.vmem [shape: f32[2,24,64], index: 0, kind: input, shape index: {}]   ;;  %s6314_s1 = inlined_call_operand.vmem [shape: f32[24,24], index: 1, kind: input, shape index: {}]   ;;  %s6315_s2 = inlined_call_operand.vmem [shape: f32[64,32], index: 2, kind: input, shape index: {}]   ;;  %s6316_s3 = inlined_call_operand.vmem [shape: f32[24,32], index: 3, kind: input, shape index: {}]   ;;  %s6317_s4 = inlined_call_operand.vmem [shape: f32[2,1,32], index: 4, kind: input, shape index: {}]   ;;  %s6318_s5 = inlined_call_operand.vmem [shape: f32[2,1,32], index: 5, kind: input, shape index: {}]   ;;  %s6319_s6 = inlined_call_operand.vmem [shape: f32[2,32,96], index: 6, kind: input, shape index: {}]   ;;  %s6320_s7 = inlined_call_operand.vmem [shape: f32[2,1,96], index: 7, kind: input, shape index: {}]   ;;  %s6321_s8 = inlined_call_operand.vmem [shape: f32[2,32,32], index: 8, kind: input, shape index: {}]   ;;  %s6322_s9 = inlined_call_operand.vmem [shape: f32[2,1,32], index: 9, kind: input, shape index: {}]   ;;  %s6323_s10 = inlined_call_operand.vmem [shape: f32[2,1,32], index: 10, kind: input, shape index: {}]   ;;  %s6324_s11 = inlined_call_operand.vmem [shape: f32[2,1,32], index: 11, kind: input, shape index: {}]   ;;  %s6325_s12 = inlined_call_operand.vmem [shape: f32[2,32,64], index: 12, kind: input, shape index: {}]   ;;  %s6326_s13 = inlined_call_operand.vmem [shape: f32[2,1,64], index: 13, kind: input, shape index: {}]   ;;  %s6327_s14 = inlined_call_operand.vmem [shape: f32[2,64,32], index: 14, kind: input, shape index: {}]   ;;  %s6328_s15 = inlined_call_operand.vmem [shape: f32[2,1,32], index: 15, kind: input, shape index: {}]   ;;  %s6329_s16 = inlined_call_operand.vmem [shape: f32[1,32], index: 16, kind: input, shape index: {}]   ;;  %s6330_s17 = inlined_call_operand.vmem [shape: f32[1,32], index: 17, kind: input, shape index: {}]   ;;  %s6331_s18 = inlined_call_operand.vmem [shape: f32[32,128], index: 18, kind: input, shape index: {}]   ;;  %s6332_s19 = inlined_call_operand.vmem [shape: f32[1,128], index: 19, kind: input, shape index: {}]   ;;  %s6333_s20 = inlined_call_operand.hbm [shape: f32[2,1,128], index: 20, kind: output, shape index: {}]  }
   0x1   :  { %6373 = sst [smem:[#allocation11_spill]] %s6313_s0 }
   0x2   :  { %6374 = sst [smem:[#allocation12_spill]] %s6314_s1 }
   0x3   :  { %6375 = sst [smem:[#allocation13_spill]] %s6315_s2 }
   0x4   :  { %6376 = sst [smem:[#allocation14_spill]] %s6316_s3 }
   0x5   :  { %6377 = sst [smem:[#allocation15_spill]] %s6317_s4 }
   0x6   :  { %6378 = sst [smem:[#allocation16_spill]] %s6318_s5 }
   0x7   :  { %6379 = sst [smem:[#allocation17_spill]] %s6319_s6 }
   0x8   :  { %25 = vsyncpa [#allocation3], 0 }
   0x9   :  { %27 = vsyncpa [#allocation3 + $0x1], 0  ;;  %s5114_s1 = smov 0   ;;  %s5116_s22 = smov 0  }
   0xa   :  { %s5118_s23 = smov 0   ;;  %s5120_s24 = smov 0  }
   0xb LB: > { %6380 = sst [smem:[#allocation5_spill]] %s4978_s1  ;;  %s5135_s2 = sadd.s32 4294967295, %s4990_s24   ;;  %s4990_s24 = sphi %s5120_s24, %s6413_s24   ;;  %s4986_s23 = sphi %s5118_s23, %s6415_s23   ;;  %s4982_s22 = sphi %s5116_s22, %s6417_s22   ;;  %s4978_s1 = sphi %s5114_s1, %s6416_s1  }
   0xc   : > { %6381 = sst [smem:[#allocation6_spill]] %s4986_s23  ;;  %s3973_s25 = sadd.s32 4294967294, %s4990_s24  }
   0xd   : > { %6382 = sst [smem:[#allocation7_spill]] %s4990_s24  ;;  %s5139_s3 = sadd.s32 1, %s4990_s24  }
   0xe   : > { %6383 = sst [smem:[#allocation8_spill]] %s5139_s3  ;;  %s465_s26 = sadd.s32 1, %s4986_s23 }
   0xf   : > { %s462_s27 = ssub.s32 %s4990_s24, %s5139_s3  ;;  %p475_p0 = scmp.ne.s32.totalorder %s4986_s23, %s4982_s22 }
  0x10   : > { %p463_p1 = scmp.eq.s32.totalorder %s462_s27, 0  ;;  %p476_p2 = scmp.eq.s32.totalorder %s5135_s2, 1 }
  0x11   : > { %p481_p3 = scmp.ne.s32.totalorder %s4982_s22, %s4978_s1  ;;  %p482_p4 = scmp.eq.s32.totalorder %s3973_s25, 1 }
  0x12   : > { %s5150_s28 = scalar_select %p463_p1, %s4986_s23, %s465_s26  }
  0x13   : > { %p5152_p5 = por %p476_p2, %p475_p0  ;;  %p5156_p6 = por %p482_p4, %p481_p3 }
  0x14   : > { %6384 = sst [smem:[#allocation9_spill]] %s5150_s28  ;;  %p3976_p7 = scmp.ge.s32.totalorder %s4990_s24, 1 }
  0x15   : > { %s6386_s29 = scalar_select %p5156_p6, 1, 0 }
  0x16   : > { %p565_p8 = scmp.lt.s32.totalorder %s4990_s24, 3 }
  0x17   : > { %6387 = sst [smem:[#allocation10_spill]] %s6386_s29 }
  0x18   : > { %p566_p9 = pnand %p3976_p7, %p565_p8 }
  0x19   : > { %s6388_s21 = sld [smem:[#allocation13_spill]] (!%p566_p9)  ;;  %p622_p10 = scmp.lt.s32.totalorder (!%p566_p9), %s5135_s2, 1 }
  0x1a   : > { %569 = sbr.rel (%p566_p9) target bundleno = 6236 (0x185c), region = 100  ;;  %s6389_s24 = sld [smem:[#allocation11_spill]] (!%p566_p9) }
  0x1b   : > { %s6390_s3 = sld [smem:[#allocation14_spill]] (!%p566_p9)  ;;  %s6362_s29 = smov (!%p566_p9), 88  }
  0x1c   : > { %s6391_s6 = sld [smem:[#allocation17_spill]] (!%p566_p9)  ;;  %s6348_s30 = smov (!%p566_p9), 80  }
  0x1d   : > { %s6392_s26 = sld [smem:[#allocation15_spill]] (!%p566_p9)  ;;  %s6346_s25 = smov (!%p566_p9), 112  }
  0x1e   : > { %s6393_s5 = sld [smem:[#allocation16_spill]] (!%p566_p9)  ;;  %s6356_s28 = smov (!%p566_p9), 56  }
  0x1f   : > { %v640_v0 = vld [vmem:[%s6388_s21 + $0x38] sm:$0xff]  ;;  %v4992_v1 = vmov 0.0   ;;  %v639_v2 = vld [vmem:[%s6388_s21 + $0x30] sm:$0xff]  ;;  %vm4993_vm0 = vmmov 0   ;;  %v638_v3 = vld [vmem:[%s6388_s21 + $0x28] sm:$0xff]  ;;  %s623_s0 = scalar_select %p622_p10, %s5135_s2, 1 }
  0x20   : > { %4303 = vmatprep.subr.mxu0 %v4992_v1  ;;  %4319 = vmatprep.mubr.msk.f32.mxu0 %vm4993_vm0, %v4992_v1  ;;  %v637_v4 = vld [vmem:[%s6388_s21 + $0x20] sm:$0xff]  ;;  %v636_v5 = vld [vmem:[%s6388_s21 + $0x18] sm:$0xff]  ;;  %v635_v6 = vld [vmem:[%s6388_s21 + $0x10] sm:$0xff]  ;;  %vm644_vm1 = vcmask 523264   ;;  %vm736_vm2 = vcmask 261120   ;;  %vm904_vm3 = vcmask 64512  }
  0x21   : > { %4304 = vmatpush3.msra.mxu0 %v640_v0  ;;  %4328 = vmatprep.subr.mxu1 %v4992_v1  ;;  %s4737_s27 = smul.u32 24, %s623_s0  ;;  %v634_v7 = vld [vmem:[%s6388_s21 + $0x8] sm:$0xff]  ;;  %v633_v8 = vld [vmem:[%s6388_s21] sm:$0xff]  ;;  %v643_v21 = vld [vmem:[%s6390_s3 + $0x10] sm:$0xff]  ;;  %vm997_vm4 = vcmask 195584   ;;  %s6358_s1 = smov 104  }
  0x22   : > { %4305 = vmatprep.subr.mxu0 %v4992_v1  ;;  %4336 = vmatprep.mubr.msk.f32.mxu1 %vm4993_vm0, %v4992_v1  ;;  %v641_v12 = vld [vmem:[%s6390_s3] sm:$0xff]  ;;  %v642_v16 = vld [vmem:[%s6390_s3 + $0x8] sm:$0xff]  ;;  %v798_v42 = vld [vmem:[%s6391_s6 + $0x18] sm:$0xff]  ;;  %s6354_s0 = smov 40   ;;  %vm1873_vm5 = vcmask 130048   ;;  %s6399_s3 = smov 120  }
  0x23   : > { %4306 = vmatpush3.msra.mxu0 %v639_v2  ;;  %s626_s23 = scalar_lea.vmem %s6389_s24, %s4737_s27  ;;  %v797_v43 = vld [vmem:[%s6391_s6 + $0x10] sm:$0xff]  ;;  %4329 = vmatpush3.msra.mxu1 %v798_v42  ;;  %v796_v44 = vld [vmem:[%s6391_s6 + $0x8] sm:$0xff]  ;;  %v795_v45 = vld [vmem:[%s6391_s6] sm:$0xff]  ;;  %s6364_s24 = smov 96  }
  0x24   : > { %4307 = vmatprep.subr.mxu0 %v4992_v1  ;;  %v630_v9 = vld [vmem:[%s626_s23] sm:$0xff]  ;;  %v631_v10 = vld [vmem:[%s626_s23 + $0x8] sm:$0xff]  ;;  %v632_v11 = vld [vmem:[%s626_s23 + $0x10] sm:$0xff]  ;;  %4330 = vmatprep.subr.mxu1 %v4992_v1  ;;  %s6350_s27 = smov 120   ;;  %s6344_s23 = smov 64  }
  0x25   : > { %4308 = vmatpush3.msra.mxu0 %v638_v3  ;;  %4331 = vmatpush3.msra.mxu1 %v797_v43  ;;  %v3981_v56 = vld [vmem:[%s6392_s26] ss:$0 sm:$0xff] }
  0x26   : > { %4309 = vmatprep.subr.mxu0 %v4992_v1  ;;  %4332 = vmatprep.subr.mxu1 %v4992_v1  ;;  %v3982_v58 = vld [vmem:[%s6393_s5] ss:$0 sm:$0xff] }
  0x27   : > { %4310 = vmatpush3.msra.mxu0 %v637_v4  ;;  %4333 = vmatpush3.msra.mxu1 %v796_v44 }
  0x28   : > { %4311 = vmatprep.subr.mxu0 %v4992_v1  ;;  %4334 = vmatprep.subr.mxu1 %v4992_v1 }
  0x29   : > { %4312 = vmatpush3.msra.mxu0 %v636_v5  ;;  %4335 = vmatpush3.msra.mxu1 %v795_v45 }
  0x2a   : > { %4313 = vmatprep.subr.mxu0 %v4992_v1  ;;  %4345 = vmatprep.subr.mxu1 %v4992_v1 }
  0x2b   : > { %4314 = vmatpush3.msra.mxu0 %v635_v6 }
  0x2c   : > { %4315 = vmatprep.subr.mxu0 %v4992_v1 }
  0x2d   : > { %4316 = vmatpush3.msra.mxu0 %v634_v7 }
  0x2e   : > { %4317 = vmatprep.subr.mxu0 %v4992_v1 }
  0x2f   : > { %4318 = vmatpush3.msra.mxu0 %v633_v8  ;;  %v3983_v8 = vld [vmem:[%s6320_s7] ss:$0 sm:$0xff] }
  0x30   : > { %4320 = vmatmul.mubr.msk.f32.vlgmr.msra.gmra.mxu0 %vm644_vm1, %v630_v9  ;;  %4360 = vmatprep.subr.mxu0 %v4992_v1 }
  0x31   : > { %4322 = vmatprep.mubr.msk.f32.mxu0 %vm4993_vm0, %v4992_v1 }
  0x34   : > { %4323 = vmatmul.mubr.msk.f32.gmra.mxu0 %vm644_vm1, %v631_v10 }
  0x35   : > { %4325 = vmatprep.mubr.msk.f32.mxu0 %vm4993_vm0, %v4992_v1 }
  0x38   : > { %4326 = vmatmul.mubr.msk.f32.gmra.mxu0 %vm644_vm1, %v632_v11 }
  0x39   : > { %4366 = vmatprep.mubr.msk.f32.mxu0 %vm4993_vm0, %v4992_v1 }
  0xf0   : > { %v720_v13 = vpop.f32.mrf.mxu0 }
  0xf1   : > { %v5217_v14 = vadd.f32 %v720_v13, %v641_v12 }
  0xf2   : > { %v4321_v15 = vpop.f32.mrf.mxu0 }
  0xf3   : > { %v737_v17 = vsel %vm736_vm2, %v5217_v14, 0.0 }
  0xf4   : > { %738 = vadd.xlane.f32.xlu0 %v737_v17  ;;  %v725_v18 = vpop.f32.mrf.mxu0 }
  0xf5   : > { %v5224_v19 = vadd.f32 %v725_v18, %v642_v16 }
  0xf6   : > { %v4324_v20 = vpop.f32.mrf.mxu0 }
  0xf7   : > { %v740_v22 = vsel %vm736_vm2, %v5224_v19, 0.0 }
  0xf8   : > { %741 = vadd.xlane.f32.xlu0 %v740_v22  ;;  %v730_v23 = vpop.f32.mrf.mxu0 }
  0xf9   : > { %v5231_v24 = vadd.f32 %v730_v23, %v643_v21 }
  0xfa   : > { %v4327_v25 = vpop.f32.mrf.mxu0 }
  0xfb   : > { %v743_v26 = vsel %vm736_vm2, %v5231_v24, 0.0 }
  0xfc   : > { %744 = vadd.xlane.f32.xlu1 %v743_v26 }
 0x17d   : > { %v739_v27 = vpop.xlane.xlu0 %738 }
 0x17e   : > { %v747_v28 = vmul.f32 0.03125, %v739_v27 }
 0x180   : > { %v750_v29 = vsub.f32 %v5217_v14, %v747_v28 }
 0x181   : > { %v742_v30 = vpop.xlane.xlu0 %741 }
 0x182   : > { %v748_v31 = vmul.f32 0.03125, %v742_v30  ;;  %v753_v32 = vmul.f32 %v750_v29, %v750_v29 }
 0x184   : > { %v751_v33 = vsub.f32 %v5224_v19, %v748_v31  ;;  %v756_v34 = vsel %vm736_vm2, %v753_v32, 0.0 }
 0x185   : > { %757 = vadd.xlane.f32.xlu1 %v756_v34  ;;  %v745_v35 = vpop.xlane.xlu1 %744 }
 0x186   : > { %v749_v36 = vmul.f32 0.03125, %v745_v35  ;;  %v754_v37 = vmul.f32 %v751_v33, %v751_v33 }
 0x188   : > { %v752_v38 = vsub.f32 %v5231_v24, %v749_v36  ;;  %v759_v39 = vsel %vm736_vm2, %v754_v37, 0.0 }
 0x189   : > { %760 = vadd.xlane.f32.xlu0 %v759_v39 }
 0x18a   : > { %v755_v40 = vmul.f32 %v752_v38, %v752_v38 }
 0x18c   : > { %v762_v41 = vsel %vm736_vm2, %v755_v40, 0.0 }
 0x18d   : > { %763 = vadd.xlane.f32.xlu1 %v762_v41 }
 0x20e   : > { %v758_v46 = vpop.xlane.xlu1 %757 }
 0x20f   : > { %v765_v47 = vmul.f32 0.03125, %v758_v46 }
 0x211   : > { %v768_v48 = vadd.f32 1e-06, %v765_v47 }
 0x212   : > { %v761_v49 = vpop.xlane.xlu0 %760 }
 0x213   : > { %4793 = vrsqrt.f32 %v768_v48  ;;  %v766_v50 = vmul.f32 0.03125, %v761_v49 }
 0x215   : > { %v769_v51 = vadd.f32 1e-06, %v766_v50 }
 0x216   : > { %v764_v52 = vpop.xlane.xlu1 %763 }
 0x217   : > { %4795 = vrsqrt.f32 %v769_v51  ;;  %v767_v53 = vmul.f32 0.03125, %v764_v52 }
 0x219   : > { %v770_v54 = vadd.f32 1e-06, %v767_v53 }
 0x21b   : > { %4797 = vrsqrt.f32 %v770_v54 }
 0x220   : > { %v4794_v55 = vpop.eup %4793 }
 0x221   : > { %v774_v57 = vmul.f32 %v4794_v55, %v750_v29 }
 0x223   : > { %v783_v59 = vmul.f32 %v3981_v56, %v774_v57 }
 0x224   : > { %v4796_v60 = vpop.eup %4795 }
 0x225   : > { %v792_v61 = vadd.f32 %v3982_v58, %v783_v59  ;;  %v775_v62 = vmul.f32 %v4796_v60, %v751_v33 }
 0x227   : > { %4337 = vmatmul.mubr.msk.f32.vlgmr.msra.gmra.mxu1 %vm736_vm2, %v792_v61  ;;  %v784_v63 = vmul.f32 %v3981_v56, %v775_v62 }
 0x228   : > { %v4798_v0 = vpop.eup %4797  ;;  %4339 = vmatprep.mubr.msk.f32.mxu1 %vm4993_vm0, %v4992_v1 }
 0x229   : > { %v793_v2 = vadd.f32 %v3982_v58, %v784_v63  ;;  %v776_v3 = vmul.f32 %v4798_v0, %v752_v38 }
 0x22b   : > { %4340 = vmatmul.mubr.msk.f32.gmra.mxu1 %vm736_vm2, %v793_v2  ;;  %v785_v4 = vmul.f32 %v3981_v56, %v776_v3 }
 0x22c   : > { %4342 = vmatprep.mubr.msk.f32.mxu1 %vm4993_vm0, %v4992_v1 }
 0x22d   : > { %v794_v5 = vadd.f32 %v3982_v58, %v785_v4 }
 0x22f   : > { %4343 = vmatmul.mubr.msk.f32.gmra.mxu1 %vm736_vm2, %v794_v5 }
 0x230   : > { %4351 = vmatprep.mubr.msk.f32.mxu1 %vm4993_vm0, %v4992_v1 }
 0x2e7   : > { %v881_v6 = vpop.f32.mrf.mxu1 }
 0x2e8   : > { %v5279_v13 = vadd.f32 %v3983_v8, %v881_v6 }
 0x2e9   : > { %v4338_v7 = vpop.f32.mrf.mxu1 }
 0x2eb   : > { %v886_v9 = vpop.f32.mrf.mxu1 }
 0x2ec   : > { %v5275_v10 = vadd.f32 %v3983_v8, %v886_v9 }
 0x2ed   : > { %v4341_v11 = vpop.f32.mrf.mxu1 }
 0x2ee   : > { %900 = vrot.lane.b32.xlu1 %v5275_v10, %s6364_s24 }
 0x2ef   : > { %v891_v12 = vpop.f32.mrf.mxu1 }
 0x2f0   : > { %v5281_v15 = vadd.f32 %v3983_v8, %v891_v12 }
 0x2f1   : > { %v4344_v16 = vpop.f32.mrf.mxu1 }
 0x2f2   : > { %898 = vrot.lane.b32.xlu1 %v5279_v13, %s6364_s24  ;;  %902 = vrot.lane.b32.xlu0 %v5281_v15, %s6364_s24  ;;  %s6396_s24 = smov 16  }
 0x2f6   : > { %1139 = vrot.lane.b32.xlu1 %v5281_v15, %s6362_s29  ;;  %1137 = vrot.lane.b32.xlu0 %v5275_v10, %s6362_s29 }
 0x2fa   : > { %1135 = vrot.lane.b32.xlu1 %v5279_v13, %s6362_s29  ;;  %1129 = vrot.lane.b32.xlu0 %v5279_v13, %s6350_s27  ;;  %s6397_s29 = smov 96  }
 0x2fe   : > { %1374 = vrot.lane.b32.xlu1 %v5281_v15, %s6348_s30  ;;  %1131 = vrot.lane.b32.xlu0 %v5275_v10, %s6350_s27 }
 0x302   : > { %1372 = vrot.lane.b32.xlu1 %v5275_v10, %s6348_s30  ;;  %1133 = vrot.lane.b32.xlu0 %v5281_v15, %s6350_s27  ;;  %s6352_s27 = smov 48  }
 0x306   : > { %1370 = vrot.lane.b32.xlu1 %v5279_v13, %s6348_s30  ;;  %1364 = vrot.lane.b32.xlu0 %v5279_v13, %s6346_s25  ;;  %s6360_s30 = smov 72  }
 0x30a   : > { %1366 = vrot.lane.b32.xlu1 %v5275_v10, %s6346_s25  ;;  %1368 = vrot.lane.b32.xlu0 %v5281_v15, %s6346_s25 }
 0x30e   : > { %1033 = vrot.lane.b32.xlu1 %v5275_v10, %s6344_s23  ;;  %1035 = vrot.lane.b32.xlu0 %v5281_v15, %s6344_s23 }
 0x312   : > { %1031 = vrot.lane.b32.xlu1 %v5279_v13, %s6344_s23  ;;  %1270 = vrot.lane.b32.xlu0 %v5281_v15, %s6356_s28  ;;  %s6394_s23 = sld [smem:[#allocation12_spill]] }
 0x316   : > { %1268 = vrot.lane.b32.xlu1 %v5275_v10, %s6356_s28 }
 0x318   : > { %s6395_s25 = smov %s6394_s23  ;;  %v5375_v37 = vld [vmem:[%s6394_s23] sm:$0xff]  ;;  %s6366_s23 = smov 16  }
 0x319   : > { %v5381_v41 = vld [vmem:[%s6395_s25 + $0x8] sm:$0xff]  ;;  %v5388_v46 = vld [vmem:[%s6395_s25 + $0x10] sm:$0xff] }
 0x360   : > { %v901_v17 = vpop.permute.xlu1 %900 }
 0x364   : > { %v903_v18 = vpop.permute.xlu0 %902  ;;  %v899_v20 = vpop.permute.xlu1 %898 }
 0x365   : > { %4346 = vmatpush3.xpose.msk.msra.mxu1 %vm904_vm3, %v903_v18 }
 0x366   : > { %4347 = vmatprep.subr.mxu1 %v4992_v1 }
 0x368   : > { %v1138_v21 = vpop.permute.xlu0 %1137  ;;  %v1140_v22 = vpop.permute.xlu1 %1139 }
 0x369   : > { %4348 = vmatpush3.xpose.msk.msra.mxu1 %vm904_vm3, %v901_v17 }
 0x36a   : > { %4349 = vmatprep.subr.mxu1 %v4992_v1 }
 0x36c   : > { %v1130_v23 = vpop.permute.xlu0 %1129  ;;  %v1136_v25 = vpop.permute.xlu1 %1135 }
 0x36d   : > { %4350 = vmatpush3.xpose.msk.msra.mxu1 %vm904_vm3, %v899_v20 }
 0x36e   : > { %4375 = vmatprep.subr.mxu1 %v4992_v1 }
 0x370   : > { %v1132_v26 = vpop.permute.xlu0 %1131  ;;  %4352 = vmatmul.mubr.msk.f32.vlgmr.msra.gmra.mxu1 %vm904_vm3, %v5279_v13  ;;  %v1375_v27 = vpop.permute.xlu1 %1374 }
 0x371   : > { %4376 = vmatpush3.xpose.msk.msra.mxu1 %vm904_vm3, %v1140_v22  ;;  %4354 = vmatprep.mubr.msk.f32.mxu1 %vm4993_vm0, %v4992_v1 }
 0x372   : > { %4377 = vmatprep.subr.mxu1 %v4992_v1 }
 0x374   : > { %v1134_v28 = vpop.permute.xlu0 %1133  ;;  %4355 = vmatmul.mubr.msk.f32.gmra.mxu1 %vm904_vm3, %v5275_v10  ;;  %v1373_v29 = vpop.permute.xlu1 %1372 }
 0x375   : > { %4378 = vmatpush3.xpose.msk.msra.mxu1 %vm904_vm3, %v1138_v21  ;;  %4357 = vmatprep.mubr.msk.f32.mxu1 %vm4993_vm0, %v4992_v1 }
 0x376   : > { %4379 = vmatprep.subr.mxu1 %v4992_v1 }
 0x378   : > { %v1365_v30 = vpop.permute.xlu0 %1364  ;;  %4358 = vmatmul.mubr.msk.f32.gmra.mxu1 %vm904_vm3, %v5281_v15  ;;  %v1371_v31 = vpop.permute.xlu1 %1370 }
 0x379   : > { %4380 = vmatpush3.xpose.msk.msra.mxu1 %vm904_vm3, %v1136_v25  ;;  %4381 = vmatprep.mubr.msk.f32.mxu1 %vm4993_vm0, %v4992_v1 }
 0x37a   : > { %4405 = vmatprep.subr.mxu1 %v4992_v1 }
 0x37c   : > { %v1369_v32 = vpop.permute.xlu0 %1368  ;;  %4382 = vmatmul.mubr.msk.f32.vlgmr.msra.gmra.mxu1 %vm904_vm3, %v1130_v23  ;;  %v1367_v33 = vpop.permute.xlu1 %1366 }
 0x37d   : > { %4406 = vmatpush3.xpose.msk.msra.mxu1 %vm904_vm3, %v1375_v27  ;;  %4384 = vmatprep.mubr.msk.f32.mxu1 %vm4993_vm0, %v4992_v1 }
 0x37e   : > { %4407 = vmatprep.subr.mxu1 %v4992_v1 }
 0x380   : > { %v1036_v34 = vpop.permute.xlu0 %1035  ;;  %4385 = vmatmul.mubr.msk.f32.gmra.mxu1 %vm904_vm3, %v1132_v26  ;;  %v1034_v35 = vpop.permute.xlu1 %1033 }
 0x381   : > { %4361 = vmatpush3.msra.mxu0 %v1036_v34  ;;  %4408 = vmatpush3.xpose.msk.msra.mxu1 %vm904_vm3, %v1373_v29 }
 0x382   : > { %4362 = vmatprep.subr.mxu0 %v4992_v1  ;;  %4387 = vmatprep.mubr.msk.f32.mxu1 %vm4993_vm0, %v4992_v1 }
 0x383   : > { %4363 = vmatpush3.msra.mxu0 %v1034_v35  ;;  %4409 = vmatprep.subr.mxu1 %v4992_v1 }
 0x384   : > { %4364 = vmatprep.subr.mxu0 %v4992_v1  ;;  %4388 = vmatmul.mubr.msk.f32.gmra.mxu1 %vm904_vm3, %v1134_v28  ;;  %v1032_v36 = vpop.permute.xlu1 %1031  ;;  %v5420_v18 = vpop.permute.xlu0 %1270 }
 0x385   : > { %4365 = vmatpush3.msra.mxu0 %v1032_v36  ;;  %4410 = vmatpush3.xpose.msk.msra.mxu1 %vm904_vm3, %v1371_v31 }
 0x386   : > { %4411 = vmatprep.mubr.msk.f32.mxu1 %vm4993_vm0, %v4992_v1  ;;  %4390 = vmatprep.subr.mxu0 %v4992_v1 }
 0x387   : > { %4731 = vmatprep.subr.mxu1 %v4992_v1 }
 0x388   : > { %4412 = vmatmul.mubr.msk.f32.vlgmr.msra.gmra.mxu1 %vm904_vm3, %v1365_v30  ;;  %v5418_v17 = vpop.permute.xlu1 %1268 }
 0x389   : > { %4414 = vmatprep.mubr.msk.f32.mxu1 %vm4993_vm0, %v4992_v1 }
 0x38c   : > { %4415 = vmatmul.mubr.msk.f32.gmra.mxu1 %vm904_vm3, %v1367_v33 }
 0x38d   : > { %4417 = vmatprep.mubr.msk.f32.mxu1 %vm4993_vm0, %v4992_v1 }
 0x390   : > { %4418 = vmatmul.mubr.msk.f32.gmra.mxu1 %vm904_vm3, %v1369_v32 }
 0x391   : > { %4444 = vmatprep.mubr.msk.f32.mxu1 %vm4993_vm0, %v4992_v1 }
 0x430   : > { %v983_v38 = vpop.f32.mrf.mxu1 }
 0x431   : > { %v984_v39 = vadd.f32 %v983_v38, %v5375_v37 }
 0x432   : > { %v4353_v40 = vpop.f32.mrf.mxu1 }
 0x433   : > { %v998_v42 = vsel %vm997_vm4, %v984_v39, -inf }
 0x434   : > { %999 = vmax.xlane.f32.xlu1 %v998_v42  ;;  %v988_v43 = vpop.f32.mrf.mxu1 }
 0x435   : > { %v989_v44 = vadd.f32 %v988_v43, %v5381_v41 }
 0x436   : > { %v4356_v45 = vpop.f32.mrf.mxu1 }
 0x437   : > { %v1001_v47 = vsel %vm997_vm4, %v989_v44, -inf }
 0x438   : > { %1002 = vmax.xlane.f32.xlu0 %v1001_v47  ;;  %v993_v48 = vpop.f32.mrf.mxu1 }
 0x439   : > { %v994_v49 = vadd.f32 %v993_v48, %v5388_v46 }
 0x43a   : > { %v4359_v50 = vpop.f32.mrf.mxu1 }
 0x43b   : > { %v1004_v51 = vsel %vm997_vm4, %v994_v49, -inf }
 0x43c   : > { %1005 = vmax.xlane.f32.xlu0 %v1004_v51  ;;  %v1219_v52 = vpop.f32.mrf.mxu1 }
 0x43d   : > { %v1220_v53 = vadd.f32 %v1219_v52, %v5375_v37 }
 0x43e   : > { %v4383_v54 = vpop.f32.mrf.mxu1 }
 0x43f   : > { %v1233_v55 = vsel %vm997_vm4, %v1220_v53, -inf }
 0x440   : > { %1234 = vmax.xlane.f32.xlu0 %v1233_v55  ;;  %v1224_v56 = vpop.f32.mrf.mxu1 }
 0x441   : > { %v1225_v57 = vadd.f32 %v1224_v56, %v5381_v41 }
 0x442   : > { %v4386_v58 = vpop.f32.mrf.mxu1 }
 0x443   : > { %v1236_v59 = vsel %vm997_vm4, %v1225_v57, -inf }
 0x444   : > { %1237 = vmax.xlane.f32.xlu1 %v1236_v59  ;;  %v1229_v60 = vpop.f32.mrf.mxu1 }
 0x445   : > { %v5398_v61 = vadd.f32 %v1229_v60, %v5388_v46 }
 0x446   : > { %v4389_v62 = vpop.f32.mrf.mxu1 }
 0x447   : > { %v1239_v63 = vsel %vm997_vm4, %v5398_v61, -inf }
 0x448   : > { %1240 = vmax.xlane.f32.xlu0 %v1239_v63  ;;  %v1454_v0 = vpop.f32.mrf.mxu1 }
 0x449   : > { %v5403_v2 = vadd.f32 %v1454_v0, %v5375_v37 }
 0x44a   : > { %v4413_v3 = vpop.f32.mrf.mxu1 }
 0x44b   : > { %v1468_v4 = vsel %vm997_vm4, %v5403_v2, -inf }
 0x44c   : > { %1469 = vmax.xlane.f32.xlu1 %v1468_v4  ;;  %v1459_v5 = vpop.f32.mrf.mxu1 }
 0x44d   : > { %v1460_v6 = vadd.f32 %v1459_v5, %v5381_v41 }
 0x44e   : > { %v4416_v7 = vpop.f32.mrf.mxu1 }
 0x44f   : > { %v1471_v8 = vsel %vm997_vm4, %v1460_v6, -inf }
 0x450   : > { %1472 = vmax.xlane.f32.xlu0 %v1471_v8  ;;  %v1464_v9 = vpop.f32.mrf.mxu1 }
 0x451   : > { %v5414_v12 = vadd.f32 %v1464_v9, %v5388_v46 }
 0x452   : > { %v4419_v11 = vpop.f32.mrf.mxu1 }
 0x453   : > { %v1474_v16 = vsel %vm997_vm4, %v5414_v12, -inf }
 0x45d   : > { %1505 = vrot.lane.b32.xlu1 %v5281_v15, %s6352_s27 }
 0x466   : > { %1266 = vrot.lane.b32.xlu0 %v5279_v13, %s6356_s28  ;;  %s6404_s28 = smov 64  }
 0x481   : > { %1475 = vmax.xlane.f32.xlu1 %v1474_v16 }
 0x4bd   : > { %v1000_v20 = vpop.xlane.xlu1 %999 }
 0x4be   : > { %v1007_v21 = vsub.f32 %v984_v39, %v1000_v20 }
 0x4c0   : > { %v1010_v22 = vmul.f32 1.442695, %v1007_v21 }
 0x4c1   : > { %v1003_v23 = vpop.xlane.xlu0 %1002 }
 0x4c2   : > { %4799 = vpow2.f32 %v1010_v22  ;;  %v1008_v25 = vsub.f32 %v989_v44, %v1003_v23 }
 0x4c4   : > { %v1012_v26 = vmul.f32 1.442695, %v1008_v25 }
 0x4c5   : > { %v1006_v27 = vpop.xlane.xlu0 %1005 }
 0x4c6   : > { %4801 = vpow2.f32 %v1012_v26  ;;  %v1009_v28 = vsub.f32 %v994_v49, %v1006_v27 }
 0x4c8   : > { %v1014_v29 = vmul.f32 1.442695, %v1009_v28 }
 0x4c9   : > { %v1235_v30 = vpop.xlane.xlu0 %1234 }
 0x4ca   : > { %4803 = vpow2.f32 %v1014_v29  ;;  %v1242_v31 = vsub.f32 %v1220_v53, %v1235_v30 }
 0x4cc   : > { %v1245_v32 = vmul.f32 1.442695, %v1242_v31 }
 0x4cd   : > { %v1238_v33 = vpop.xlane.xlu1 %1237 }
 0x4ce   : > { %4805 = vpow2.f32 %v1245_v32  ;;  %v1243_v34 = vsub.f32 %v1225_v57, %v1238_v33 }
 0x4cf   : > { %v5422_v35 = vpop.eup %4799 }
 0x4d0   : > { %v1247_v36 = vmul.f32 1.442695, %v1243_v34  ;;  %v1016_v38 = vsel %vm997_vm4, %v5422_v35, 0.0 }
 0x4d1   : > { %1017 = vadd.xlane.f32.xlu0 %v1016_v38  ;;  %v1241_v49 = vpop.xlane.xlu0 %1240 }
 0x4d2   : > { %4807 = vpow2.f32 %v1247_v36  ;;  %v1244_v50 = vsub.f32 %v5398_v61, %v1241_v49 }
 0x4d3   : > { %v5426_v39 = vpop.eup %4801 }
 0x4d4   : > { %v1019_v40 = vsel %vm997_vm4, %v5426_v39, 0.0  ;;  %v1249_v54 = vmul.f32 1.442695, %v1244_v50 }
 0x4d5   : > { %1020 = vadd.xlane.f32.xlu1 %v1019_v40  ;;  %v1470_v51 = vpop.xlane.xlu1 %1469 }
 0x4d6   : > { %v1477_v53 = vsub.f32 %v5403_v2, %v1470_v51  ;;  %4809 = vpow2.f32 %v1249_v54 }
 0x4d7   : > { %v5430_v42 = vpop.eup %4803 }
 0x4d8   : > { %v1022_v43 = vsel %vm997_vm4, %v5430_v42, 0.0  ;;  %v1480_v56 = vmul.f32 1.442695, %v1477_v53 }
 0x4d9   : > { %1023 = vadd.xlane.f32.xlu0 %v1022_v43  ;;  %v1473_v52 = vpop.xlane.xlu0 %1472  ;;  %v1506_v0 = vpop.permute.xlu1 %1505 }
 0x4da   : > { %v1478_v55 = vsub.f32 %v1460_v6, %v1473_v52  ;;  %4811 = vpow2.f32 %v1480_v56 }
 0x4db   : > { %v5434_v44 = vpop.eup %4805 }
 0x4dc   : > { %v1251_v45 = vsel %vm997_vm4, %v5434_v44, 0.0  ;;  %v1482_v57 = vmul.f32 1.442695, %v1478_v55 }
 0x4dd   : > { %1252 = vadd.xlane.f32.xlu1 %v1251_v45  ;;  %v1267_v7 = vpop.permute.xlu0 %1266 }
 0x4de   : > { %4813 = vpow2.f32 %v1482_v57 }
 0x4df   : > { %v5438_v47 = vpop.eup %4807 }
 0x4e0   : > { %v1254_v48 = vsel %vm997_vm4, %v5438_v47, 0.0 }
 0x4e1   : > { %1255 = vadd.xlane.f32.xlu0 %v1254_v48 }
 0x4e3   : > { %v5448_v58 = vpop.eup %4809 }
 0x4e4   : > { %v1257_v60 = vsel %vm997_vm4, %v5448_v58, 0.0 }
 0x4e7   : > { %v5450_v59 = vpop.eup %4811 }
 0x4e8   : > { %v1486_v63 = vsel %vm997_vm4, %v5450_v59, 0.0 }
 0x4eb   : > { %v5454_v62 = vpop.eup %4813 }
 0x4ec   : > { %v1489_v61 = vsel %vm997_vm4, %v5454_v62, 0.0 }
 0x4ee   : > { %1501 = vrot.lane.b32.xlu1 %v5279_v13, %s6352_s27 }
 0x4f7   : > { %1503 = vrot.lane.b32.xlu0 %v5275_v10, %s6352_s27  ;;  %s6370_s27 = smov 8  }
 0x50a   : > { %v1476_v2 = vpop.xlane.xlu1 %1475 }
 0x50b   : > { %v1479_v3 = vsub.f32 %v5414_v12, %v1476_v2 }
 0x50d   : > { %v1484_v4 = vmul.f32 1.442695, %v1479_v3 }
 0x50f   : > { %4815 = vpow2.f32 %v1484_v4 }
 0x512   : > { %1258 = vadd.xlane.f32.xlu1 %v1257_v60 }
 0x516   : > { %1490 = vadd.xlane.f32.xlu0 %v1489_v61  ;;  %1487 = vadd.xlane.f32.xlu1 %v1486_v63 }
 0x51c   : > { %v5469_v5 = vpop.eup %4815 }
 0x51d   : > { %v1492_v6 = vsel %vm997_vm4, %v5469_v5, 0.0 }
 0x527   : > { %1607 = vrot.lane.b32.xlu1 %v5275_v10, %s6360_s30 }
 0x52c   : > { %1609 = vrot.lane.b32.xlu0 %v5281_v15, %s6360_s30 }
 0x530   : > { %1605 = vrot.lane.b32.xlu0 %v5279_v13, %s6360_s30  ;;  %s6368_s30 = smov 24  }
 0x534   : > { %1601 = vrot.lane.b32.xlu0 %v5275_v10, %s6358_s1 }
 0x54b   : > { %1493 = vadd.xlane.f32.xlu1 %v1492_v6 }
 0x55a   : > { %v1018_v8 = vpop.xlane.xlu0 %1017 }
 0x55b   : > { %4817 = vrcp.f32 %v1018_v8 }
 0x55c   : > { %1599 = vrot.lane.b32.xlu1 %v5279_v13, %s6358_s1 }
 0x55e   : > { %v1021_v9 = vpop.xlane.xlu1 %1020 }
 0x55f   : > { %4819 = vrcp.f32 %v1021_v9 }
 0x560   : > { %1603 = vrot.lane.b32.xlu1 %v5281_v15, %s6358_s1  ;;  %s6398_s1 = smov 88  }
 0x562   : > { %v1024_v11 = vpop.xlane.xlu0 %1023 }
 0x563   : > { %4821 = vrcp.f32 %v1024_v11 }
 0x566   : > { %v1253_v12 = vpop.xlane.xlu1 %1252 }
 0x567   : > { %4823 = vrcp.f32 %v1253_v12 }
 0x568   : > { %v4818_v16 = vpop.eup %4817 }
 0x569   : > { %v1026_v20 = vmul.f32 %v4818_v16, %v5422_v35 }
 0x56a   : > { %v1256_v21 = vpop.xlane.xlu0 %1255  ;;  %v1502_v30 = vpop.permute.xlu1 %1501 }
 0x56b   : > { %4825 = vrcp.f32 %v1256_v21  ;;  %4367 = vmatmul.mubr.msk.f32.vlgmr.msra.gmra.mxu0 %vm997_vm4, %v1026_v20 }
 0x56c   : > { %v4820_v22 = vpop.eup %4819  ;;  %4391 = vmatpush3.msra.mxu0 %v5420_v18  ;;  %4369 = vmatprep.mubr.msk.f32.mxu0 %vm4993_vm0, %v4992_v1 }
 0x56d   : > { %4392 = vmatprep.subr.mxu0 %v4992_v1  ;;  %v1028_v23 = vmul.f32 %v4820_v22, %v5426_v39 }
 0x56e   : > { %4393 = vmatpush3.msra.mxu0 %v5418_v17  ;;  %v1504_v28 = vpop.permute.xlu0 %1503 }
 0x56f   : > { %4394 = vmatprep.subr.mxu0 %v4992_v1  ;;  %4370 = vmatmul.mubr.msk.f32.gmra.mxu0 %vm997_vm4, %v1028_v23 }
 0x570   : > { %v4822_v25 = vpop.eup %4821  ;;  %4395 = vmatpush3.msra.mxu0 %v1267_v7  ;;  %4372 = vmatprep.mubr.msk.f32.mxu0 %vm4993_vm0, %v4992_v1 }
 0x571   : > { %v1030_v18 = vmul.f32 %v4822_v25, %v5430_v42  ;;  %4420 = vmatprep.subr.mxu0 %v4992_v1 }
 0x573   : > { %4373 = vmatmul.mubr.msk.f32.gmra.mxu0 %vm997_vm4, %v1030_v18 }
 0x574   : > { %v4824_v26 = vpop.eup %4823  ;;  %4396 = vmatprep.mubr.msk.f32.mxu0 %vm4993_vm0, %v4992_v1 }
 0x575   : > { %v1261_v17 = vmul.f32 %v4824_v26, %v5434_v44 }
 0x577   : > { %4397 = vmatmul.mubr.msk.f32.vlgmr.msra.gmra.mxu0 %vm997_vm4, %v1261_v17 }
 0x578   : > { %v4826_v27 = vpop.eup %4825  ;;  %4421 = vmatpush3.msra.mxu0 %v1506_v0  ;;  %4399 = vmatprep.mubr.msk.f32.mxu0 %vm4993_vm0, %v4992_v1 }
 0x579   : > { %4422 = vmatprep.subr.mxu0 %v4992_v1  ;;  %v1263_v29 = vmul.f32 %v4826_v27, %v5438_v47 }
 0x57a   : > { %4423 = vmatpush3.msra.mxu0 %v1504_v28 }
 0x57b   : > { %4424 = vmatprep.subr.mxu0 %v4992_v1  ;;  %4400 = vmatmul.mubr.msk.f32.gmra.mxu0 %vm997_vm4, %v1263_v29 }
 0x57c   : > { %4425 = vmatpush3.msra.mxu0 %v1502_v30  ;;  %4402 = vmatprep.mubr.msk.f32.mxu0 %vm4993_vm0, %v4992_v1 }
 0x57d   : > { %4435 = vmatprep.subr.mxu0 %v4992_v1 }
 0x59b   : > { %v1259_v31 = vpop.xlane.xlu1 %1258 }
 0x59c   : > { %4827 = vrcp.f32 %v1259_v31 }
 0x59f   : > { %v1491_v32 = vpop.xlane.xlu0 %1490  ;;  %v1488_v33 = vpop.xlane.xlu1 %1487 }
 0x5a0   : > { %4829 = vrcp.f32 %v1488_v33 }
 0x5a1   : > { %4831 = vrcp.f32 %v1491_v32 }
 0x5a3   : > { %v1610_v34 = vpop.permute.xlu0 %1609  ;;  %v1608_v35 = vpop.permute.xlu1 %1607 }
 0x5a4   : > { %4734 = vmatpush3.xpose.msk.msra.mxu1 %vm904_vm3, %v1610_v34 }
 0x5a5   : > { %4732 = vmatprep.subr.mxu1 %v4992_v1 }
 0x5a7   : > { %v1606_v36 = vpop.permute.xlu0 %1605 }
 0x5a8   : > { %4735 = vmatpush3.xpose.msk.msra.mxu1 %vm904_vm3, %v1608_v35 }
 0x5a9   : > { %v4828_v38 = vpop.eup %4827  ;;  %4733 = vmatprep.subr.mxu1 %v4992_v1 }
 0x5aa   : > { %v1265_v39 = vmul.f32 %v4828_v38, %v5448_v58 }
 0x5ab   : > { %v1602_v42 = vpop.permute.xlu0 %1601 }
 0x5ac   : > { %4403 = vmatmul.mubr.msk.f32.gmra.mxu0 %vm997_vm4, %v1265_v39  ;;  %4736 = vmatpush3.xpose.msk.msra.mxu1 %vm904_vm3, %v1606_v36 }
 0x5ad   : > { %4426 = vmatprep.mubr.msk.f32.mxu0 %vm4993_vm0, %v4992_v1  ;;  %4465 = vmatprep.subr.mxu1 %v4992_v1  ;;  %v4830_v40 = vpop.eup %4829 }
 0x5ae   : > { %v1496_v43 = vmul.f32 %v4830_v40, %v5450_v59  ;;  %v4832_v44 = vpop.eup %4831 }
 0x5af   : > { %4445 = vmatmul.mubr.msk.f32.vlgmr.msra.gmra.mxu1 %vm904_vm3, %v1602_v42  ;;  %v1498_v45 = vmul.f32 %v4832_v44, %v5454_v62 }
 0x5b0   : > { %4447 = vmatprep.mubr.msk.f32.mxu1 %vm4993_vm0, %v4992_v1  ;;  %4427 = vmatmul.mubr.msk.f32.vlgmr.msra.gmra.mxu0 %vm997_vm4, %v1496_v43 }
 0x5b1   : > { %4436 = vmatpush3.xpose.msk.msra.mxu0 %vm904_vm3, %v1610_v34  ;;  %4429 = vmatprep.mubr.msk.f32.mxu0 %vm4993_vm0, %v4992_v1 }
 0x5b2   : > { %4437 = vmatprep.subr.mxu0 %v4992_v1 }
 0x5b4   : > { %4430 = vmatmul.mubr.msk.f32.gmra.mxu0 %vm997_vm4, %v1498_v45 }
 0x5b5   : > { %4438 = vmatpush3.xpose.msk.msra.mxu0 %vm904_vm3, %v1608_v35  ;;  %4432 = vmatprep.mubr.msk.f32.mxu0 %vm4993_vm0, %v4992_v1 }
 0x5b6   : > { %4439 = vmatprep.subr.mxu0 %v4992_v1 }
 0x5b9   : > { %4440 = vmatpush3.xpose.msk.msra.mxu0 %vm904_vm3, %v1606_v36 }
 0x5ba   : > { %4450 = vmatprep.subr.mxu0 %v4992_v1 }
 0x5d4   : > { %v1494_v47 = vpop.xlane.xlu1 %1493 }
 0x5d5   : > { %4833 = vrcp.f32 %v1494_v47 }
 0x5d8   : > { %v1600_v48 = vpop.permute.xlu1 %1599 }
 0x5dc   : > { %v1604_v49 = vpop.permute.xlu1 %1603 }
 0x5dd   : > { %4448 = vmatmul.mubr.msk.f32.gmra.mxu1 %vm904_vm3, %v1604_v49  ;;  %v1883_v49 = vld [vmem:[%s6321_s8 + $0x18] sm:$0xff] }
 0x5de   : > { %4473 = vmatprep.mubr.msk.f32.mxu1 %vm4993_vm0, %v4992_v1  ;;  %4466 = vmatpush3.msra.mxu1 %v1883_v49 }
 0x5df   : > { %4467 = vmatprep.subr.mxu1 %v4992_v1 }
 0x5e2   : > { %v4834_v50 = vpop.eup %4833 }
 0x5e3   : > { %v1500_v51 = vmul.f32 %v4834_v50, %v5469_v5  ;;  %v1882_v50 = vld [vmem:[%s6321_s8 + $0x10] sm:$0xff] }
 0x5e4   : > { %4468 = vmatpush3.msra.mxu1 %v1882_v50 }
 0x5e5   : > { %4433 = vmatmul.mubr.msk.f32.gmra.mxu0 %vm997_vm4, %v1500_v51  ;;  %v1881_v51 = vld [vmem:[%s6321_s8 + $0x8] sm:$0xff]  ;;  %4469 = vmatprep.subr.mxu1 %v4992_v1 }
 0x5e6   : > { %4441 = vmatprep.mubr.msk.f32.mxu0 %vm4993_vm0, %v4992_v1  ;;  %4470 = vmatpush3.msra.mxu1 %v1881_v51 }
 0x5e7   : > { %4471 = vmatprep.subr.mxu1 %v4992_v1 }
 0x5e9   : > { %4442 = vmatmul.mubr.msk.f32.vlgmr.msra.gmra.mxu0 %vm904_vm3, %v1600_v48 }
 0x5ea   : > { %4456 = vmatprep.mubr.msk.f32.mxu0 %vm4993_vm0, %v4992_v1 }
 0x62b   : > { %v5542_v52 = vpop.f32.mrf.mxu0 }
 0x62d   : > { %v4368_v53 = vpop.f32.mrf.mxu0 }
 0x62e   : > { %v1880_v53 = vld [vmem:[%s6321_s8] sm:$0xff] }
 0x62f   : > { %v5544_v54 = vpop.f32.mrf.mxu0  ;;  %4472 = vmatpush3.msra.mxu1 %v1880_v53 }
 0x630   : > { %4499 = vmatprep.subr.mxu1 %v4992_v1 }
 0x631   : > { %v4371_v55 = vpop.f32.mrf.mxu0 }
 0x633   : > { %v5546_v56 = vpop.f32.mrf.mxu0 }
 0x635   : > { %v4374_v57 = vpop.f32.mrf.mxu0 }
 0x637   : > { %v1350_v58 = vpop.f32.mrf.mxu0 }
 0x639   : > { %v4398_v59 = vpop.f32.mrf.mxu0 }
 0x63b   : > { %v1355_v60 = vpop.f32.mrf.mxu0 }
 0x63d   : > { %v4401_v62 = vpop.f32.mrf.mxu0 }
 0x66c   : > { %v5548_v61 = vpop.f32.mrf.mxu0 }
 0x66e   : > { %v4404_v63 = vpop.f32.mrf.mxu0 }
 0x66f   : > { %v1694_v0 = vpop.f32.mrf.mxu1 }
 0x670   : > { %v1695_v2 = vadd.f32 %v1694_v0, %v5381_v41  ;;  %v1585_v3 = vpop.f32.mrf.mxu0 }
 0x671   : > { %v4446_v4 = vpop.f32.mrf.mxu1 }
 0x672   : > { %v1706_v5 = vsel %vm997_vm4, %v1695_v2, -inf  ;;  %v4428_v6 = vpop.f32.mrf.mxu0 }
 0x673   : > { %1707 = vmax.xlane.f32.xlu1 %v1706_v5 }
 0x674   : > { %v1590_v7 = vpop.f32.mrf.mxu0 }
 0x676   : > { %v4431_v8 = vpop.f32.mrf.mxu0 }
 0x69d   : > { %v1699_v9 = vpop.f32.mrf.mxu1 }
 0x69e   : > { %v1700_v23 = vadd.f32 %v1699_v9, %v5388_v46 }
 0x69f   : > { %v4449_v11 = vpop.f32.mrf.mxu1 }
 0x6a0   : > { %v1709_v25 = vsel %vm997_vm4, %v1700_v23, -inf }
 0x6a5   : > { %v5552_v12 = vpop.f32.mrf.mxu0 }
 0x6a7   : > { %v4434_v16 = vpop.f32.mrf.mxu0 }
 0x6a9   : > { %v1689_v20 = vpop.f32.mrf.mxu0 }
 0x6aa   : > { %v1690_v21 = vadd.f32 %v1689_v20, %v5375_v37 }
 0x6ab   : > { %v4443_v22 = vpop.f32.mrf.mxu0 }
 0x6ac   : > { %v1703_v41 = vsel %vm997_vm4, %v1690_v21, -inf  ;;  %v4023_v22 = vld [vmem:[%s6322_s9] ss:$0 sm:$0xff] }
 0x6ad   : > { %1704 = vmax.xlane.f32.xlu0 %v1703_v41 }
 0x6b1   : > { %1710 = vmax.xlane.f32.xlu0 %v1709_v25 }
 0x6fc   : > { %v1708_v18 = vpop.xlane.xlu1 %1707 }
 0x6fd   : > { %v1713_v26 = vsub.f32 %v1695_v2, %v1708_v18 }
 0x6ff   : > { %v1717_v17 = vmul.f32 1.442695, %v1713_v26 }
 0x701   : > { %4835 = vpow2.f32 %v1717_v17 }
 0x70e   : > { %v4836_v27 = vpop.eup %4835 }
 0x70f   : > { %v1724_v28 = vsel %vm997_vm4, %v4836_v27, 0.0 }
 0x710   : > { %1725 = vadd.xlane.f32.xlu0 %v1724_v28 }
 0x736   : > { %v1705_v29 = vpop.xlane.xlu0 %1704 }
 0x737   : > { %v1712_v30 = vsub.f32 %v1690_v21, %v1705_v29 }
 0x739   : > { %v1715_v37 = vmul.f32 1.442695, %v1712_v30 }
 0x73a   : > { %v1711_v31 = vpop.xlane.xlu0 %1710 }
 0x73b   : > { %4837 = vpow2.f32 %v1715_v37  ;;  %v1714_v46 = vsub.f32 %v1700_v23, %v1711_v31 }
 0x73d   : > { %v1719_v32 = vmul.f32 1.442695, %v1714_v46 }
 0x73f   : > { %4839 = vpow2.f32 %v1719_v32 }
 0x748   : > { %v4838_v33 = vpop.eup %4837 }
 0x749   : > { %v1721_v34 = vsel %vm997_vm4, %v4838_v33, 0.0 }
 0x74a   : > { %1722 = vadd.xlane.f32.xlu0 %v1721_v34 }
 0x74c   : > { %v4840_v35 = vpop.eup %4839 }
 0x74d   : > { %v1727_v36 = vsel %vm997_vm4, %v4840_v35, 0.0 }
 0x74e   : > { %1728 = vadd.xlane.f32.xlu1 %v1727_v36 }
 0x75f   : > { %1738 = vrot.lane.b32.xlu1 %v5275_v10, %s6354_s0 }
 0x760   : > { %1740 = vrot.lane.b32.xlu0 %v5281_v15, %s6354_s0 }
 0x763   : > { %1736 = vrot.lane.b32.xlu1 %v5279_v13, %s6354_s0  ;;  %s6402_s0 = smov 72  }
 0x764   : > { %1849 = vrot.lane.b32.xlu0 %v1585_v3, %s6366_s23 }
 0x767   : > { %1837 = vrot.lane.b32.xlu1 %v1350_v58, %s6370_s27 }
 0x768   : > { %1839 = vrot.lane.b32.xlu0 %v1355_v60, %s6370_s27 }
 0x76b   : > { %1851 = vrot.lane.b32.xlu1 %v1590_v7, %s6366_s23  ;;  %s6403_s23 = smov 104  }
 0x799   : > { %v1726_v38 = vpop.xlane.xlu0 %1725 }
 0x7d3   : > { %v1723_v39 = vpop.xlane.xlu0 %1722 }
 0x7d4   : > { %4841 = vrcp.f32 %v1723_v39 }
 0x7d5   : > { %4843 = vrcp.f32 %v1726_v38 }
 0x7d7   : > { %v1729_v10 = vpop.xlane.xlu1 %1728  ;;  %v1741_v40 = vpop.permute.xlu0 %1740 }
 0x7d8   : > { %4451 = vmatpush3.msra.mxu0 %v1741_v40  ;;  %4845 = vrcp.f32 %v1729_v10 }
 0x7d9   : > { %4452 = vmatprep.subr.mxu0 %v4992_v1 }
 0x7db   : > { %v1739_v13 = vpop.permute.xlu1 %1738  ;;  %v1850_v0 = vpop.permute.xlu0 %1849 }
 0x7dc   : > { %4453 = vmatpush3.msra.mxu0 %v1739_v13 }
 0x7dd   : > { %4454 = vmatprep.subr.mxu0 %v4992_v1 }
 0x7df   : > { %v1737_v15 = vpop.permute.xlu1 %1736  ;;  %v1840_v4 = vpop.permute.xlu0 %1839 }
 0x7e0   : > { %4455 = vmatpush3.msra.mxu0 %v1737_v15  ;;  %v1871_v7 = vsel %vm904_vm3, %v5544_v54, %v1840_v4 }
 0x7e1   : > { %v4842_v42 = vpop.eup %4841  ;;  %4482 = vmatprep.subr.mxu0 %v4992_v1 }
 0x7e2   : > { %v1731_v43 = vmul.f32 %v4842_v42, %v4838_v33  ;;  %v4844_v44 = vpop.eup %4843 }
 0x7e3   : > { %v1733_v45 = vmul.f32 %v4844_v44, %v4836_v27  ;;  %v1838_v63 = vpop.permute.xlu1 %1837  ;;  %v2045_v44 = vld [vmem:[%s6325_s12 + $0x18] sm:$0xff] }
 0x7e4   : > { %4457 = vmatmul.mubr.msk.f32.vlgmr.msra.gmra.mxu0 %vm997_vm4, %v1731_v43  ;;  %v1870_v3 = vsel %vm904_vm3, %v5542_v52, %v1838_v63  ;;  %v4027_v63 = vld [vmem:[%s6323_s10] ss:$0 sm:$0xff] }
 0x7e5   : > { %4459 = vmatprep.mubr.msk.f32.mxu0 %vm4993_vm0, %v4992_v1  ;;  %v4846_v47 = vpop.eup %4845  ;;  %4483 = vmatpush3.msra.mxu0 %v2045_v44  ;;  %v4033_v44 = vld [vmem:[%s6328_s15] ss:$0 sm:$0xff] }
 0x7e6   : > { %v1735_v48 = vmul.f32 %v4846_v47, %v4840_v35  ;;  %4484 = vmatprep.subr.mxu0 %v4992_v1  ;;  %v2043_v47 = vld [vmem:[%s6325_s12 + $0x8] sm:$0xff] }
 0x7e7   : > { %v1852_v2 = vpop.permute.xlu1 %1851 }
 0x7e8   : > { %4460 = vmatmul.mubr.msk.f32.gmra.mxu0 %vm997_vm4, %v1733_v45  ;;  %v1875_v8 = vsel %vm1873_vm5, %v1871_v7, %v1852_v2  ;;  %v2044_v45 = vld [vmem:[%s6325_s12 + $0x10] sm:$0xff]  ;;  %v4028_v2 = vld [vmem:[%s6324_s11] ss:$0 sm:$0xff] }
 0x7e9   : > { %4462 = vmatprep.mubr.msk.f32.mxu0 %vm4993_vm0, %v4992_v1  ;;  %4485 = vmatpush3.msra.mxu0 %v2044_v45 }
 0x7ea   : > { %4486 = vmatprep.subr.mxu0 %v4992_v1 }
 0x7eb   : > { %4487 = vmatpush3.msra.mxu0 %v2043_v47 }
 0x7ec   : > { %4463 = vmatmul.mubr.msk.f32.gmra.mxu0 %vm997_vm4, %v1735_v48  ;;  %v2042_v48 = vld [vmem:[%s6325_s12] sm:$0xff]  ;;  %4488 = vmatprep.subr.mxu0 %v4992_v1 }
 0x7ed   : > { %4490 = vmatprep.mubr.msk.f32.mxu0 %vm4993_vm0, %v4992_v1  ;;  %4489 = vmatpush3.msra.mxu0 %v2042_v48 }
 0x7ee   : > { %4524 = vmatprep.subr.mxu0 %v4992_v1 }
 0x8a4   : > { %v1820_v55 = vpop.f32.mrf.mxu0 }
 0x8a5   : > { %1861 = vrot.lane.b32.xlu1 %v1820_v55, %s6368_s30 }
 0x8a6   : > { %v4458_v57 = vpop.f32.mrf.mxu0 }
 0x8a8   : > { %v1825_v58 = vpop.f32.mrf.mxu0 }
 0x8a9   : > { %1841 = vrot.lane.b32.xlu1 %v5548_v61, %s6370_s27  ;;  %1863 = vrot.lane.b32.xlu0 %v1825_v58, %s6368_s30  ;;  %v1874_v61 = vsel %vm1873_vm5, %v1870_v3, %v1850_v0  ;;  %s6400_s27 = smov 80  }
 0x8aa   : > { %v4461_v59 = vpop.f32.mrf.mxu0 }
 0x8ac   : > { %v1830_v60 = vpop.f32.mrf.mxu0 }
 0x8ad   : > { %1853 = vrot.lane.b32.xlu0 %v5552_v12, %s6396_s24  ;;  %1865 = vrot.lane.b32.xlu1 %v1830_v60, %s6368_s30  ;;  %s6401_s30 = smov 112  }
 0x8ae   : > { %v4464_v62 = vpop.f32.mrf.mxu0 }
 0x917   : > { %v1862_v5 = vpop.permute.xlu1 %1861 }
 0x918   : > { %v1877_v6 = vsel %vm997_vm4, %v1874_v61, %v1862_v5 }
 0x919   : > { %4474 = vmatmul.mubr.msk.f32.vlgmr.msra.gmra.mxu1 %vm736_vm2, %v1877_v6 }
 0x91a   : > { %4476 = vmatprep.mubr.msk.f32.mxu1 %vm4993_vm0, %v4992_v1 }
 0x91b   : > { %v1842_v9 = vpop.permute.xlu1 %1841  ;;  %v1864_v11 = vpop.permute.xlu0 %1863 }
 0x91c   : > { %v1878_v52 = vsel %vm997_vm4, %v1875_v8, %v1864_v11  ;;  %v1872_v12 = vsel %vm904_vm3, %v5546_v56, %v1842_v9 }
 0x91d   : > { %4477 = vmatmul.mubr.msk.f32.gmra.mxu1 %vm736_vm2, %v1878_v52 }
 0x91e   : > { %4479 = vmatprep.mubr.msk.f32.mxu1 %vm4993_vm0, %v4992_v1 }
 0x91f   : > { %v1854_v16 = vpop.permute.xlu0 %1853  ;;  %v1866_v20 = vpop.permute.xlu1 %1865 }
 0x920   : > { %v1876_v54 = vsel %vm1873_vm5, %v1872_v12, %v1854_v16  ;;  %v2164_v12 = vld [vmem:[%s6327_s14 + $0x38] sm:$0xff]  ;;  %v2163_v16 = vld [vmem:[%s6327_s14 + $0x30] sm:$0xff] }
 0x921   : > { %v1879_v21 = vsel %vm997_vm4, %v1876_v54, %v1866_v20  ;;  %4500 = vmatpush3.msra.mxu1 %v2164_v12  ;;  %v2162_v20 = vld [vmem:[%s6327_s14 + $0x28] sm:$0xff]  ;;  %v2161_v54 = vld [vmem:[%s6327_s14 + $0x20] sm:$0xff] }
 0x922   : > { %4480 = vmatmul.mubr.msk.f32.gmra.mxu1 %vm736_vm2, %v1879_v21  ;;  %4501 = vmatprep.subr.mxu1 %v4992_v1  ;;  %v2160_v21 = vld [vmem:[%s6327_s14 + $0x18] sm:$0xff] }
 0x923   : > { %4515 = vmatprep.mubr.msk.f32.mxu1 %vm4993_vm0, %v4992_v1  ;;  %4502 = vmatpush3.msra.mxu1 %v2163_v16  ;;  %v4044_v16 = vld [vmem:[%s6391_s6 + $0x38] sm:$0xff] }
 0x924   : > { %4503 = vmatprep.subr.mxu1 %v4992_v1 }
 0x925   : > { %4504 = vmatpush3.msra.mxu1 %v2162_v20  ;;  %v4043_v20 = vld [vmem:[%s6391_s6 + $0x30] sm:$0xff] }
 0x926   : > { %4505 = vmatprep.subr.mxu1 %v4992_v1 }
 0x927   : > { %4506 = vmatpush3.msra.mxu1 %v2161_v54  ;;  %v4042_v54 = vld [vmem:[%s6391_s6 + $0x28] sm:$0xff] }
 0x928   : > { %4507 = vmatprep.subr.mxu1 %v4992_v1 }
 0x929   : > { %4508 = vmatpush3.msra.mxu1 %v2160_v21  ;;  %v4041_v21 = vld [vmem:[%s6391_s6 + $0x20] sm:$0xff] }
 0x92a   : > { %4509 = vmatprep.subr.mxu1 %v4992_v1 }
 0x9d9   : > { %v1966_v23 = vpop.f32.mrf.mxu1 }
 0x9da   : > { %v1967_v41 = vadd.f32 %v4023_v22, %v1966_v23  ;;  %v2158_v23 = vld [vmem:[%s6327_s14 + $0x8] sm:$0xff] }
 0x9db   : > { %v4475_v25 = vpop.f32.mrf.mxu1 }
 0x9dc   : > { %v5631_v56 = vadd.f32 %v1967_v41, %v5217_v14  ;;  %v2157_v41 = vld [vmem:[%s6327_s14] sm:$0xff] }
 0x9dd   : > { %v1971_v18 = vpop.f32.mrf.mxu1  ;;  %v4029_v25 = vld [vmem:[%s6326_s13] ss:$0 sm:$0xff] }
 0x9de   : > { %v1972_v26 = vadd.f32 %v4023_v22, %v1971_v18  ;;  %v1985_v17 = vsel %vm736_vm2, %v5631_v56, 0.0 }
 0x9df   : > { %1986 = vadd.xlane.f32.xlu0 %v1985_v17  ;;  %v4478_v27 = vpop.f32.mrf.mxu1 }
 0x9e0   : > { %v5636_v28 = vadd.f32 %v1972_v26, %v5224_v19 }
 0x9e2   : > { %v1976_v29 = vpop.f32.mrf.mxu1  ;;  %v1988_v30 = vsel %vm736_vm2, %v5636_v28, 0.0 }
 0x9e3   : > { %v1977_v37 = vadd.f32 %v4023_v22, %v1976_v29  ;;  %1989 = vadd.xlane.f32.xlu1 %v1988_v30  ;;  %v2159_v22 = vld [vmem:[%s6327_s14 + $0x10] sm:$0xff] }
 0x9e4   : > { %v4481_v31 = vpop.f32.mrf.mxu1  ;;  %4510 = vmatpush3.msra.mxu1 %v2159_v22 }
 0x9e5   : > { %v5641_v14 = vadd.f32 %v1977_v37, %v5231_v24  ;;  %4511 = vmatprep.subr.mxu1 %v4992_v1 }
 0x9e6   : > { %4512 = vmatpush3.msra.mxu1 %v2158_v23 }
 0x9e7   : > { %v1991_v46 = vsel %vm736_vm2, %v5641_v14, 0.0  ;;  %4513 = vmatprep.subr.mxu1 %v4992_v1 }
 0x9e8   : > { %1992 = vadd.xlane.f32.xlu0 %v1991_v46  ;;  %4514 = vmatpush3.msra.mxu1 %v2157_v41 }
 0x9e9   : > { %4541 = vmatprep.subr.mxu1 %v4992_v1 }
 0xa68   : > { %v1987_v32 = vpop.xlane.xlu0 %1986 }
 0xa69   : > { %v1994_v33 = vmul.f32 0.03125, %v1987_v32 }
 0xa6b   : > { %v1997_v34 = vsub.f32 %v5631_v56, %v1994_v33 }
 0xa6c   : > { %v1990_v19 = vpop.xlane.xlu1 %1989 }
 0xa6d   : > { %v1995_v35 = vmul.f32 0.03125, %v1990_v19  ;;  %v2000_v36 = vmul.f32 %v1997_v34, %v1997_v34 }
 0xa6f   : > { %v1998_v38 = vsub.f32 %v5636_v28, %v1995_v35  ;;  %v2003_v39 = vsel %vm736_vm2, %v2000_v36, 0.0 }
 0xa70   : > { %2004 = vadd.xlane.f32.xlu0 %v2003_v39 }
 0xa71   : > { %v1993_v10 = vpop.xlane.xlu0 %1992  ;;  %v2001_v40 = vmul.f32 %v1998_v38, %v1998_v38 }
 0xa72   : > { %v1996_v24 = vmul.f32 0.03125, %v1993_v10 }
 0xa73   : > { %v2006_v13 = vsel %vm736_vm2, %v2001_v40, 0.0 }
 0xa74   : > { %v1999_v15 = vsub.f32 %v5641_v14, %v1996_v24  ;;  %2007 = vadd.xlane.f32.xlu0 %v2006_v13 }
 0xa76   : > { %v2002_v42 = vmul.f32 %v1999_v15, %v1999_v15 }
 0xa78   : > { %v2009_v43 = vsel %vm736_vm2, %v2002_v42, 0.0 }
 0xa79   : > { %2010 = vadd.xlane.f32.xlu1 %v2009_v43 }
 0xaf9   : > { %v2005_v49 = vpop.xlane.xlu0 %2004 }
 0xafa   : > { %v2012_v50 = vmul.f32 0.03125, %v2005_v49 }
 0xafc   : > { %v2015_v51 = vadd.f32 1e-06, %v2012_v50 }
 0xafd   : > { %v2008_v53 = vpop.xlane.xlu0 %2007 }
 0xafe   : > { %4847 = vrsqrt.f32 %v2015_v51  ;;  %v2013_v55 = vmul.f32 0.03125, %v2008_v53 }
 0xb00   : > { %v2016_v57 = vadd.f32 1e-06, %v2013_v55 }
 0xb02   : > { %4849 = vrsqrt.f32 %v2016_v57  ;;  %v2011_v58 = vpop.xlane.xlu1 %2010 }
 0xb03   : > { %v2014_v59 = vmul.f32 0.03125, %v2011_v58 }
 0xb05   : > { %v2017_v60 = vadd.f32 1e-06, %v2014_v59 }
 0xb07   : > { %4851 = vrsqrt.f32 %v2017_v60 }
 0xb0b   : > { %v4848_v62 = vpop.eup %4847 }
 0xb0c   : > { %v2021_v0 = vmul.f32 %v4848_v62, %v1997_v34 }
 0xb0e   : > { %v2030_v3 = vmul.f32 %v4027_v63, %v2021_v0 }
 0xb0f   : > { %v4850_v4 = vpop.eup %4849 }
 0xb10   : > { %v2039_v61 = vadd.f32 %v4028_v2, %v2030_v3  ;;  %v2022_v5 = vmul.f32 %v4850_v4, %v1998_v38 }
 0xb12   : > { %4491 = vmatmul.mubr.msk.f32.vlgmr.msra.gmra.mxu0 %vm736_vm2, %v2039_v61  ;;  %v2031_v6 = vmul.f32 %v4027_v63, %v2022_v5 }
 0xb13   : > { %4493 = vmatprep.mubr.msk.f32.mxu0 %vm4993_vm0, %v4992_v1  ;;  %4525 = vmatpush3.msra.mxu0 %v4044_v16 }
 0xb14   : > { %v4852_v7 = vpop.eup %4851  ;;  %v2040_v8 = vadd.f32 %v4028_v2, %v2031_v6  ;;  %4526 = vmatprep.subr.mxu0 %v4992_v1 }
 0xb15   : > { %v2023_v9 = vmul.f32 %v4852_v7, %v1999_v15  ;;  %4527 = vmatpush3.msra.mxu0 %v4043_v20 }
 0xb16   : > { %4494 = vmatmul.mubr.msk.f32.gmra.mxu0 %vm736_vm2, %v2040_v8  ;;  %4528 = vmatprep.subr.mxu0 %v4992_v1 }
 0xb17   : > { %4496 = vmatprep.mubr.msk.f32.mxu0 %vm4993_vm0, %v4992_v1  ;;  %v2032_v11 = vmul.f32 %v4027_v63, %v2023_v9  ;;  %4529 = vmatpush3.msra.mxu0 %v4042_v54  ;;  %v4927_v54 = vld [vmem:[%s6395_s25] sm:$0xff] }
 0xb18   : > { %4530 = vmatprep.subr.mxu0 %v4992_v1 }
 0xb19   : > { %v2041_v52 = vadd.f32 %v4028_v2, %v2032_v11  ;;  %4531 = vmatpush3.msra.mxu0 %v4041_v21 }
 0xb1a   : > { %4556 = vmatprep.subr.mxu0 %v4992_v1 }
 0xb1b   : > { %4497 = vmatmul.mubr.msk.f32.gmra.mxu0 %vm736_vm2, %v2041_v52 }
 0xb1c   : > { %4532 = vmatprep.mubr.msk.f32.mxu0 %vm4993_vm0, %v4992_v1 }
 0xbd2   : > { %v2128_v18 = vpop.f32.mrf.mxu0 }
 0xbd3   : > { %v2129_v26 = vadd.f32 %v4029_v25, %v2128_v18 }
 0xbd4   : > { %v4492_v17 = vpop.f32.mrf.mxu0 }
 0xbd5   : > { %v2145_v27 = vmul.f32 0.70710677, %v2129_v26  ;;  %v2142_v35 = vmul.f32 0.5, %v2129_v26 }
 0xbd6   : > { %v2133_v29 = vpop.f32.mrf.mxu0 }
 0xbd7   : > { %4853 = verf.f32 %v2145_v27  ;;  %v2134_v30 = vadd.f32 %v4029_v25, %v2133_v29 }
 0xbd8   : > { %v4495_v37 = vpop.f32.mrf.mxu0 }
 0xbd9   : > { %v2146_v31 = vmul.f32 0.70710677, %v2134_v30  ;;  %v2143_v10 = vmul.f32 0.5, %v2134_v30  ;;  %v4039_v37 = vld [vmem:[%s6392_s26 + $0x1] ss:$0 sm:$0xff] }
 0xbdb   : > { %4855 = verf.f32 %v2146_v31  ;;  %v2138_v46 = vpop.f32.mrf.mxu0 }
 0xbdc   : > { %v2139_v32 = vadd.f32 %v4029_v25, %v2138_v46  ;;  %v4040_v46 = vld [vmem:[%s6393_s5 + $0x1] ss:$0 sm:$0xff] }
 0xbdd   : > { %v4498_v33 = vpop.f32.mrf.mxu0 }
 0xbde   : > { %v2147_v34 = vmul.f32 0.70710677, %v2139_v32  ;;  %v2144_v15 = vmul.f32 0.5, %v2139_v32 }
 0xbe0   : > { %4857 = verf.f32 %v2147_v34 }
 0xbe4   : > { %v4854_v19 = vpop.eup %4853 }
 0xbe5   : > { %v2151_v36 = vadd.f32 1.0, %v4854_v19 }
 0xbe7   : > { %v2154_v38 = vmul.f32 %v2151_v36, %v2142_v35 }
 0xbe8   : > { %v4856_v39 = vpop.eup %4855 }
 0xbe9   : > { %v2152_v40 = vadd.f32 1.0, %v4856_v39  ;;  %4516 = vmatmul.mubr.msk.f32.vlgmr.msra.gmra.mxu1 %vm644_vm1, %v2154_v38 }
 0xbea   : > { %4518 = vmatprep.mubr.msk.f32.mxu1 %vm4993_vm0, %v4992_v1 }
 0xbeb   : > { %v2155_v24 = vmul.f32 %v2152_v40, %v2143_v10 }
 0xbed   : > { %v4858_v13 = vpop.eup %4857  ;;  %4519 = vmatmul.mubr.msk.f32.gmra.mxu1 %vm644_vm1, %v2155_v24 }
 0xbee   : > { %v2153_v42 = vadd.f32 1.0, %v4858_v13  ;;  %4521 = vmatprep.mubr.msk.f32.mxu1 %vm4993_vm0, %v4992_v1 }
 0xbf0   : > { %v2156_v43 = vmul.f32 %v2153_v42, %v2144_v15  ;;  %v4046_v15 = vld [vmem:[%s6320_s7 + $0x1] ss:$0 sm:$0xff] }
 0xbf2   : > { %4522 = vmatmul.mubr.msk.f32.gmra.mxu1 %vm644_vm1, %v2156_v43 }
 0xbf3   : > { %4547 = vmatprep.mubr.msk.f32.mxu1 %vm4993_vm0, %v4992_v1 }
 0xca9   : > { %v2247_v45 = vpop.f32.mrf.mxu1 }
 0xcaa   : > { %v2248_v47 = vadd.f32 %v4033_v44, %v2247_v45 }
 0xcab   : > { %v4517_v48 = vpop.f32.mrf.mxu1 }
 0xcac   : > { %v5730_v49 = vadd.f32 %v2248_v47, %v5631_v56 }
 0xcad   : > { %v2252_v50 = vpop.f32.mrf.mxu1 }
 0xcae   : > { %v2253_v51 = vadd.f32 %v4033_v44, %v2252_v50  ;;  %v2268_v53 = vsel %vm736_vm2, %v5730_v49, 0.0 }
 0xcaf   : > { %2269 = vadd.xlane.f32.xlu0 %v2268_v53  ;;  %v4520_v55 = vpop.f32.mrf.mxu1 }
 0xcb0   : > { %v5735_v57 = vadd.f32 %v2253_v51, %v5636_v28 }
 0xcb2   : > { %v2257_v58 = vpop.f32.mrf.mxu1  ;;  %v2271_v59 = vsel %vm736_vm2, %v5735_v57, 0.0 }
 0xcb3   : > { %v2258_v60 = vadd.f32 %v4033_v44, %v2257_v58  ;;  %2272 = vadd.xlane.f32.xlu1 %v2271_v59 }
 0xcb4   : > { %v4523_v62 = vpop.f32.mrf.mxu1 }
 0xcb5   : > { %v5740_v56 = vadd.f32 %v2258_v60, %v5641_v14 }
 0xcb7   : > { %v2274_v63 = vsel %vm736_vm2, %v5740_v56, 0.0 }
 0xcb8   : > { %2275 = vadd.xlane.f32.xlu0 %v2274_v63 }
 0xd38   : > { %v2270_v0 = vpop.xlane.xlu0 %2269 }
 0xd39   : > { %v2277_v2 = vmul.f32 0.03125, %v2270_v0 }
 0xd3b   : > { %v2280_v3 = vsub.f32 %v5730_v49, %v2277_v2 }
 0xd3c   : > { %v2273_v28 = vpop.xlane.xlu1 %2272 }
 0xd3d   : > { %v2278_v4 = vmul.f32 0.03125, %v2273_v28  ;;  %v2283_v61 = vmul.f32 %v2280_v3, %v2280_v3 }
 0xd3f   : > { %v2281_v5 = vsub.f32 %v5735_v57, %v2278_v4  ;;  %v2286_v6 = vsel %vm736_vm2, %v2283_v61, 0.0 }
 0xd40   : > { %2287 = vadd.xlane.f32.xlu1 %v2286_v6 }
 0xd41   : > { %v2276_v7 = vpop.xlane.xlu0 %2275  ;;  %v2284_v8 = vmul.f32 %v2281_v5, %v2281_v5 }
 0xd42   : > { %v2279_v14 = vmul.f32 0.03125, %v2276_v7 }
 0xd43   : > { %v2289_v9 = vsel %vm736_vm2, %v2284_v8, 0.0 }
 0xd44   : > { %v2282_v11 = vsub.f32 %v5740_v56, %v2279_v14  ;;  %2290 = vadd.xlane.f32.xlu0 %v2289_v9 }
 0xd46   : > { %v2285_v52 = vmul.f32 %v2282_v11, %v2282_v11 }
 0xd48   : > { %v2292_v12 = vsel %vm736_vm2, %v2285_v52, 0.0 }
 0xd49   : > { %2293 = vadd.xlane.f32.xlu1 %v2292_v12 }
 0xdc9   : > { %v2288_v22 = vpop.xlane.xlu1 %2287 }
 0xdca   : > { %v2295_v23 = vmul.f32 0.03125, %v2288_v22 }
 0xdcc   : > { %v2298_v41 = vadd.f32 1e-06, %v2295_v23 }
 0xdcd   : > { %v2291_v25 = vpop.xlane.xlu0 %2290 }
 0xdce   : > { %4859 = vrsqrt.f32 %v2298_v41  ;;  %v2296_v18 = vmul.f32 0.03125, %v2291_v25  ;;  %v5915_v25 = vld [vmem:[%s6395_s25 + $0x8] sm:$0xff] }
 0xdd0   : > { %v2299_v26 = vadd.f32 1e-06, %v2296_v18 }
 0xdd2   : > { %4861 = vrsqrt.f32 %v2299_v26  ;;  %v2294_v17 = vpop.xlane.xlu1 %2293 }
 0xdd3   : > { %v2297_v27 = vmul.f32 0.03125, %v2294_v17 }
 0xdd5   : > { %v2300_v29 = vadd.f32 1e-06, %v2297_v27 }
 0xdd7   : > { %4863 = vrsqrt.f32 %v2300_v29  ;;  %v5922_v29 = vld [vmem:[%s6395_s25 + $0x10] sm:$0xff] }
 0xddb   : > { %v4860_v30 = vpop.eup %4859 }
 0xddc   : > { %v2304_v31 = vmul.f32 %v4860_v30, %v2280_v3 }
 0xdde   : > { %v2313_v32 = vmul.f32 %v4039_v37, %v2304_v31 }
 0xddf   : > { %v4862_v33 = vpop.eup %4861 }
 0xde0   : > { %v2322_v34 = vadd.f32 %v4040_v46, %v2313_v32  ;;  %v2305_v19 = vmul.f32 %v4862_v33, %v2281_v5 }
 0xde2   : > { %4533 = vmatmul.mubr.msk.f32.vlgmr.msra.gmra.mxu0 %vm736_vm2, %v2322_v34  ;;  %v2314_v35 = vmul.f32 %v4039_v37, %v2305_v19 }
 0xde3   : > { %4535 = vmatprep.mubr.msk.f32.mxu0 %vm4993_vm0, %v4992_v1 }
 0xde4   : > { %v4864_v36 = vpop.eup %4863  ;;  %v2323_v38 = vadd.f32 %v4040_v46, %v2314_v35 }
 0xde5   : > { %v2306_v39 = vmul.f32 %v4864_v36, %v2282_v11 }
 0xde6   : > { %4536 = vmatmul.mubr.msk.f32.gmra.mxu0 %vm736_vm2, %v2323_v38 }
 0xde7   : > { %4538 = vmatprep.mubr.msk.f32.mxu0 %vm4993_vm0, %v4992_v1  ;;  %v2315_v10 = vmul.f32 %v4039_v37, %v2306_v39 }
 0xde9   : > { %v2324_v40 = vadd.f32 %v4040_v46, %v2315_v10 }
 0xdeb   : > { %4539 = vmatmul.mubr.msk.f32.gmra.mxu0 %vm736_vm2, %v2324_v40 }
 0xdec   : > { %4562 = vmatprep.mubr.msk.f32.mxu0 %vm4993_vm0, %v4992_v1 }
 0xea2   : > { %v2413_v24 = vpop.f32.mrf.mxu0 }
 0xea3   : > { %v5788_v45 = vadd.f32 %v4046_v15, %v2413_v24 }
 0xea4   : > { %v4534_v13 = vpop.f32.mrf.mxu0 }
 0xea6   : > { %v2418_v42 = vpop.f32.mrf.mxu0 }
 0xea7   : > { %v5784_v43 = vadd.f32 %v4046_v15, %v2418_v42 }
 0xea8   : > { %v4537_v44 = vpop.f32.mrf.mxu0 }
 0xea9   : > { %2432 = vrot.lane.b32.xlu1 %v5784_v43, %s6397_s29 }
 0xeab   : > { %v2423_v47 = vpop.f32.mrf.mxu0 }
 0xeac   : > { %v5790_v48 = vadd.f32 %v4046_v15, %v2423_v47 }
 0xead   : > { %2430 = vrot.lane.b32.xlu1 %v5788_v45, %s6397_s29  ;;  %v4540_v50 = vpop.f32.mrf.mxu0 }
 0xeae   : > { %2434 = vrot.lane.b32.xlu0 %v5790_v48, %s6397_s29  ;;  %s6405_s29 = smov 56  }
 0xeb1   : > { %2669 = vrot.lane.b32.xlu1 %v5790_v48, %s6398_s1 }
 0xeb2   : > { %2667 = vrot.lane.b32.xlu0 %v5784_v43, %s6398_s1 }
 0xeb5   : > { %2665 = vrot.lane.b32.xlu1 %v5788_v45, %s6398_s1  ;;  %s6406_s1 = smov 48  }
 0xeb6   : > { %2659 = vrot.lane.b32.xlu0 %v5788_v45, %s6399_s3 }
 0xeb9   : > { %2904 = vrot.lane.b32.xlu1 %v5790_v48, %s6400_s27 }
 0xeba   : > { %2661 = vrot.lane.b32.xlu0 %v5784_v43, %s6399_s3 }
 0xebd   : > { %2902 = vrot.lane.b32.xlu1 %v5784_v43, %s6400_s27 }
 0xebe   : > { %2663 = vrot.lane.b32.xlu0 %v5790_v48, %s6399_s3  ;;  %s6407_s3 = smov 40  }
 0xec1   : > { %2900 = vrot.lane.b32.xlu1 %v5788_v45, %s6400_s27  ;;  %s6409_s27 = smov 24  }
 0xec2   : > { %2894 = vrot.lane.b32.xlu0 %v5788_v45, %s6401_s30 }
 0xec5   : > { %3139 = vrot.lane.b32.xlu1 %v5790_v48, %s6402_s0 }
 0xec6   : > { %2896 = vrot.lane.b32.xlu0 %v5784_v43, %s6401_s30 }
 0xec9   : > { %3137 = vrot.lane.b32.xlu1 %v5784_v43, %s6402_s0 }
 0xeca   : > { %2898 = vrot.lane.b32.xlu0 %v5790_v48, %s6401_s30 }
 0xecd   : > { %3135 = vrot.lane.b32.xlu1 %v5788_v45, %s6402_s0 }
 0xece   : > { %3129 = vrot.lane.b32.xlu0 %v5788_v45, %s6403_s23 }
 0xed1   : > { %2561 = vrot.lane.b32.xlu1 %v5788_v45, %s6404_s28 }
 0xed2   : > { %2563 = vrot.lane.b32.xlu0 %v5784_v43, %s6404_s28 }
 0xed5   : > { %2796 = vrot.lane.b32.xlu1 %v5788_v45, %s6405_s29 }
 0xed6   : > { %2798 = vrot.lane.b32.xlu0 %v5784_v43, %s6405_s29 }
 0xed9   : > { %3033 = vrot.lane.b32.xlu1 %v5784_v43, %s6406_s1 }
 0xedd   : > { %2565 = vrot.lane.b32.xlu1 %v5790_v48, %s6404_s28  ;;  %s5008_s28 = smov [#allocation2]  }
 0xee1   : > { %2800 = vrot.lane.b32.xlu1 %v5790_v48, %s6405_s29 }
 0xee5   : > { %3035 = vrot.lane.b32.xlu1 %v5790_v48, %s6406_s1 }
 0xf1b   : > { %v2433_v51 = vpop.permute.xlu1 %2432 }
 0xf1f   : > { %v2431_v53 = vpop.permute.xlu1 %2430 }
 0xf20   : > { %v2435_v55 = vpop.permute.xlu0 %2434 }
 0xf21   : > { %4542 = vmatpush3.xpose.msk.msra.mxu1 %vm904_vm3, %v2435_v55 }
 0xf22   : > { %4543 = vmatprep.subr.mxu1 %v4992_v1 }
 0xf23   : > { %v2670_v58 = vpop.permute.xlu1 %2669 }
 0xf24   : > { %v2668_v59 = vpop.permute.xlu0 %2667 }
 0xf25   : > { %4544 = vmatpush3.xpose.msk.msra.mxu1 %vm904_vm3, %v2433_v51 }
 0xf26   : > { %4545 = vmatprep.subr.mxu1 %v4992_v1 }
 0xf27   : > { %v2666_v60 = vpop.permute.xlu1 %2665 }
 0xf28   : > { %v2660_v62 = vpop.permute.xlu0 %2659 }
 0xf29   : > { %4546 = vmatpush3.xpose.msk.msra.mxu1 %vm904_vm3, %v2431_v53 }
 0xf2a   : > { %4571 = vmatprep.subr.mxu1 %v4992_v1 }
 0xf2b   : > { %v2905_v63 = vpop.permute.xlu1 %2904 }
 0xf2c   : > { %4548 = vmatmul.mubr.msk.f32.vlgmr.msra.gmra.mxu1 %vm904_vm3, %v5788_v45  ;;  %v2662_v0 = vpop.permute.xlu0 %2661 }
 0xf2d   : > { %4572 = vmatpush3.xpose.msk.msra.mxu1 %vm904_vm3, %v2670_v58  ;;  %4550 = vmatprep.mubr.msk.f32.mxu1 %vm4993_vm0, %v4992_v1 }
 0xf2e   : > { %4573 = vmatprep.subr.mxu1 %v4992_v1 }
 0xf2f   : > { %v2903_v2 = vpop.permute.xlu1 %2902 }
 0xf30   : > { %4551 = vmatmul.mubr.msk.f32.gmra.mxu1 %vm904_vm3, %v5784_v43  ;;  %v2664_v3 = vpop.permute.xlu0 %2663 }
 0xf31   : > { %4574 = vmatpush3.xpose.msk.msra.mxu1 %vm904_vm3, %v2668_v59  ;;  %4553 = vmatprep.mubr.msk.f32.mxu1 %vm4993_vm0, %v4992_v1 }
 0xf32   : > { %4575 = vmatprep.subr.mxu1 %v4992_v1 }
 0xf33   : > { %v2901_v28 = vpop.permute.xlu1 %2900 }
 0xf34   : > { %4554 = vmatmul.mubr.msk.f32.gmra.mxu1 %vm904_vm3, %v5790_v48  ;;  %v2895_v61 = vpop.permute.xlu0 %2894 }
 0xf35   : > { %4576 = vmatpush3.xpose.msk.msra.mxu1 %vm904_vm3, %v2666_v60  ;;  %4577 = vmatprep.mubr.msk.f32.mxu1 %vm4993_vm0, %v4992_v1 }
 0xf36   : > { %4601 = vmatprep.subr.mxu1 %v4992_v1 }
 0xf37   : > { %v3140_v4 = vpop.permute.xlu1 %3139 }
 0xf38   : > { %4578 = vmatmul.mubr.msk.f32.vlgmr.msra.gmra.mxu1 %vm904_vm3, %v2660_v62  ;;  %v2897_v6 = vpop.permute.xlu0 %2896 }
 0xf39   : > { %4602 = vmatpush3.xpose.msk.msra.mxu1 %vm904_vm3, %v2905_v63  ;;  %4580 = vmatprep.mubr.msk.f32.mxu1 %vm4993_vm0, %v4992_v1 }
 0xf3a   : > { %4603 = vmatprep.subr.mxu1 %v4992_v1 }
 0xf3b   : > { %v3138_v5 = vpop.permute.xlu1 %3137 }
 0xf3c   : > { %4581 = vmatmul.mubr.msk.f32.gmra.mxu1 %vm904_vm3, %v2662_v0  ;;  %v2899_v14 = vpop.permute.xlu0 %2898 }
 0xf3d   : > { %4604 = vmatpush3.xpose.msk.msra.mxu1 %vm904_vm3, %v2903_v2  ;;  %4583 = vmatprep.mubr.msk.f32.mxu1 %vm4993_vm0, %v4992_v1 }
 0xf3e   : > { %4605 = vmatprep.subr.mxu1 %v4992_v1 }
 0xf3f   : > { %v3136_v7 = vpop.permute.xlu1 %3135 }
 0xf40   : > { %4584 = vmatmul.mubr.msk.f32.gmra.mxu1 %vm904_vm3, %v2664_v3  ;;  %v3130_v11 = vpop.permute.xlu0 %3129 }
 0xf41   : > { %4606 = vmatpush3.xpose.msk.msra.mxu1 %vm904_vm3, %v2901_v28  ;;  %4607 = vmatprep.mubr.msk.f32.mxu1 %vm4993_vm0, %v4992_v1 }
 0xf42   : > { %4631 = vmatprep.subr.mxu1 %v4992_v1 }
 0xf43   : > { %v2562_v8 = vpop.permute.xlu1 %2561 }
 0xf44   : > { %4608 = vmatmul.mubr.msk.f32.vlgmr.msra.gmra.mxu1 %vm904_vm3, %v2895_v61  ;;  %v2564_v16 = vpop.permute.xlu0 %2563 }
 0xf45   : > { %4632 = vmatpush3.xpose.msk.msra.mxu1 %vm904_vm3, %v3140_v4  ;;  %4610 = vmatprep.mubr.msk.f32.mxu1 %vm4993_vm0, %v4992_v1 }
 0xf46   : > { %4633 = vmatprep.subr.mxu1 %v4992_v1 }
 0xf47   : > { %v5888_v9 = vpop.permute.xlu1 %2796 }
 0xf48   : > { %4611 = vmatmul.mubr.msk.f32.gmra.mxu1 %vm904_vm3, %v2897_v6  ;;  %v5954_v4 = vpop.permute.xlu0 %2798 }
 0xf49   : > { %4634 = vmatpush3.xpose.msk.msra.mxu1 %vm904_vm3, %v3138_v5  ;;  %4613 = vmatprep.mubr.msk.f32.mxu1 %vm4993_vm0, %v4992_v1 }
 0xf4a   : > { %4635 = vmatprep.subr.mxu1 %v4992_v1 }
 0xf4b   : > { %v5895_v52 = vpop.permute.xlu1 %3033 }
 0xf4c   : > { %4614 = vmatmul.mubr.msk.f32.gmra.mxu1 %vm904_vm3, %v2899_v14 }
 0xf4d   : > { %4636 = vmatpush3.xpose.msk.msra.mxu1 %vm904_vm3, %v3136_v7  ;;  %4637 = vmatprep.mubr.msk.f32.mxu1 %vm4993_vm0, %v4992_v1 }
 0xf4e   : > { %4661 = vmatprep.subr.mxu1 %v4992_v1 }
 0xf4f   : > { %v2566_v12 = vpop.permute.xlu1 %2565 }
 0xf50   : > { %4557 = vmatpush3.msra.mxu0 %v2566_v12  ;;  %4638 = vmatmul.mubr.msk.f32.vlgmr.msra.gmra.mxu1 %vm904_vm3, %v3130_v11 }
 0xf51   : > { %4558 = vmatprep.subr.mxu0 %v4992_v1  ;;  %4640 = vmatprep.mubr.msk.f32.mxu1 %vm4993_vm0, %v4992_v1 }
 0xf52   : > { %4559 = vmatpush3.msra.mxu0 %v2564_v16 }
 0xf53   : > { %4560 = vmatprep.subr.mxu0 %v4992_v1  ;;  %v5950_v3 = vpop.permute.xlu1 %2800 }
 0xf54   : > { %4561 = vmatpush3.msra.mxu0 %v2562_v8 }
 0xf55   : > { %4586 = vmatprep.subr.mxu0 %v4992_v1 }
 0xf57   : > { %v5952_v28 = vpop.permute.xlu1 %3035 }
 0xfec   : > { %v2514_v20 = vpop.f32.mrf.mxu1 }
 0xfed   : > { %v2515_v21 = vadd.f32 %v4927_v54, %v2514_v20 }
 0xfee   : > { %v4549_v22 = vpop.f32.mrf.mxu1 }
 0xfef   : > { %v2528_v23 = vsel %vm997_vm4, %v2515_v21, -inf }
 0xff0   : > { %2529 = vmax.xlane.f32.xlu1 %v2528_v23  ;;  %v2519_v41 = vpop.f32.mrf.mxu1 }
 0xff1   : > { %v2520_v18 = vadd.f32 %v5915_v25, %v2519_v41 }
 0xff2   : > { %v4552_v26 = vpop.f32.mrf.mxu1 }
 0xff3   : > { %v2531_v17 = vsel %vm997_vm4, %v2520_v18, -inf }
 0xff4   : > { %2532 = vmax.xlane.f32.xlu0 %v2531_v17  ;;  %v2524_v27 = vpop.f32.mrf.mxu1 }
 0xff5   : > { %v2525_v30 = vadd.f32 %v5922_v29, %v2524_v27 }
 0xff6   : > { %v4555_v37 = vpop.f32.mrf.mxu1 }
 0xff7   : > { %v2534_v31 = vsel %vm997_vm4, %v2525_v30, -inf }
 0xff8   : > { %2535 = vmax.xlane.f32.xlu0 %v2534_v31  ;;  %v2749_v46 = vpop.f32.mrf.mxu1 }
 0xff9   : > { %v2750_v32 = vadd.f32 %v4927_v54, %v2749_v46 }
 0xffa   : > { %v4579_v33 = vpop.f32.mrf.mxu1 }
 0xffb   : > { %v2763_v34 = vsel %vm997_vm4, %v2750_v32, -inf }
 0xffc   : > { %2764 = vmax.xlane.f32.xlu0 %v2763_v34  ;;  %v2754_v19 = vpop.f32.mrf.mxu1 }
 0xffd   : > { %v2755_v35 = vadd.f32 %v5915_v25, %v2754_v19 }
 0xffe   : > { %v4582_v36 = vpop.f32.mrf.mxu1 }
 0xfff   : > { %v2766_v38 = vsel %vm997_vm4, %v2755_v35, -inf }
0x1000   : > { %2767 = vmax.xlane.f32.xlu1 %v2766_v38  ;;  %v2759_v39 = vpop.f32.mrf.mxu1 }
0x1001   : > { %v2760_v10 = vadd.f32 %v5922_v29, %v2759_v39 }
0x1002   : > { %v4585_v40 = vpop.f32.mrf.mxu1 }
0x1003   : > { %v2769_v24 = vsel %vm997_vm4, %v2760_v10, -inf }
0x1004   : > { %2770 = vmax.xlane.f32.xlu0 %v2769_v24  ;;  %v2984_v13 = vpop.f32.mrf.mxu1 }
0x1005   : > { %v2985_v15 = vadd.f32 %v4927_v54, %v2984_v13 }
0x1006   : > { %v4609_v42 = vpop.f32.mrf.mxu1 }
0x1007   : > { %v2998_v44 = vsel %vm997_vm4, %v2985_v15, -inf }
0x1008   : > { %2999 = vmax.xlane.f32.xlu1 %v2998_v44  ;;  %v2989_v47 = vpop.f32.mrf.mxu1 }
0x1009   : > { %v5933_v50 = vadd.f32 %v5915_v25, %v2989_v47 }
0x100a   : > { %v4612_v51 = vpop.f32.mrf.mxu1 }
0x100b   : > { %v3001_v53 = vsel %vm997_vm4, %v5933_v50, -inf }
0x100c   : > { %3002 = vmax.xlane.f32.xlu0 %v3001_v53  ;;  %v2994_v55 = vpop.f32.mrf.mxu1 }
0x100d   : > { %v5938_v58 = vadd.f32 %v5922_v29, %v2994_v55 }
0x100e   : > { %v4615_v59 = vpop.f32.mrf.mxu1 }
0x100f   : > { %v3004_v60 = vsel %vm997_vm4, %v5938_v58, -inf }
0x1010   : > { %3005 = vmax.xlane.f32.xlu1 %v3004_v60  ;;  %v3219_v62 = vpop.f32.mrf.mxu1 }
0x1011   : > { %v5942_v63 = vadd.f32 %v4927_v54, %v3219_v62 }
0x1012   : > { %v4639_v0 = vpop.f32.mrf.mxu1 }
0x1013   : > { %v3233_v2 = vsel %vm997_vm4, %v5942_v63, -inf }
0x1014   : > { %3234 = vmax.xlane.f32.xlu0 %v3233_v2 }
0x1021   : > { %3031 = vrot.lane.b32.xlu1 %v5788_v45, %s6406_s1 }
0x102a   : > { %3270 = vrot.lane.b32.xlu0 %v5790_v48, %s6407_s3 }
0x1079   : > { %v2530_v61 = vpop.xlane.xlu1 %2529 }
0x107a   : > { %v2537_v5 = vsub.f32 %v2515_v21, %v2530_v61 }
0x107c   : > { %v2540_v6 = vmul.f32 1.442695, %v2537_v5 }
0x107d   : > { %v2533_v7 = vpop.xlane.xlu0 %2532 }
0x107e   : > { %4865 = vpow2.f32 %v2540_v6  ;;  %v2538_v8 = vsub.f32 %v2520_v18, %v2533_v7 }
0x1080   : > { %v2542_v14 = vmul.f32 1.442695, %v2538_v8 }
0x1081   : > { %v2536_v11 = vpop.xlane.xlu0 %2535 }
0x1082   : > { %4867 = vpow2.f32 %v2542_v14  ;;  %v2539_v12 = vsub.f32 %v2525_v30, %v2536_v11 }
0x1084   : > { %v2544_v16 = vmul.f32 1.442695, %v2539_v12 }
0x1085   : > { %v2765_v20 = vpop.xlane.xlu0 %2764 }
0x1086   : > { %4869 = vpow2.f32 %v2544_v16  ;;  %v2772_v54 = vsub.f32 %v2750_v32, %v2765_v20 }
0x1088   : > { %v2775_v22 = vmul.f32 1.442695, %v2772_v54 }
0x1089   : > { %v2768_v23 = vpop.xlane.xlu1 %2767 }
0x108a   : > { %4871 = vpow2.f32 %v2775_v22  ;;  %v2773_v41 = vsub.f32 %v2755_v35, %v2768_v23 }
0x108b   : > { %v5956_v26 = vpop.eup %4865 }
0x108c   : > { %v2777_v17 = vmul.f32 1.442695, %v2773_v41  ;;  %v2546_v21 = vsel %vm997_vm4, %v5956_v26, 0.0 }
0x108d   : > { %2547 = vadd.xlane.f32.xlu1 %v2546_v21  ;;  %v2771_v18 = vpop.xlane.xlu0 %2770 }
0x108e   : > { %4873 = vpow2.f32 %v2777_v17  ;;  %v2774_v27 = vsub.f32 %v2760_v10, %v2771_v18 }
0x108f   : > { %v5960_v37 = vpop.eup %4867 }
0x1090   : > { %v2779_v30 = vmul.f32 1.442695, %v2774_v27  ;;  %v2549_v31 = vsel %vm997_vm4, %v5960_v37, 0.0 }
0x1091   : > { %v3000_v46 = vpop.xlane.xlu1 %2999  ;;  %2550 = vadd.xlane.f32.xlu0 %v2549_v31 }
0x1092   : > { %4875 = vpow2.f32 %v2779_v30  ;;  %v3007_v32 = vsub.f32 %v2985_v15, %v3000_v46 }
0x1093   : > { %v5964_v33 = vpop.eup %4869 }
0x1094   : > { %v3010_v34 = vmul.f32 1.442695, %v3007_v32  ;;  %v2552_v19 = vsel %vm997_vm4, %v5964_v33, 0.0 }
0x1095   : > { %2553 = vadd.xlane.f32.xlu1 %v2552_v19  ;;  %v3003_v15 = vpop.xlane.xlu0 %3002 }
0x1096   : > { %4877 = vpow2.f32 %v3010_v34  ;;  %v3008_v42 = vsub.f32 %v5933_v50, %v3003_v15 }
0x1097   : > { %v5968_v35 = vpop.eup %4871 }
0x1098   : > { %v2781_v36 = vsel %vm997_vm4, %v5968_v35, 0.0  ;;  %v3012_v44 = vmul.f32 1.442695, %v3008_v42 }
0x1099   : > { %2782 = vadd.xlane.f32.xlu0 %v2781_v36  ;;  %v3006_v47 = vpop.xlane.xlu1 %3005 }
0x109a   : > { %4879 = vpow2.f32 %v3012_v44  ;;  %v3009_v51 = vsub.f32 %v5938_v58, %v3006_v47 }
0x109b   : > { %v5972_v38 = vpop.eup %4873 }
0x109c   : > { %v2784_v39 = vsel %vm997_vm4, %v5972_v38, 0.0  ;;  %v3014_v55 = vmul.f32 1.442695, %v3009_v51 }
0x109d   : > { %2785 = vadd.xlane.f32.xlu1 %v2784_v39  ;;  %v3235_v53 = vpop.xlane.xlu0 %3234 }
0x109e   : > { %v3242_v59 = vsub.f32 %v5942_v63, %v3235_v53  ;;  %4881 = vpow2.f32 %v3014_v55  ;;  %v3032_v63 = vpop.permute.xlu1 %3031 }
0x109f   : > { %v5976_v10 = vpop.eup %4875 }
0x10a0   : > { %v2787_v40 = vsel %vm997_vm4, %v5976_v10, 0.0  ;;  %v3245_v60 = vmul.f32 1.442695, %v3242_v59 }
0x10a1   : > { %2788 = vadd.xlane.f32.xlu0 %v2787_v40  ;;  %v3271_v61 = vpop.permute.xlu0 %3270 }
0x10a2   : > { %4883 = vpow2.f32 %v3245_v60 }
0x10a3   : > { %v5980_v24 = vpop.eup %4877 }
0x10a4   : > { %v3016_v13 = vsel %vm997_vm4, %v5980_v24, 0.0 }
0x10a5   : > { %3017 = vadd.xlane.f32.xlu0 %v3016_v13 }
0x10a7   : > { %v5991_v62 = vpop.eup %4879 }
0x10a8   : > { %v3019_v50 = vsel %vm997_vm4, %v5991_v62, 0.0 }
0x10ab   : > { %v5995_v0 = vpop.eup %4881 }
0x10ae   : > { %3131 = vrot.lane.b32.xlu1 %v5784_v43, %s6403_s23 }
0x10af   : > { %v5999_v2 = vpop.eup %4883 }
0x10b0   : > { %v3251_v58 = vsel %vm997_vm4, %v5999_v2, 0.0 }
0x10bb   : > { %3268 = vrot.lane.b32.xlu0 %v5784_v43, %s6407_s3  ;;  %v3022_v43 = vsel %vm997_vm4, %v5995_v0, 0.0 }
0x10d2   : > { %3020 = vadd.xlane.f32.xlu1 %v3019_v50  ;;  %v4089_v50 = vld [vmem:[%s6321_s8 + $0x38] sm:$0xff] }
0x10d3   : > { %4662 = vmatpush3.msra.mxu1 %v4089_v50 }
0x10d4   : > { %4663 = vmatprep.subr.mxu1 %v4992_v1 }
0x10da   : > { %3023 = vadd.xlane.f32.xlu0 %v3022_v43  ;;  %v4087_v43 = vld [vmem:[%s6321_s8 + $0x28] sm:$0xff] }
0x10de   : > { %3252 = vadd.xlane.f32.xlu0 %v3251_v58 }
0x10e3   : > { %3266 = vrot.lane.b32.xlu1 %v5788_v45, %s6407_s3  ;;  %s4124_s3 = sshll.u32 %s5135_s2, 4  ;;  %s4934_s2 = sshll.u32 %s5008_s28, 4  ;;  %s4935_s2 = int_to_ptr.vmem [resolvable:$false] %s4934_s2 }
0x10e4   : > { %s4936_s29 = scalar_lea.vmem %s4935_s2, 32 }
0x10f4   : > { %3133 = vrot.lane.b32.xlu0 %v5790_v48, %s6403_s23  ;;  %s6408_s23 = smov 8  }
0x1116   : > { %v2548_v5 = vpop.xlane.xlu1 %2547 }
0x1117   : > { %4885 = vrcp.f32 %v2548_v5 }
0x111a   : > { %v2551_v6 = vpop.xlane.xlu0 %2550 }
0x111b   : > { %4887 = vrcp.f32 %v2551_v6 }
0x111e   : > { %v2554_v7 = vpop.xlane.xlu1 %2553 }
0x111f   : > { %4889 = vrcp.f32 %v2554_v7 }
0x1122   : > { %v2783_v8 = vpop.xlane.xlu0 %2782 }
0x1123   : > { %4891 = vrcp.f32 %v2783_v8 }
0x1124   : > { %v4886_v14 = vpop.eup %4885 }
0x1125   : > { %v2556_v11 = vmul.f32 %v4886_v14, %v5956_v26 }
0x1126   : > { %v2786_v12 = vpop.xlane.xlu1 %2785 }
0x1127   : > { %4893 = vrcp.f32 %v2786_v12  ;;  %4563 = vmatmul.mubr.msk.f32.vlgmr.msra.gmra.mxu0 %vm997_vm4, %v2556_v11 }
0x1128   : > { %v4888_v45 = vpop.eup %4887  ;;  %4587 = vmatpush3.msra.mxu0 %v5950_v3  ;;  %4565 = vmatprep.mubr.msk.f32.mxu0 %vm4993_vm0, %v4992_v1 }
0x1129   : > { %4588 = vmatprep.subr.mxu0 %v4992_v1  ;;  %v2558_v48 = vmul.f32 %v4888_v45, %v5960_v37 }
0x112a   : > { %4589 = vmatpush3.msra.mxu0 %v5954_v4  ;;  %v3132_v16 = vpop.permute.xlu1 %3131  ;;  %v2789_v20 = vpop.xlane.xlu0 %2788 }
0x112b   : > { %4590 = vmatprep.subr.mxu0 %v4992_v1  ;;  %4895 = vrcp.f32 %v2789_v20  ;;  %4566 = vmatmul.mubr.msk.f32.gmra.mxu0 %vm997_vm4, %v2558_v48 }
0x112c   : > { %v4890_v54 = vpop.eup %4889  ;;  %4591 = vmatpush3.msra.mxu0 %v5888_v9  ;;  %4641 = vmatmul.mubr.msk.f32.gmra.mxu1 %vm904_vm3, %v3132_v16 }
0x112d   : > { %4568 = vmatprep.mubr.msk.f32.mxu0 %vm4993_vm0, %v4992_v1  ;;  %v2560_v3 = vmul.f32 %v4890_v54, %v5964_v33  ;;  %4616 = vmatprep.subr.mxu0 %v4992_v1 }
0x112e   : > { %v3018_v4 = vpop.xlane.xlu0 %3017  ;;  %4643 = vmatprep.mubr.msk.f32.mxu1 %vm4993_vm0, %v4992_v1 }
0x112f   : > { %4897 = vrcp.f32 %v3018_v4  ;;  %4569 = vmatmul.mubr.msk.f32.gmra.mxu0 %vm997_vm4, %v2560_v3 }
0x1130   : > { %v4892_v22 = vpop.eup %4891  ;;  %4592 = vmatprep.mubr.msk.f32.mxu0 %vm4993_vm0, %v4992_v1 }
0x1131   : > { %v2791_v9 = vmul.f32 %v4892_v22, %v5968_v35 }
0x1132   : > { %v3269_v21 = vpop.permute.xlu0 %3268 }
0x1133   : > { %4593 = vmatmul.mubr.msk.f32.vlgmr.msra.gmra.mxu0 %vm997_vm4, %v2791_v9 }
0x1134   : > { %v4894_v23 = vpop.eup %4893  ;;  %4617 = vmatpush3.msra.mxu0 %v5952_v28  ;;  %4595 = vmatprep.mubr.msk.f32.mxu0 %vm4993_vm0, %v4992_v1 }
0x1135   : > { %4618 = vmatprep.subr.mxu0 %v4992_v1  ;;  %v2793_v41 = vmul.f32 %v4894_v23, %v5972_v38 }
0x1136   : > { %4619 = vmatpush3.msra.mxu0 %v5895_v52 }
0x1137   : > { %4620 = vmatprep.subr.mxu0 %v4992_v1  ;;  %4596 = vmatmul.mubr.msk.f32.gmra.mxu0 %vm997_vm4, %v2793_v41 }
0x1138   : > { %v4896_v26 = vpop.eup %4895  ;;  %4621 = vmatpush3.msra.mxu0 %v3032_v63  ;;  %4598 = vmatprep.mubr.msk.f32.mxu0 %vm4993_vm0, %v4992_v1  ;;  %v4086_v63 = vld [vmem:[%s6321_s8 + $0x20] sm:$0xff] }
0x1139   : > { %v2795_v28 = vmul.f32 %v4896_v26, %v5976_v10  ;;  %4646 = vmatprep.subr.mxu0 %v4992_v1 }
0x113b   : > { %4599 = vmatmul.mubr.msk.f32.gmra.mxu0 %vm997_vm4, %v2795_v28 }
0x113c   : > { %v4898_v17 = vpop.eup %4897  ;;  %4622 = vmatprep.mubr.msk.f32.mxu0 %vm4993_vm0, %v4992_v1 }
0x113d   : > { %v3026_v52 = vmul.f32 %v4898_v17, %v5980_v24 }
0x113f   : > { %4623 = vmatmul.mubr.msk.f32.vlgmr.msra.gmra.mxu0 %vm997_vm4, %v3026_v52 }
0x1140   : > { %4647 = vmatpush3.msra.mxu0 %v3271_v61  ;;  %4625 = vmatprep.mubr.msk.f32.mxu0 %vm4993_vm0, %v4992_v1 }
0x1141   : > { %4648 = vmatprep.subr.mxu0 %v4992_v1 }
0x1142   : > { %4649 = vmatpush3.msra.mxu0 %v3269_v21 }
0x1143   : > { %4650 = vmatprep.subr.mxu0 %v4992_v1 }
0x115b   : > { %v3021_v18 = vpop.xlane.xlu1 %3020 }
0x115c   : > { %4899 = vrcp.f32 %v3021_v18 }
0x115f   : > { %v3267_v27 = vpop.permute.xlu1 %3266 }
0x1160   : > { %4651 = vmatpush3.msra.mxu0 %v3267_v27 }
0x1161   : > { %4678 = vmatprep.subr.mxu0 %v4992_v1 }
0x1163   : > { %v3024_v37 = vpop.xlane.xlu0 %3023 }
0x1164   : > { %4901 = vrcp.f32 %v3024_v37  ;;  %v6113_v37 = vld [vmem:[%s6322_s9 + $0x1] ss:$0 sm:$0xff] }
0x1167   : > { %v3253_v30 = vpop.xlane.xlu0 %3252 }
0x1168   : > { %4903 = vrcp.f32 %v3253_v30 }
0x1169   : > { %v4900_v31 = vpop.eup %4899 }
0x116a   : > { %v3028_v46 = vmul.f32 %v4900_v31, %v5991_v62 }
0x116b   : > { %v3134_v32 = vpop.permute.xlu0 %3133 }
0x116c   : > { %4626 = vmatmul.mubr.msk.f32.gmra.mxu0 %vm997_vm4, %v3028_v46  ;;  %4644 = vmatmul.mubr.msk.f32.gmra.mxu1 %vm904_vm3, %v3134_v32 }
0x116d   : > { %4628 = vmatprep.mubr.msk.f32.mxu0 %vm4993_vm0, %v4992_v1  ;;  %4669 = vmatprep.mubr.msk.f32.mxu1 %vm4993_vm0, %v4992_v1 }
0x1171   : > { %v4902_v33 = vpop.eup %4901 }
0x1172   : > { %v3030_v34 = vmul.f32 %v4902_v33, %v5995_v0  ;;  %v4088_v0 = vld [vmem:[%s6321_s8 + $0x30] sm:$0xff] }
0x1173   : > { %4664 = vmatpush3.msra.mxu1 %v4088_v0 }
0x1174   : > { %4629 = vmatmul.mubr.msk.f32.gmra.mxu0 %vm997_vm4, %v3030_v34  ;;  %4665 = vmatprep.subr.mxu1 %v4992_v1 }
0x1175   : > { %v4904_v19 = vpop.eup %4903  ;;  %4652 = vmatprep.mubr.msk.f32.mxu0 %vm4993_vm0, %v4992_v1  ;;  %4666 = vmatpush3.msra.mxu1 %v4087_v43 }
0x1176   : > { %v3261_v35 = vmul.f32 %v4904_v19, %v5999_v2  ;;  %4667 = vmatprep.subr.mxu1 %v4992_v1 }
0x1177   : > { %4668 = vmatpush3.msra.mxu1 %v4086_v63 }
0x1178   : > { %4653 = vmatmul.mubr.msk.f32.vlgmr.msra.gmra.mxu0 %vm997_vm4, %v3261_v35  ;;  %4695 = vmatprep.subr.mxu1 %v4992_v1 }
0x1179   : > { %4655 = vmatprep.mubr.msk.f32.mxu0 %vm4993_vm0, %v4992_v1 }
0x11e7   : > { %v2645_v36 = vpop.f32.mrf.mxu0 }
0x11e9   : > { %v4564_v38 = vpop.f32.mrf.mxu0 }
0x11eb   : > { %v6067_v39 = vpop.f32.mrf.mxu0 }
0x11ec   : > { %v3224_v10 = vpop.f32.mrf.mxu1 }
0x11ed   : > { %v3225_v40 = vadd.f32 %v5915_v25, %v3224_v10  ;;  %v4567_v24 = vpop.f32.mrf.mxu0 }
0x11ee   : > { %v4642_v13 = vpop.f32.mrf.mxu1 }
0x11ef   : > { %v3236_v15 = vsel %vm997_vm4, %v3225_v40, -inf  ;;  %v6071_v42 = vpop.f32.mrf.mxu0 }
0x11f0   : > { %3237 = vmax.xlane.f32.xlu0 %v3236_v15  ;;  %v4102_v15 = vld [vmem:[%s6325_s12 + $0x38] sm:$0xff] }
0x11f1   : > { %v4570_v44 = vpop.f32.mrf.mxu0  ;;  %4679 = vmatpush3.msra.mxu0 %v4102_v15 }
0x11f2   : > { %4680 = vmatprep.subr.mxu0 %v4992_v1  ;;  %v4101_v44 = vld [vmem:[%s6325_s12 + $0x30] sm:$0xff] }
0x11f3   : > { %v2880_v47 = vpop.f32.mrf.mxu0  ;;  %4681 = vmatpush3.msra.mxu0 %v4101_v44 }
0x11f4   : > { %3367 = vrot.lane.b32.xlu1 %v2880_v47, %s6408_s23  ;;  %v4100_v47 = vld [vmem:[%s6325_s12 + $0x28] sm:$0xff]  ;;  %4682 = vmatprep.subr.mxu0 %v4992_v1 }
0x11f5   : > { %v4594_v51 = vpop.f32.mrf.mxu0  ;;  %4683 = vmatpush3.msra.mxu0 %v4100_v47 }
0x11f6   : > { %v4099_v51 = vld [vmem:[%s6325_s12 + $0x20] sm:$0xff]  ;;  %4684 = vmatprep.subr.mxu0 %v4992_v1 }
0x11f7   : > { %v6074_v53 = vpop.f32.mrf.mxu0  ;;  %4685 = vmatpush3.msra.mxu0 %v4099_v51 }
0x11f8   : > { %4720 = vmatprep.subr.mxu0 %v4992_v1 }
0x11f9   : > { %v4597_v55 = vpop.f32.mrf.mxu0 }
0x11fb   : > { %v6076_v59 = vpop.f32.mrf.mxu0 }
0x11fd   : > { %v4600_v60 = vpop.f32.mrf.mxu0 }
0x11ff   : > { %v3115_v62 = vpop.f32.mrf.mxu0 }
0x1200   : > { %3379 = vrot.lane.b32.xlu1 %v3115_v62, %s6396_s24 }
0x1201   : > { %v4624_v25 = vpop.f32.mrf.mxu0 }
0x122c   : > { %v3120_v2 = vpop.f32.mrf.mxu0  ;;  %v3229_v58 = vpop.f32.mrf.mxu1 }
0x122d   : > { %v3230_v11 = vadd.f32 %v5922_v29, %v3229_v58 }
0x122e   : > { %v4627_v61 = vpop.f32.mrf.mxu0  ;;  %v4645_v5 = vpop.f32.mrf.mxu1 }
0x122f   : > { %v3239_v12 = vsel %vm997_vm4, %v3230_v11, -inf  ;;  %v6159_v61 = vld [vmem:[%s6323_s10 + $0x1] ss:$0 sm:$0xff] }
0x1234   : > { %v3125_v6 = vpop.f32.mrf.mxu0 }
0x1236   : > { %v4630_v7 = vpop.f32.mrf.mxu0 }
0x1238   : > { %v3350_v8 = vpop.f32.mrf.mxu0 }
0x1239   : > { %3391 = vrot.lane.b32.xlu1 %v3350_v8, %s6409_s27 }
0x123a   : > { %v4654_v14 = vpop.f32.mrf.mxu0 }
0x125d   : > { %3240 = vmax.xlane.f32.xlu1 %v3239_v12 }
0x1266   : > { %v3368_v3 = vpop.permute.xlu1 %3367 }
0x1267   : > { %v3400_v22 = vsel %vm904_vm3, %v2645_v36, %v3368_v3  ;;  %v4111_v3 = vld [vmem:[%s6327_s14 + $0x58] sm:$0xff] }
0x126e   : > { %3381 = vrot.lane.b32.xlu1 %v3120_v2, %s6396_s24 }
0x1272   : > { %v3380_v4 = vpop.permute.xlu1 %3379 }
0x1273   : > { %v3403_v9 = vsel %vm1873_vm5, %v3400_v22, %v3380_v4  ;;  %v4110_v4 = vld [vmem:[%s6327_s14 + $0x50] sm:$0xff]  ;;  %v4109_v22 = vld [vmem:[%s6327_s14 + $0x48] sm:$0xff] }
0x1279   : > { %v3238_v45 = vpop.xlane.xlu0 %3237 }
0x127a   : > { %v3243_v48 = vsub.f32 %v3225_v40, %v3238_v45 }
0x127c   : > { %v3247_v16 = vmul.f32 1.442695, %v3243_v48 }
0x127e   : > { %4905 = vpow2.f32 %v3247_v16  ;;  %v4115_v16 = vld [vmem:[%s6327_s14 + $0x78] sm:$0xff] }
0x128b   : > { %v4906_v20 = vpop.eup %4905 }
0x128c   : > { %v3254_v54 = vsel %vm997_vm4, %v4906_v20, 0.0 }
0x128d   : > { %3255 = vadd.xlane.f32.xlu0 %v3254_v54  ;;  %v4112_v54 = vld [vmem:[%s6327_s14 + $0x60] sm:$0xff] }
0x12ab   : > { %v3392_v29 = vpop.permute.xlu1 %3391 }
0x12ac   : > { %v3406_v23 = vsel %vm997_vm4, %v3403_v9, %v3392_v29  ;;  %v4108_v9 = vld [vmem:[%s6327_s14 + $0x40] sm:$0xff] }
0x12ad   : > { %4670 = vmatmul.mubr.msk.f32.vlgmr.msra.gmra.mxu1 %vm736_vm2, %v3406_v23 }
0x12ae   : > { %4672 = vmatprep.mubr.msk.f32.mxu1 %vm4993_vm0, %v4992_v1  ;;  %4696 = vmatpush3.msra.mxu1 %v4115_v16 }
0x12af   : > { %4697 = vmatprep.subr.mxu1 %v4992_v1 }
0x12e6   : > { %v3241_v41 = vpop.xlane.xlu1 %3240 }
0x12e7   : > { %v3244_v26 = vsub.f32 %v3230_v11, %v3241_v41 }
0x12e9   : > { %v3249_v28 = vmul.f32 1.442695, %v3244_v26 }
0x12ea   : > { %v3382_v62 = vpop.permute.xlu1 %3381 }
0x12eb   : > { %4907 = vpow2.f32 %v3249_v28 }
0x12f8   : > { %v4908_v17 = vpop.eup %4907 }
0x12f9   : > { %v3257_v52 = vsel %vm997_vm4, %v4908_v17, 0.0 }
0x12fa   : > { %3258 = vadd.xlane.f32.xlu0 %v3257_v52 }
0x1316   : > { %v3256_v21 = vpop.xlane.xlu0 %3255 }
0x1317   : > { %4909 = vrcp.f32 %v3256_v21 }
0x1324   : > { %v4910_v18 = vpop.eup %4909 }
0x1325   : > { %v3263_v27 = vmul.f32 %v4910_v18, %v4906_v20  ;;  %v4113_v20 = vld [vmem:[%s6327_s14 + $0x68] sm:$0xff] }
0x1327   : > { %4656 = vmatmul.mubr.msk.f32.gmra.mxu0 %vm997_vm4, %v3263_v27 }
0x1328   : > { %4658 = vmatprep.mubr.msk.f32.mxu0 %vm4993_vm0, %v4992_v1 }
0x136d   : > { %v3497_v30 = vpop.f32.mrf.mxu1 }
0x136e   : > { %v3498_v31 = vadd.f32 %v6113_v37, %v3497_v30 }
0x136f   : > { %v4671_v46 = vpop.f32.mrf.mxu1 }
0x1370   : > { %v6117_v32 = vadd.f32 %v3498_v31, %v5730_v49 }
0x1372   : > { %v3518_v33 = vsel %vm736_vm2, %v6117_v32, 0.0 }
0x1373   : > { %3519 = vadd.xlane.f32.xlu0 %v3518_v33 }
0x1383   : > { %v3259_v34 = vpop.xlane.xlu0 %3258 }
0x1384   : > { %4911 = vrcp.f32 %v3259_v34 }
0x1391   : > { %v4912_v19 = vpop.eup %4911 }
0x1392   : > { %v3265_v35 = vmul.f32 %v4912_v19, %v4908_v17  ;;  %v6215_v17 = vld [vmem:[%s6326_s13 + $0x1] ss:$0 sm:$0xff] }
0x1394   : > { %4659 = vmatmul.mubr.msk.f32.gmra.mxu0 %vm997_vm4, %v3265_v35 }
0x1395   : > { %4686 = vmatprep.mubr.msk.f32.mxu0 %vm4993_vm0, %v4992_v1 }
0x13e7   : > { %v3355_v36 = vpop.f32.mrf.mxu0 }
0x13e8   : > { %3393 = vrot.lane.b32.xlu1 %v3355_v36, %s6409_s27 }
0x13e9   : > { %v4657_v38 = vpop.f32.mrf.mxu0 }
0x13ec   : > { %3371 = vrot.lane.b32.xlu1 %v6076_v59, %s6408_s23 }
0x13fc   : > { %v3520_v49 = vpop.xlane.xlu0 %3519 }
0x13fd   : > { %v3527_v10 = vmul.f32 0.03125, %v3520_v49 }
0x13ff   : > { %v3530_v40 = vsub.f32 %v6117_v32, %v3527_v10 }
0x1401   : > { %v3533_v24 = vmul.f32 %v3530_v40, %v3530_v40 }
0x1403   : > { %v3536_v13 = vsel %vm736_vm2, %v3533_v24, 0.0 }
0x1404   : > { %3537 = vadd.xlane.f32.xlu0 %v3536_v13 }
0x141a   : > { %3369 = vrot.lane.b32.xlu0 %v6074_v53, %s6408_s23 }
0x141e   : > { %3383 = vrot.lane.b32.xlu0 %v3125_v6, %s6396_s24  ;;  %s6278_s24 = scalar_lea.hbm %s6333_s20, %s4124_s3 }
0x1454   : > { %v3360_v53 = vpop.f32.mrf.mxu0 }
0x1455   : > { %3395 = vrot.lane.b32.xlu1 %v3360_v53, %s6409_s27  ;;  %s620_s27 = sand.u32 1, %s4982_s22  }
0x1456   : > { %v4660_v55 = vpop.f32.mrf.mxu0  ;;  %s621_s1 = scalar_lea.vmem [#allocation2], %s620_s27  ;;  %s3906_s5 = scalar_lea.sflag [#allocation3], %s620_s27 }
0x1457   : > { %s3918_s30 = sshll.u32 %s621_s1, 4  ;;  %s3919_s30 = int_to_ptr.vmem [resolvable:$true] %s3918_s30 }
0x1458   : > { %s4930_s6 = scalar_lea.vmem %s3919_s30, 16  ;;  %p4937_p0 = scmp.lt.s32.totalorder %s3919_s30, %s4935_s2 }
0x1459   : > { %p4931_p11 = scmp.ne.s32.totalorder %s3919_s30, %s4930_s6  ;;  %p4938_p1 = scmp.lt.s32.totalorder %s4936_s29, %s4930_s6 }
0x145a   : > { %v3394_v43 = vpop.permute.xlu1 %3393 }
0x145b   : > { %p4932_p12 = pnand %p4931_p11, %p5152_p5  ;;  %p4939_p2 = por %p4938_p1, %p4937_p0 }
0x145d   : > { %p4933_p13 = pneg %p4932_p12 }
0x145e   : > { %v3372_v8 = vpop.permute.xlu1 %3371 }
0x145f   : > { %v3402_v11 = vsel %vm904_vm3, %v6071_v42, %v3372_v8  ;;  %v4114_v42 = vld [vmem:[%s6327_s14 + $0x70] sm:$0xff]  ;;  %p4940_p3 = pnand %p4939_p2, %p4933_p13 }
0x1460   : > { %4698 = vmatpush3.msra.mxu1 %v4114_v42  ;;  %v3829_v42 = vld [vmem:[%s6331_s18 + $0x18] sm:$0xff] }
0x1461   : > { %4699 = vmatprep.subr.mxu1 %v4992_v1 }
0x1462   : > { %4700 = vmatpush3.msra.mxu1 %v4113_v20  ;;  %v3826_v20 = vld [vmem:[%s6331_s18] sm:$0xff] }
0x1463   : > { %4701 = vmatprep.subr.mxu1 %v4992_v1 }
0x1464   : > { %4702 = vmatpush3.msra.mxu1 %v4112_v54 }
0x1465   : > { %4703 = vmatprep.subr.mxu1 %v4992_v1 }
0x1466   : > { %4704 = vmatpush3.msra.mxu1 %v4111_v3 }
0x1467   : > { %4705 = vmatprep.subr.mxu1 %v4992_v1 }
0x1468   : > { %4706 = vmatpush3.msra.mxu1 %v4110_v4 }
0x1469   : > { %4707 = vmatprep.subr.mxu1 %v4992_v1 }
0x146a   : > { %4708 = vmatpush3.msra.mxu1 %v4109_v22 }
0x146b   : > { %4709 = vmatprep.subr.mxu1 %v4992_v1 }
0x146c   : > { %4710 = vmatpush3.msra.mxu1 %v4108_v9 }
0x148d   : > { %v3538_v59 = vpop.xlane.xlu0 %3537 }
0x148e   : > { %v3545_v60 = vmul.f32 0.03125, %v3538_v59 }
0x1490   : > { %v3548_v25 = vadd.f32 1e-06, %v3545_v60 }
0x1491   : > { %v3370_v50 = vpop.permute.xlu0 %3369 }
0x1492   : > { %4913 = vrsqrt.f32 %v3548_v25  ;;  %v3401_v0 = vsel %vm904_vm3, %v6067_v39, %v3370_v50  ;;  %v6164_v39 = vld [vmem:[%s6324_s11 + $0x1] ss:$0 sm:$0xff] }
0x1493   : > { %v3404_v2 = vsel %vm1873_vm5, %v3401_v0, %v3382_v62 }
0x1494   : > { %v3407_v58 = vsel %vm997_vm4, %v3404_v2, %v3394_v43 }
0x1495   : > { %4673 = vmatmul.mubr.msk.f32.gmra.mxu1 %vm736_vm2, %v3407_v58  ;;  %v3384_v14 = vpop.permute.xlu0 %3383 }
0x1496   : > { %4675 = vmatprep.mubr.msk.f32.mxu1 %vm4993_vm0, %v4992_v1  ;;  %v3405_v12 = vsel %vm1873_vm5, %v3402_v11, %v3384_v14 }
0x149f   : > { %v4914_v63 = vpop.eup %4913 }
0x14a0   : > { %v3554_v5 = vmul.f32 %v4914_v63, %v3530_v40 }
0x14a2   : > { %v3563_v6 = vmul.f32 %v6159_v61, %v3554_v5 }
0x14a4   : > { %v3572_v7 = vadd.f32 %v6164_v39, %v3563_v6 }
0x14a6   : > { %4687 = vmatmul.mubr.msk.f32.vlgmr.msra.gmra.mxu0 %vm736_vm2, %v3572_v7 }
0x14a7   : > { %4689 = vmatprep.mubr.msk.f32.mxu0 %vm4993_vm0, %v4992_v1  ;;  %4721 = vmatpush3.msra.mxu0 %v3829_v42 }
0x14a8   : > { %4722 = vmatprep.subr.mxu0 %v4992_v1 }
0x14c7   : > { %v3396_v45 = vpop.permute.xlu1 %3395 }
0x14c8   : > { %v3408_v48 = vsel %vm997_vm4, %v3405_v12, %v3396_v45 }
0x14c9   : > { %4676 = vmatmul.mubr.msk.f32.gmra.mxu1 %vm736_vm2, %v3408_v48 }
0x14ca   : > { %4711 = vmatprep.mubr.msk.f32.mxu1 %vm4993_vm0, %v4992_v1 }
0x1555   : > { %v3502_v29 = vpop.f32.mrf.mxu1 }
0x1556   : > { %v3503_v23 = vadd.f32 %v6113_v37, %v3502_v29 }
0x1557   : > { %v4674_v41 = vpop.f32.mrf.mxu1 }
0x1558   : > { %v3512_v26 = vadd.f32 %v3503_v23, %v5735_v57 }
0x155a   : > { %v3521_v28 = vsel %vm736_vm2, %v3512_v26, 0.0 }
0x155b   : > { %3522 = vadd.xlane.f32.xlu0 %v3521_v28 }
0x1566   : > { %v3663_v52 = vpop.f32.mrf.mxu0 }
0x1567   : > { %v3664_v21 = vadd.f32 %v6215_v17, %v3663_v52 }
0x1568   : > { %v4688_v18 = vpop.f32.mrf.mxu0 }
0x1569   : > { %v3680_v27 = vmul.f32 0.70710677, %v3664_v21  ;;  %v3677_v31 = vmul.f32 0.5, %v3664_v21  ;;  %v4121_v18 = vld [vmem:[%s6329_s16] ss:$0 sm:$0xff] }
0x156b   : > { %4915 = verf.f32 %v3680_v27 }
0x1578   : > { %v4916_v30 = vpop.eup %4915 }
0x1579   : > { %v3686_v46 = vadd.f32 1.0, %v4916_v30  ;;  %v4122_v30 = vld [vmem:[%s6330_s17] ss:$0 sm:$0xff] }
0x157b   : > { %v3689_v33 = vmul.f32 %v3686_v46, %v3677_v31 }
0x157d   : > { %4712 = vmatmul.mubr.msk.f32.vlgmr.msra.gmra.mxu1 %vm644_vm1, %v3689_v33 }
0x157e   : > { %4714 = vmatprep.mubr.msk.f32.mxu1 %vm4993_vm0, %v4992_v1 }
0x1589   : > { %v3507_v57 = vpop.f32.mrf.mxu1 }
0x158a   : > { %v3508_v34 = vadd.f32 %v6113_v37, %v3507_v57 }
0x158b   : > { %v4677_v19 = vpop.f32.mrf.mxu1 }
0x158c   : > { %v3513_v35 = vadd.f32 %v3508_v34, %v5740_v56  ;;  %v4117_v56 = vld [vmem:[%s6328_s15 + $0x1] ss:$0 sm:$0xff] }
0x158e   : > { %v3524_v36 = vsel %vm736_vm2, %v3513_v35, 0.0 }
0x158f   : > { %3525 = vadd.xlane.f32.xlu1 %v3524_v36 }
0x15e4   : > { %v3523_v38 = vpop.xlane.xlu0 %3522 }
0x15e5   : > { %v3528_v49 = vmul.f32 0.03125, %v3523_v38 }
0x15e7   : > { %v3531_v10 = vsub.f32 %v3512_v26, %v3528_v49 }
0x15e9   : > { %v3534_v40 = vmul.f32 %v3531_v10, %v3531_v10 }
0x15eb   : > { %v3539_v24 = vsel %vm736_vm2, %v3534_v40, 0.0  ;;  %v3830_v40 = vld [vmem:[%s6332_s19] sm:$0x1] }
0x15ec   : > { %3540 = vadd.xlane.f32.xlu0 %v3539_v24 }
0x1618   : > { %v3526_v13 = vpop.xlane.xlu1 %3525 }
0x1619   : > { %v3529_v15 = vmul.f32 0.03125, %v3526_v13 }
0x161b   : > { %v3532_v44 = vsub.f32 %v3513_v35, %v3529_v15 }
0x161d   : > { %v3535_v47 = vmul.f32 %v3532_v44, %v3532_v44 }
0x161f   : > { %v3542_v51 = vsel %vm736_vm2, %v3535_v47, 0.0 }
0x1620   : > { %3543 = vadd.xlane.f32.xlu0 %v3542_v51 }
0x163d   : > { %v3784_v37 = vpop.f32.mrf.mxu1 }
0x163e   : > { %v3785_v53 = vadd.f32 %v4117_v56, %v3784_v37 }
0x163f   : > { %v4713_v55 = vpop.f32.mrf.mxu1 }
0x1640   : > { %v3796_v59 = vadd.f32 %v3785_v53, %v6117_v32 }
0x1642   : > { %v3799_v60 = vsel %vm736_vm2, %v3796_v59, 0.0 }
0x1643   : > { %3800 = vadd.xlane.f32.xlu0 %v3799_v60 }
0x1675   : > { %v3541_v62 = vpop.xlane.xlu0 %3540 }
0x1676   : > { %v3546_v25 = vmul.f32 0.03125, %v3541_v62 }
0x1678   : > { %v3549_v50 = vadd.f32 1e-06, %v3546_v25 }
0x167a   : > { %4917 = vrsqrt.f32 %v3549_v50 }
0x1687   : > { %v4918_v0 = vpop.eup %4917 }
0x1688   : > { %v3555_v43 = vmul.f32 %v4918_v0, %v3531_v10 }
0x168a   : > { %v3564_v2 = vmul.f32 %v6159_v61, %v3555_v43 }
0x168c   : > { %v3573_v58 = vadd.f32 %v6164_v39, %v3564_v2 }
0x168e   : > { %4690 = vmatmul.mubr.msk.f32.gmra.mxu0 %vm736_vm2, %v3573_v58 }
0x168f   : > { %4692 = vmatprep.mubr.msk.f32.mxu0 %vm4993_vm0, %v4992_v1 }
0x16a9   : > { %v3544_v63 = vpop.xlane.xlu0 %3543 }
0x16aa   : > { %v3547_v32 = vmul.f32 0.03125, %v3544_v63 }
0x16ac   : > { %v3550_v5 = vadd.f32 1e-06, %v3547_v32 }
0x16ae   : > { %4919 = vrsqrt.f32 %v3550_v5 }
0x16bb   : > { %v4920_v6 = vpop.eup %4919 }
0x16bc   : > { %v3556_v7 = vmul.f32 %v4920_v6, %v3532_v44 }
0x16be   : > { %v3565_v8 = vmul.f32 %v6159_v61, %v3556_v7  ;;  %v3828_v61 = vld [vmem:[%s6331_s18 + $0x10] sm:$0xff] }
0x16bf   : > { %4723 = vmatpush3.msra.mxu0 %v3828_v61 }
0x16c0   : > { %v3574_v14 = vadd.f32 %v6164_v39, %v3565_v8  ;;  %v3827_v39 = vld [vmem:[%s6331_s18 + $0x8] sm:$0xff]  ;;  %4724 = vmatprep.subr.mxu0 %v4992_v1 }
0x16c1   : > { %4725 = vmatpush3.msra.mxu0 %v3827_v39 }
0x16c2   : > { %4693 = vmatmul.mubr.msk.f32.gmra.mxu0 %vm736_vm2, %v3574_v14  ;;  %4726 = vmatprep.subr.mxu0 %v4992_v1 }
0x16c3   : > { %4728 = vmatprep.mubr.msk.f32.mxu0 %vm4993_vm0, %v4992_v1  ;;  %4727 = vmatpush3.msra.mxu0 %v3826_v20 }
0x16cc   : > { %v3801_v11 = vpop.xlane.xlu0 %3800 }
0x16cd   : > { %v3802_v12 = vmul.f32 0.03125, %v3801_v11 }
0x16cf   : > { %v3803_v45 = vsub.f32 %v3796_v59, %v3802_v12 }
0x16d1   : > { %v3804_v48 = vmul.f32 %v3803_v45, %v3803_v45 }
0x16d3   : > { %v3805_v16 = vsel %vm736_vm2, %v3804_v48, 0.0 }
0x16d4   : > { %3806 = vadd.xlane.f32.xlu1 %v3805_v16 }
0x174e   : > { %v3668_v54 = vpop.f32.mrf.mxu0 }
0x174f   : > { %v3669_v3 = vadd.f32 %v6215_v17, %v3668_v54 }
0x1750   : > { %v4691_v4 = vpop.f32.mrf.mxu0 }
0x1751   : > { %v3681_v22 = vmul.f32 0.70710677, %v3669_v3  ;;  %v3678_v26 = vmul.f32 0.5, %v3669_v3 }
0x1753   : > { %4921 = verf.f32 %v3681_v22 }
0x175d   : > { %v3807_v9 = vpop.xlane.xlu1 %3806 }
0x175e   : > { %v3808_v29 = vmul.f32 0.03125, %v3807_v9 }
0x1760   : > { %v4922_v23 = vpop.eup %4921  ;;  %v3809_v41 = vadd.f32 1e-06, %v3808_v29 }
0x1761   : > { %v3687_v28 = vadd.f32 1.0, %v4922_v23 }
0x1762   : > { %4923 = vrsqrt.f32 %v3809_v41 }
0x1763   : > { %v3690_v52 = vmul.f32 %v3687_v28, %v3678_v26 }
0x1765   : > { %4715 = vmatmul.mubr.msk.f32.gmra.mxu1 %vm644_vm1, %v3690_v52 }
0x1766   : > { %4717 = vmatprep.mubr.msk.f32.mxu1 %vm4993_vm0, %v4992_v1 }
0x176f   : > { %v4924_v21 = vpop.eup %4923 }
0x1770   : > { %v3811_v27 = vmul.f32 %v4924_v21, %v3803_v45 }
0x1772   : > { %v3818_v31 = vmul.f32 %v4121_v18, %v3811_v27 }
0x1774   : > { %v3825_v46 = vadd.f32 %v4122_v30, %v3818_v31 }
0x1776   : > { %4729 = vmatmul.mubr.msk.f32.vlgmr.msra.gmra.mxu0 %vm736_vm2, %v3825_v46 }
0x1782   : > { %v3673_v33 = vpop.f32.mrf.mxu0 }
0x1783   : > { %v3674_v57 = vadd.f32 %v6215_v17, %v3673_v33 }
0x1784   : > { %v4694_v1 = vpop.f32.mrf.mxu0 }
0x1785   : > { %v3682_v34 = vmul.f32 0.70710677, %v3674_v57  ;;  %v3679_v35 = vmul.f32 0.5, %v3674_v57 }
0x1787   : > { %4925 = verf.f32 %v3682_v34 }
0x1794   : > { %v4926_v19 = vpop.eup %4925 }
0x1795   : > { %v3688_v36 = vadd.f32 1.0, %v4926_v19 }
0x1797   : > { %v3691_v38 = vmul.f32 %v3688_v36, %v3679_v35 }
0x1799   : > { %4718 = vmatmul.mubr.msk.f32.gmra.mxu1 %vm644_vm1, %v3691_v38 }
0x1825   : > { %v3789_v49 = vpop.f32.mrf.mxu1 }
0x1827   : > { %v4716_v10 = vpop.f32.mrf.mxu1 }
0x1836   : > { %v3900_v17 = vpop.f32.mrf.mxu0 }
0x1837   : > { %v3901_v24 = vadd.f32 %v3900_v17, %v3830_v40 }
0x1838   : > { %v4730_v13 = vpop.f32.mrf.mxu0 }
0x1839   : > { %3904 = vst [vmem:[%s621_s1] sm:$0x1] %v3901_v24 }
0x183a   : > { %4943 = shalt.err (!%p4940_p3)
}
0x183b   : > { %s4944_s3 = scalar_lea.hbm %s6278_s24, 16  ;;  %s4948_s0 = scalar_lea.hbm %s6333_s20, 32 }
0x183c   : > { %p4945_p4 = scmp.ne.s32.totalorder %s6278_s24, %s4944_s3  ;;  %p4949_p9 = scmp.lt.s32.totalorder %s6278_s24, %s6333_s20 }
0x183d   : > { %p4950_p10 = scmp.lt.s32.totalorder %s4948_s0, %s4944_s3 }
0x183e   : > { %p4946_p7 = pnand %p4945_p4, %p5152_p5 }
0x183f   : > { %p4951_p11 = por %p4950_p10, %p4949_p9 }
0x1840   : > { %p4947_p8 = pneg %p4946_p7 }
0x1842   : > { %p4952_p12 = pnand %p4951_p11, %p4947_p8 }
0x1844   : > { %4955 = shalt.err (!%p4952_p12)
}
0x1845   : > { %4738 = dma.vmem_to_hbm [thread:$0]  (%p5152_p5), %s3919_s30, 16, %s6278_s24, %s3906_s5  }
0x1859   : > { %v3793_v15 = vpop.f32.mrf.mxu1 }
0x185b   : > { %v4719_v44 = vpop.f32.mrf.mxu1 }
0x185c PF: > { %s6410_s6 = sld [smem:[#allocation7_spill]] }
0x185d   : > { %s6411_s2 = sld [smem:[#allocation5_spill]] }
0x1862   : > { %p4744_p13 = scmp.ge.s32.totalorder %s6410_s6, 2 }
0x1863   : > { %s3930_s27 = sand.u32 1, %s6411_s2  }
0x1864   : > { %p4741_p0 = pnand %p4744_p13, %p5156_p6  ;;  %s3931_s1 = scalar_lea.sflag [#allocation3], %s3930_s27 }
0x1866   : > { %p4742_p1 = pneg %p4741_p0 }
0x1868   : > { %4973 = dma.done.wait (%p4742_p1), %s3931_s1, 16  }
0x1869   : > { %4975 = vsyncadd (%p4742_p1), %s3931_s1, 4294967280  ;;  %s6413_s24 = sld [smem:[#allocation8_spill]]  ;;  %s6416_s1 = smov %s4982_s22 }
0x186a   : > { %s6414_s3 = sld [smem:[#allocation6_spill]] }
0x186b   : > { %s6415_s23 = sld [smem:[#allocation9_spill]] }
0x186f   : > { %p30_p5 = scmp.ge.s32.totalorder %s6413_s24, 4  }
0x1870   : > { %s6417_s22 = smov %s6414_s3 }
0x1871   :  { %32 = sbr.rel (!%p30_p5) target bundleno = 11 (0xb), region = 147 }
0x1876   :  { %3935 = vsyncpa [#allocation3], 1 }
0x1877   :  { %3937 = vsyncpa [#allocation3 + $0x1], 1 }

</bundles_post_ra>
